<compile_context>
chip_gen: v6e
topology: v6e:2x2x1
jax: 0.10.0
libtpu: 0.0.40
codegen_flags: <defaults>
</compile_context>

<pallas_src>
import jax
import jax.numpy as jnp
from jax.experimental import pallas as pl
from jax.experimental.pallas import tpu as pltpu

NUM_CLASSES = 10
C_PAD = 128          # classifier output padded to a lane-dense width
LN_EPS = 1e-5        # F.layer_norm default
MASK_NEG = -1e30     # additive mask value for cross-sample attention entries


def _layer_norm(x):
    # F.layer_norm(x, [hidden]) with no affine params (f32).
    mu = jnp.mean(x, axis=-1, keepdims=True)
    var = jnp.mean(jnp.square(x - mu), axis=-1, keepdims=True)
    return (x - mu) * jax.lax.rsqrt(var + LN_EPS)


def _mm(a, w_bf16):
    # Activation cast to bf16 (no-op if already bf16); weight is pre-cast bf16;
    # f32 accumulation on the MXU.
    return jnp.dot(a.astype(jnp.bfloat16), w_bf16,
                   preferred_element_type=jnp.float32)


def mnist_transformer_kernel(
    x_ref,                                   # (M, D_in) bf16, M = tb*S
    mask_ref,                                # (M, M) f32 block-diagonal mask
    pool_ref,                                # (tb, M) bf16 averaging matrix
    w_in_ref, b_in_ref,                      # (D_in, H) bf16, (1, H) f32
    wqkv_ref, bqkv_ref,                      # (H, QKV_PAD) bf16, (1, QKV_PAD) f32
    wo_ref, bo_ref,                          # (H, H) bf16, (1, H) f32
    w1_ref, b1_ref,                          # (H, F) bf16, (1, F) f32
    w2_ref, b2_ref,                          # (F, H) bf16, (1, H) f32
    wc_ref, bc_ref,                          # (H, C_PAD) bf16, (1, C_PAD) f32
    out_ref,                                 # (tb, C_PAD) f32
):
    H = w_in_ref.shape[1]

    # x = input_projection(x)
    h = _mm(x_ref[...], w_in_ref[...]) + b_in_ref[...]               # (M, H) f32

    # z = layer_norm(x)
    z1 = _layer_norm(h)

    # x = attn(x): fused QKV projection (one lane-dense matmul), then a single
    # dense masked (M, M) attention instead of per-sample batched matmuls.
    qkv = _mm(h, wqkv_ref[...]) + bqkv_ref[...]                      # (M, QKV_PAD)
    q = qkv[:, 0:H]
    k = qkv[:, H:2 * H]
    v = qkv[:, 2 * H:3 * H]

    scale = 1.0 / (float(H) ** 0.5)
    s = jax.lax.dot_general(
        q.astype(jnp.bfloat16), k.astype(jnp.bfloat16),
        (((1,), (1,)), ((), ())),                                    # q @ k^T
        preferred_element_type=jnp.float32) * scale                  # (M, M)
    s = s + mask_ref[...]                                            # block-diag
    s_max = jnp.max(s, axis=-1, keepdims=True)
    p = jnp.exp(s - s_max)
    denom = jnp.sum(p, axis=-1, keepdims=True)
    p = p * (1.0 / denom)                                            # exact f32
    a = _mm(p, v.astype(jnp.bfloat16))                               # (M, H)
    a = _mm(a, wo_ref[...]) + bo_ref[...]

    # x = x + z
    h2 = a + z1

    # z = layer_norm(x)
    z2 = _layer_norm(h2)

    # x = linear2(relu(linear1(x)))
    f = jnp.maximum(_mm(h2, w1_ref[...]) + b1_ref[...], 0.0)
    f = _mm(f, w2_ref[...]) + b2_ref[...]

    # x = x + z ; per-sample sequence mean via pooling matmul ; classifier.
    h3 = f + z2
    pooled = _mm(pool_ref[...], h3.astype(jnp.bfloat16))             # (tb, H)
    logits = _mm(pooled, wc_ref[...]) + bc_ref[...]                  # (tb, C_PAD)
    out_ref[...] = logits.astype(out_ref.dtype)


def _choose_block_b(B):
    # v7x has 2 TensorCores/chip -> keep >= 2 parallel grid blocks.
    # v5e/v6e have 1 TensorCore -> process the whole batch in one grid step.
    try:
        kind = jax.devices()[0].device_kind.lower()
    except Exception:
        kind = ""
    if "7" in kind and B >= 2:
        return (B + 1) // 2
    return B


def mnist_transformer(x, params, block_b=None):
    B, S, D_in = x.shape
    H = params["w_in"].shape[1]
    C = params["wc"].shape[1]

    tb = block_b if block_b is not None else _choose_block_b(B)
    tb = max(1, min(tb, B))
    b_pad = pl.cdiv(B, tb) * tb
    if b_pad != B:
        # Pad batch; padded (zero) samples only attend to themselves and are
        # sliced off from the output.
        x = jnp.pad(x, ((0, b_pad - B), (0, 0), (0, 0)))
    M = tb * S

    # Pre-flatten to (rows, features) and pre-cast to bf16 (MXU operand dtype).
    x_flat = x.reshape(b_pad * S, D_in).astype(jnp.bfloat16)

    # Block-diagonal additive mask: attention stays inside each sample's S rows.
    sid = jnp.arange(M, dtype=jnp.int32) // S
    mask = jnp.where(sid[:, None] == sid[None, :], 0.0, MASK_NEG).astype(jnp.float32)

    # Block-averaging pooling matrix: pooled[b] = mean over that sample's rows.
    rows = jnp.arange(tb, dtype=jnp.int32)[:, None]
    cols = jnp.arange(M, dtype=jnp.int32)[None, :] // S
    pool = jnp.where(rows == cols, 1.0 / S, 0.0).astype(jnp.bfloat16)

    # Fused QKV weights, zero-padded to a lane-dense width.
    qkv_pad = pl.cdiv(3 * H, 128) * 128
    wqkv = jnp.concatenate([params["wq"], params["wk"], params["wv"]], axis=1)
    bqkv = jnp.concatenate([params["bq"], params["bk"], params["bv"]], axis=1)
    wqkv = jnp.pad(wqkv, ((0, 0), (0, qkv_pad - 3 * H)))
    bqkv = jnp.pad(bqkv, ((0, 0), (0, qkv_pad - 3 * H)))

    # Lane-dense classifier.
    wc_p = jnp.pad(params["wc"], ((0, 0), (0, C_PAD - C)))
    bc_p = jnp.pad(params["bc"], ((0, 0), (0, C_PAD - C)))

    bf = lambda w: w.astype(jnp.bfloat16)
    plist = [
        bf(params["w_in"]), params["b_in"],
        bf(wqkv), bqkv,
        bf(params["wo"]), params["bo"],
        bf(params["w1"]), params["b1"],
        bf(params["w2"]), params["b2"],
        bf(wc_p), bc_p,
    ]

    def replicated_spec(arr):
        # Constant index_map: DMA'd once, stays resident across grid steps.
        nd = arr.ndim
        return pl.BlockSpec(arr.shape, lambda b, _nd=nd: (0,) * _nd)

    in_specs = [pl.BlockSpec((M, D_in), lambda b: (b, 0)),
                replicated_spec(mask),
                replicated_spec(pool)]
    in_specs += [replicated_spec(p) for p in plist]

    out = pl.pallas_call(
        mnist_transformer_kernel,
        out_shape=jax.ShapeDtypeStruct((b_pad, C_PAD), jnp.float32),
        grid_spec=pltpu.PrefetchScalarGridSpec(
            num_scalar_prefetch=0,
            grid=(b_pad // tb,),
            in_specs=in_specs,
            out_specs=pl.BlockSpec((tb, C_PAD), lambda b: (b, 0)),
        ),
        compiler_params=pltpu.CompilerParams(dimension_semantics=("parallel",)),
    )(x_flat, mask, pool, *plist)
    return out[:B, :C]


def init_params(key, d_in, hidden, ffn_hidden, num_classes):
    ks = jax.random.split(key, 9)

    def lin(k, fan_in, fan_out):
        kw, kb = jax.random.split(k)
        bound = 1.0 / jnp.sqrt(jnp.float32(fan_in))
        w = jax.random.uniform(kw, (fan_in, fan_out), jnp.float32, -bound, bound)
        b = jax.random.uniform(kb, (1, fan_out), jnp.float32, -bound, bound)
        return w, b

    p = {}
    p["w_in"], p["b_in"] = lin(ks[0], d_in, hidden)
    p["wq"], p["bq"] = lin(ks[1], hidden, hidden)
    p["wk"], p["bk"] = lin(ks[2], hidden, hidden)
    p["wv"], p["bv"] = lin(ks[3], hidden, hidden)
    p["wo"], p["bo"] = lin(ks[4], hidden, hidden)
    p["w1"], p["b1"] = lin(ks[5], hidden, ffn_hidden)
    p["w2"], p["b2"] = lin(ks[6], ffn_hidden, hidden)
    p["wc"], p["bc"] = lin(ks[7], hidden, num_classes)
    return p


def reference_forward(x, p):
    # Pure-JAX f32 reference (matches the PyTorch forward).
    h = x @ p["w_in"] + p["b_in"]
    z1 = _layer_norm(h)
    q = h @ p["wq"] + p["bq"]
    k = h @ p["wk"] + p["bk"]
    v = h @ p["wv"] + p["bv"]
    s = jnp.einsum("bqd,bkd->bqk", q, k) / jnp.sqrt(jnp.float32(h.shape[-1]))
    a = jax.nn.softmax(s, axis=-1) @ v
    a = a @ p["wo"] + p["bo"]
    h2 = a + z1
    z2 = _layer_norm(h2)
    f = jnp.maximum(h2 @ p["w1"] + p["b1"], 0.0)
    f = f @ p["w2"] + p["b2"]
    h3 = f + z2
    return h3.mean(axis=1) @ p["wc"] + p["bc"]


if __name__ == "__main__":
    B, S, D_IN = 32, 8, 28        # D_IN fixed at 28 by nn.Linear(28, hidden_size)
    HIDDEN, FFN_HIDDEN = 32, 64

    key = jax.random.PRNGKey(0)
    k_x, k_p = jax.random.split(key)
    x = jax.random.normal(k_x, (B, S, D_IN), jnp.float32)
    params = init_params(k_p, D_IN, HIDDEN, FFN_HIDDEN, NUM_CLASSES)

    out = jax.block_until_ready(mnist_transformer(x, params))
    ref = jax.block_until_ready(reference_forward(x, params))
    assert out.shape == (B, NUM_CLASSES)
    # Tolerance for bf16 MXU operands (f32 accumulation).
    assert jnp.allclose(out, ref, atol=5e-2, rtol=5e-2), float(jnp.max(jnp.abs(out - ref)))
    print("KERNEL_OK")
</pallas_src>

<mosaic_0001>
module attributes {stable_mosaic.version = 11 : i64} {
  func.func @mnist_transformer_kernel(%arg0: i32, %arg1: memref<256x28xbf16, #tpu.memory_space<vmem>>, %arg2: memref<256x256xf32, #tpu.memory_space<vmem>>, %arg3: memref<32x256xbf16, #tpu.memory_space<vmem>>, %arg4: memref<28x32xbf16, #tpu.memory_space<vmem>>, %arg5: memref<1x32xf32, #tpu.memory_space<vmem>>, %arg6: memref<32x128xbf16, #tpu.memory_space<vmem>>, %arg7: memref<1x128xf32, #tpu.memory_space<vmem>>, %arg8: memref<32x32xbf16, #tpu.memory_space<vmem>>, %arg9: memref<1x32xf32, #tpu.memory_space<vmem>>, %arg10: memref<32x64xbf16, #tpu.memory_space<vmem>>, %arg11: memref<1x64xf32, #tpu.memory_space<vmem>>, %arg12: memref<64x32xbf16, #tpu.memory_space<vmem>>, %arg13: memref<1x32xf32, #tpu.memory_space<vmem>>, %arg14: memref<32x128xbf16, #tpu.memory_space<vmem>>, %arg15: memref<1x128xf32, #tpu.memory_space<vmem>>, %arg16: memref<32x128xf32, #tpu.memory_space<vmem>>) attributes {dimension_semantics = [#tpu.dimension_semantics<parallel>], iteration_bounds = array<i64: 1>, scalar_prefetch = 0 : i64, scratch_operands = 0 : i64, tpu.core_type = #tpu.core_type<tc>, window_params = [{transform_indices = @transform_0, window_bounds = array<i64: 256, 28>}, {pipeline_mode = #tpu.pipeline_mode<synchronous>, transform_indices = @transform_1, window_bounds = array<i64: 256, 256>}, {pipeline_mode = #tpu.pipeline_mode<synchronous>, transform_indices = @transform_2, window_bounds = array<i64: 32, 256>}, {pipeline_mode = #tpu.pipeline_mode<synchronous>, transform_indices = @transform_3, window_bounds = array<i64: 28, 32>}, {pipeline_mode = #tpu.pipeline_mode<synchronous>, transform_indices = @transform_4, window_bounds = array<i64: 1, 32>}, {pipeline_mode = #tpu.pipeline_mode<synchronous>, transform_indices = @transform_5, window_bounds = array<i64: 32, 128>}, {pipeline_mode = #tpu.pipeline_mode<synchronous>, transform_indices = @transform_6, window_bounds = array<i64: 1, 128>}, {pipeline_mode = #tpu.pipeline_mode<synchronous>, transform_indices = @transform_7, window_bounds = array<i64: 32, 32>}, {pipeline_mode = #tpu.pipeline_mode<synchronous>, transform_indices = @transform_8, window_bounds = array<i64: 1, 32>}, {pipeline_mode = #tpu.pipeline_mode<synchronous>, transform_indices = @transform_9, window_bounds = array<i64: 32, 64>}, {pipeline_mode = #tpu.pipeline_mode<synchronous>, transform_indices = @transform_10, window_bounds = array<i64: 1, 64>}, {pipeline_mode = #tpu.pipeline_mode<synchronous>, transform_indices = @transform_11, window_bounds = array<i64: 64, 32>}, {pipeline_mode = #tpu.pipeline_mode<synchronous>, transform_indices = @transform_12, window_bounds = array<i64: 1, 32>}, {pipeline_mode = #tpu.pipeline_mode<synchronous>, transform_indices = @transform_13, window_bounds = array<i64: 32, 128>}, {pipeline_mode = #tpu.pipeline_mode<synchronous>, transform_indices = @transform_14, window_bounds = array<i64: 1, 128>}, {transform_indices = @transform_15, window_bounds = array<i64: 32, 128>}]} {
    %c0 = arith.constant 0 : index
    %c0_0 = arith.constant 0 : index
    %0 = vector.load %arg1[%c0, %c0_0] : memref<256x28xbf16, #tpu.memory_space<vmem>>, vector<256x28xbf16>
    %c0_1 = arith.constant 0 : index
    %c0_2 = arith.constant 0 : index
    %1 = vector.load %arg4[%c0_1, %c0_2] : memref<28x32xbf16, #tpu.memory_space<vmem>>, vector<28x32xbf16>
    %cst = arith.constant dense<0.000000e+00> : vector<256x32xf32>
    %2 = tpu.matmul %0, %1, %cst {dimension_numbers = #tpu.dot_dimension_numbers<[1], [0], [0], [1], [0, 0, 1, 1], [], []>} : vector<256x28xbf16>, vector<28x32xbf16>, vector<256x32xf32> -> vector<256x32xf32>
    %c0_3 = arith.constant 0 : index
    %c0_4 = arith.constant 0 : index
    %3 = vector.load %arg5[%c0_3, %c0_4] : memref<1x32xf32, #tpu.memory_space<vmem>>, vector<1x32xf32>
    %4 = vector.broadcast %3 : vector<1x32xf32> to vector<256x32xf32>
    %5 = arith.addf %2, %4 : vector<256x32xf32>
    %cst_5 = arith.constant dense<0.000000e+00> : vector<256xf32>
    %6 = vector.multi_reduction <add>, %5, %cst_5 [1] : vector<256x32xf32> to vector<256xf32>
    %7 = vector.shape_cast %6 : vector<256xf32> to vector<256x1xf32>
    %cst_6 = arith.constant 3.200000e+01 : f32
    %8 = vector.broadcast %cst_6 : f32 to vector<256x1xf32>
    %9 = arith.divf %7, %8 : vector<256x1xf32>
    %10 = vector.broadcast %9 : vector<256x1xf32> to vector<256x32xf32>
    %11 = arith.subf %5, %10 : vector<256x32xf32>
    %12 = arith.mulf %11, %11 : vector<256x32xf32>
    %cst_7 = arith.constant dense<0.000000e+00> : vector<256xf32>
    %13 = vector.multi_reduction <add>, %12, %cst_7 [1] : vector<256x32xf32> to vector<256xf32>
    %14 = vector.shape_cast %13 : vector<256xf32> to vector<256x1xf32>
    %cst_8 = arith.constant 3.200000e+01 : f32
    %15 = vector.broadcast %cst_8 : f32 to vector<256x1xf32>
    %16 = arith.divf %14, %15 : vector<256x1xf32>
    %17 = vector.broadcast %9 : vector<256x1xf32> to vector<256x32xf32>
    %18 = arith.subf %5, %17 : vector<256x32xf32>
    %cst_9 = arith.constant 9.99999974E-6 : f32
    %19 = vector.broadcast %cst_9 : f32 to vector<256x1xf32>
    %20 = arith.addf %16, %19 : vector<256x1xf32>
    %21 = math.rsqrt %20 : vector<256x1xf32>
    %22 = vector.broadcast %21 : vector<256x1xf32> to vector<256x32xf32>
    %23 = arith.mulf %18, %22 : vector<256x32xf32>
    %c0_10 = arith.constant 0 : index
    %c0_11 = arith.constant 0 : index
    %24 = vector.load %arg6[%c0_10, %c0_11] : memref<32x128xbf16, #tpu.memory_space<vmem>>, vector<32x128xbf16>
    %25 = arith.truncf %5 : vector<256x32xf32> to vector<256x32xbf16>
    %cst_12 = arith.constant dense<0.000000e+00> : vector<256x128xf32>
    %26 = tpu.matmul %25, %24, %cst_12 {dimension_numbers = #tpu.dot_dimension_numbers<[1], [0], [0], [1], [0, 0, 1, 1], [], []>} : vector<256x32xbf16>, vector<32x128xbf16>, vector<256x128xf32> -> vector<256x128xf32>
    %c0_13 = arith.constant 0 : index
    %c0_14 = arith.constant 0 : index
    %27 = vector.load %arg7[%c0_13, %c0_14] : memref<1x128xf32, #tpu.memory_space<vmem>>, vector<1x128xf32>
    %28 = vector.broadcast %27 : vector<1x128xf32> to vector<256x128xf32>
    %29 = arith.addf %26, %28 : vector<256x128xf32>
    %30 = vector.extract_strided_slice %29 {offsets = [0, 0], sizes = [256, 32], strides = [1, 1]} : vector<256x128xf32> to vector<256x32xf32>
    %31 = vector.extract_strided_slice %29 {offsets = [0, 32], sizes = [256, 32], strides = [1, 1]} : vector<256x128xf32> to vector<256x32xf32>
    %32 = vector.extract_strided_slice %29 {offsets = [0, 64], sizes = [256, 32], strides = [1, 1]} : vector<256x128xf32> to vector<256x32xf32>
    %33 = arith.truncf %30 : vector<256x32xf32> to vector<256x32xbf16>
    %34 = arith.truncf %31 : vector<256x32xf32> to vector<256x32xbf16>
    %cst_15 = arith.constant dense<0.000000e+00> : vector<256x256xf32>
    %35 = tpu.matmul %33, %34, %cst_15 {dimension_numbers = #tpu.dot_dimension_numbers<[1], [1], [0], [0], [0, 0, 1, 0], [], []>} : vector<256x32xbf16>, vector<256x32xbf16>, vector<256x256xf32> -> vector<256x256xf32>
    %cst_16 = arith.constant 0.176776692 : f32
    %36 = vector.broadcast %cst_16 : f32 to vector<256x256xf32>
    %37 = arith.mulf %35, %36 : vector<256x256xf32>
    %c0_17 = arith.constant 0 : index
    %c0_18 = arith.constant 0 : index
    %38 = vector.load %arg2[%c0_17, %c0_18] : memref<256x256xf32, #tpu.memory_space<vmem>>, vector<256x256xf32>
    %39 = arith.addf %37, %38 : vector<256x256xf32>
    %cst_19 = arith.constant dense<0xFF800000> : vector<256xf32>
    %40 = vector.multi_reduction <maximumf>, %39, %cst_19 [1] : vector<256x256xf32> to vector<256xf32>
    %41 = vector.shape_cast %40 : vector<256xf32> to vector<256x1xf32>
    %42 = vector.broadcast %41 : vector<256x1xf32> to vector<256x256xf32>
    %43 = arith.subf %39, %42 : vector<256x256xf32>
    %44 = math.exp %43 : vector<256x256xf32>
    %cst_20 = arith.constant dense<0.000000e+00> : vector<256xf32>
    %45 = vector.multi_reduction <add>, %44, %cst_20 [1] : vector<256x256xf32> to vector<256xf32>
    %46 = vector.shape_cast %45 : vector<256xf32> to vector<256x1xf32>
    %cst_21 = arith.constant 1.000000e+00 : f32
    %47 = vector.broadcast %cst_21 : f32 to vector<256x1xf32>
    %48 = arith.divf %47, %46 : vector<256x1xf32>
    %49 = vector.broadcast %48 : vector<256x1xf32> to vector<256x256xf32>
    %50 = arith.mulf %44, %49 : vector<256x256xf32>
    %51 = arith.truncf %32 : vector<256x32xf32> to vector<256x32xbf16>
    %52 = arith.truncf %50 : vector<256x256xf32> to vector<256x256xbf16>
    %cst_22 = arith.constant dense<0.000000e+00> : vector<256x32xf32>
    %53 = tpu.matmul %52, %51, %cst_22 {dimension_numbers = #tpu.dot_dimension_numbers<[1], [0], [0], [1], [0, 0, 1, 1], [], []>} : vector<256x256xbf16>, vector<256x32xbf16>, vector<256x32xf32> -> vector<256x32xf32>
    %c0_23 = arith.constant 0 : index
    %c0_24 = arith.constant 0 : index
    %54 = vector.load %arg8[%c0_23, %c0_24] : memref<32x32xbf16, #tpu.memory_space<vmem>>, vector<32x32xbf16>
    %55 = arith.truncf %53 : vector<256x32xf32> to vector<256x32xbf16>
    %cst_25 = arith.constant dense<0.000000e+00> : vector<256x32xf32>
    %56 = tpu.matmul %55, %54, %cst_25 {dimension_numbers = #tpu.dot_dimension_numbers<[1], [0], [0], [1], [0, 0, 1, 1], [], []>} : vector<256x32xbf16>, vector<32x32xbf16>, vector<256x32xf32> -> vector<256x32xf32>
    %c0_26 = arith.constant 0 : index
    %c0_27 = arith.constant 0 : index
    %57 = vector.load %arg9[%c0_26, %c0_27] : memref<1x32xf32, #tpu.memory_space<vmem>>, vector<1x32xf32>
    %58 = vector.broadcast %57 : vector<1x32xf32> to vector<256x32xf32>
    %59 = arith.addf %56, %58 : vector<256x32xf32>
    %60 = arith.addf %59, %23 : vector<256x32xf32>
    %cst_28 = arith.constant dense<0.000000e+00> : vector<256xf32>
    %61 = vector.multi_reduction <add>, %60, %cst_28 [1] : vector<256x32xf32> to vector<256xf32>
    %62 = vector.shape_cast %61 : vector<256xf32> to vector<256x1xf32>
    %cst_29 = arith.constant 3.200000e+01 : f32
    %63 = vector.broadcast %cst_29 : f32 to vector<256x1xf32>
    %64 = arith.divf %62, %63 : vector<256x1xf32>
    %65 = vector.broadcast %64 : vector<256x1xf32> to vector<256x32xf32>
    %66 = arith.subf %60, %65 : vector<256x32xf32>
    %67 = arith.mulf %66, %66 : vector<256x32xf32>
    %cst_30 = arith.constant dense<0.000000e+00> : vector<256xf32>
    %68 = vector.multi_reduction <add>, %67, %cst_30 [1] : vector<256x32xf32> to vector<256xf32>
    %69 = vector.shape_cast %68 : vector<256xf32> to vector<256x1xf32>
    %cst_31 = arith.constant 3.200000e+01 : f32
    %70 = vector.broadcast %cst_31 : f32 to vector<256x1xf32>
    %71 = arith.divf %69, %70 : vector<256x1xf32>
    %72 = vector.broadcast %64 : vector<256x1xf32> to vector<256x32xf32>
    %73 = arith.subf %60, %72 : vector<256x32xf32>
    %cst_32 = arith.constant 9.99999974E-6 : f32
    %74 = vector.broadcast %cst_32 : f32 to vector<256x1xf32>
    %75 = arith.addf %71, %74 : vector<256x1xf32>
    %76 = math.rsqrt %75 : vector<256x1xf32>
    %77 = vector.broadcast %76 : vector<256x1xf32> to vector<256x32xf32>
    %78 = arith.mulf %73, %77 : vector<256x32xf32>
    %c0_33 = arith.constant 0 : index
    %c0_34 = arith.constant 0 : index
    %79 = vector.load %arg10[%c0_33, %c0_34] : memref<32x64xbf16, #tpu.memory_space<vmem>>, vector<32x64xbf16>
    %80 = arith.truncf %60 : vector<256x32xf32> to vector<256x32xbf16>
    %cst_35 = arith.constant dense<0.000000e+00> : vector<256x64xf32>
    %81 = tpu.matmul %80, %79, %cst_35 {dimension_numbers = #tpu.dot_dimension_numbers<[1], [0], [0], [1], [0, 0, 1, 1], [], []>} : vector<256x32xbf16>, vector<32x64xbf16>, vector<256x64xf32> -> vector<256x64xf32>
    %c0_36 = arith.constant 0 : index
    %c0_37 = arith.constant 0 : index
    %82 = vector.load %arg11[%c0_36, %c0_37] : memref<1x64xf32, #tpu.memory_space<vmem>>, vector<1x64xf32>
    %83 = vector.broadcast %82 : vector<1x64xf32> to vector<256x64xf32>
    %84 = arith.addf %81, %83 : vector<256x64xf32>
    %cst_38 = arith.constant 0.000000e+00 : f32
    %85 = vector.broadcast %cst_38 : f32 to vector<256x64xf32>
    %86 = arith.maximumf %84, %85 : vector<256x64xf32>
    %c0_39 = arith.constant 0 : index
    %c0_40 = arith.constant 0 : index
    %87 = vector.load %arg12[%c0_39, %c0_40] : memref<64x32xbf16, #tpu.memory_space<vmem>>, vector<64x32xbf16>
    %88 = arith.truncf %86 : vector<256x64xf32> to vector<256x64xbf16>
    %cst_41 = arith.constant dense<0.000000e+00> : vector<256x32xf32>
    %89 = tpu.matmul %88, %87, %cst_41 {dimension_numbers = #tpu.dot_dimension_numbers<[1], [0], [0], [1], [0, 0, 1, 1], [], []>} : vector<256x64xbf16>, vector<64x32xbf16>, vector<256x32xf32> -> vector<256x32xf32>
    %c0_42 = arith.constant 0 : index
    %c0_43 = arith.constant 0 : index
    %90 = vector.load %arg13[%c0_42, %c0_43] : memref<1x32xf32, #tpu.memory_space<vmem>>, vector<1x32xf32>
    %91 = vector.broadcast %90 : vector<1x32xf32> to vector<256x32xf32>
    %92 = arith.addf %89, %91 : vector<256x32xf32>
    %93 = arith.addf %92, %78 : vector<256x32xf32>
    %c0_44 = arith.constant 0 : index
    %c0_45 = arith.constant 0 : index
    %94 = vector.load %arg3[%c0_44, %c0_45] : memref<32x256xbf16, #tpu.memory_space<vmem>>, vector<32x256xbf16>
    %95 = arith.truncf %93 : vector<256x32xf32> to vector<256x32xbf16>
    %cst_46 = arith.constant dense<0.000000e+00> : vector<32x32xf32>
    %96 = tpu.matmul %94, %95, %cst_46 {dimension_numbers = #tpu.dot_dimension_numbers<[1], [0], [0], [1], [0, 0, 1, 1], [], []>} : vector<32x256xbf16>, vector<256x32xbf16>, vector<32x32xf32> -> vector<32x32xf32>
    %c0_47 = arith.constant 0 : index
    %c0_48 = arith.constant 0 : index
    %97 = vector.load %arg14[%c0_47, %c0_48] : memref<32x128xbf16, #tpu.memory_space<vmem>>, vector<32x128xbf16>
    %98 = arith.truncf %96 : vector<32x32xf32> to vector<32x32xbf16>
    %cst_49 = arith.constant dense<0.000000e+00> : vector<32x128xf32>
    %99 = tpu.matmul %98, %97, %cst_49 {dimension_numbers = #tpu.dot_dimension_numbers<[1], [0], [0], [1], [0, 0, 1, 1], [], []>} : vector<32x32xbf16>, vector<32x128xbf16>, vector<32x128xf32> -> vector<32x128xf32>
    %c0_50 = arith.constant 0 : index
    %c0_51 = arith.constant 0 : index
    %100 = vector.load %arg15[%c0_50, %c0_51] : memref<1x128xf32, #tpu.memory_space<vmem>>, vector<1x128xf32>
    %101 = vector.broadcast %100 : vector<1x128xf32> to vector<32x128xf32>
    %102 = arith.addf %99, %101 : vector<32x128xf32>
    %c0_52 = arith.constant 0 : index
    %c0_53 = arith.constant 0 : index
    %103 = vector.load %arg16[%c0_52, %c0_53] : memref<32x128xf32, #tpu.memory_space<vmem>>, vector<32x128xf32>
    tpu.vector_store %arg16[%c0_52, %c0_53], %102 {strides = array<i32>} : memref<32x128xf32, #tpu.memory_space<vmem>>, vector<32x128xf32>,
    return
  }
  func.func @transform_0(%arg0: i32) -> (i32, i32) {
    %c0_i32 = arith.constant 0 : i32
    %c0_i32_0 = arith.constant 0 : i32
    return %arg0, %c0_i32 : i32, i32
  }
  func.func @transform_1(%arg0: i32) -> (i32, i32) {
    %c0_i32 = arith.constant 0 : i32
    %c0_i32_0 = arith.constant 0 : i32
    %c0_i32_1 = arith.constant 0 : i32
    return %c0_i32, %c0_i32_0 : i32, i32
  }
  func.func @transform_2(%arg0: i32) -> (i32, i32) {
    %c0_i32 = arith.constant 0 : i32
    %c0_i32_0 = arith.constant 0 : i32
    %c0_i32_1 = arith.constant 0 : i32
    return %c0_i32, %c0_i32_0 : i32, i32
  }
  func.func @transform_3(%arg0: i32) -> (i32, i32) {
    %c0_i32 = arith.constant 0 : i32
    %c0_i32_0 = arith.constant 0 : i32
    %c0_i32_1 = arith.constant 0 : i32
    return %c0_i32, %c0_i32_0 : i32, i32
  }
  func.func @transform_4(%arg0: i32) -> (i32, i32) {
    %c0_i32 = arith.constant 0 : i32
    %c0_i32_0 = arith.constant 0 : i32
    %c0_i32_1 = arith.constant 0 : i32
    return %c0_i32, %c0_i32_0 : i32, i32
  }
  func.func @transform_5(%arg0: i32) -> (i32, i32) {
    %c0_i32 = arith.constant 0 : i32
    %c0_i32_0 = arith.constant 0 : i32
    %c0_i32_1 = arith.constant 0 : i32
    return %c0_i32, %c0_i32_0 : i32, i32
  }
  func.func @transform_6(%arg0: i32) -> (i32, i32) {
    %c0_i32 = arith.constant 0 : i32
    %c0_i32_0 = arith.constant 0 : i32
    %c0_i32_1 = arith.constant 0 : i32
    return %c0_i32, %c0_i32_0 : i32, i32
  }
  func.func @transform_7(%arg0: i32) -> (i32, i32) {
    %c0_i32 = arith.constant 0 : i32
    %c0_i32_0 = arith.constant 0 : i32
    %c0_i32_1 = arith.constant 0 : i32
    return %c0_i32, %c0_i32_0 : i32, i32
  }
  func.func @transform_8(%arg0: i32) -> (i32, i32) {
    %c0_i32 = arith.constant 0 : i32
    %c0_i32_0 = arith.constant 0 : i32
    %c0_i32_1 = arith.constant 0 : i32
    return %c0_i32, %c0_i32_0 : i32, i32
  }
  func.func @transform_9(%arg0: i32) -> (i32, i32) {
    %c0_i32 = arith.constant 0 : i32
    %c0_i32_0 = arith.constant 0 : i32
    %c0_i32_1 = arith.constant 0 : i32
    return %c0_i32, %c0_i32_0 : i32, i32
  }
  func.func @transform_10(%arg0: i32) -> (i32, i32) {
    %c0_i32 = arith.constant 0 : i32
    %c0_i32_0 = arith.constant 0 : i32
    %c0_i32_1 = arith.constant 0 : i32
    return %c0_i32, %c0_i32_0 : i32, i32
  }
  func.func @transform_11(%arg0: i32) -> (i32, i32) {
    %c0_i32 = arith.constant 0 : i32
    %c0_i32_0 = arith.constant 0 : i32
    %c0_i32_1 = arith.constant 0 : i32
    return %c0_i32, %c0_i32_0 : i32, i32
  }
  func.func @transform_12(%arg0: i32) -> (i32, i32) {
    %c0_i32 = arith.constant 0 : i32
    %c0_i32_0 = arith.constant 0 : i32
    %c0_i32_1 = arith.constant 0 : i32
    return %c0_i32, %c0_i32_0 : i32, i32
  }
  func.func @transform_13(%arg0: i32) -> (i32, i32) {
    %c0_i32 = arith.constant 0 : i32
    %c0_i32_0 = arith.constant 0 : i32
    %c0_i32_1 = arith.constant 0 : i32
    return %c0_i32, %c0_i32_0 : i32, i32
  }
  func.func @transform_14(%arg0: i32) -> (i32, i32) {
    %c0_i32 = arith.constant 0 : i32
    %c0_i32_0 = arith.constant 0 : i32
    %c0_i32_1 = arith.constant 0 : i32
    return %c0_i32, %c0_i32_0 : i32, i32
  }
  func.func @transform_15(%arg0: i32) -> (i32, i32) {
    %c0_i32 = arith.constant 0 : i32
    %c0_i32_0 = arith.constant 0 : i32
    return %arg0, %c0_i32 : i32, i32
  }
}

</mosaic_0001>

<bundles_post_ra>
// kernel: tpu_custom_call.1
= control target key start
LH: loop header
LB: loop body
LE: loop exit
PB: predicated region body
PF: predicated region fallthrough
CT: control target
= control target key end

     0   :  { %20 = vsyncpa [#allocation3], 0  ;;  %s7002_s0 = inlined_call_operand.vmem [shape: bf16[256,28], index: 0, kind: input, shape index: {}]   ;;  %s7003_s1 = inlined_call_operand.hbm [shape: f32[256,256], index: 1, kind: input, shape index: {}]   ;;  %s7004_s2 = inlined_call_operand.vmem [shape: bf16[32,256], index: 2, kind: input, shape index: {}]   ;;  %s7005_s3 = inlined_call_operand.vmem [shape: bf16[28,32], index: 3, kind: input, shape index: {}]   ;;  %s7006_s4 = inlined_call_operand.vmem [shape: f32[1,32], index: 4, kind: input, shape index: {}]   ;;  %s7007_s5 = inlined_call_operand.vmem [shape: bf16[32,128], index: 5, kind: input, shape index: {}]   ;;  %s7008_s6 = inlined_call_operand.vmem [shape: f32[1,128], index: 6, kind: input, shape index: {}]   ;;  %s7009_s7 = inlined_call_operand.vmem [shape: bf16[32,32], index: 7, kind: input, shape index: {}]   ;;  %s7010_s8 = inlined_call_operand.vmem [shape: f32[1,32], index: 8, kind: input, shape index: {}]   ;;  %s7011_s9 = inlined_call_operand.vmem [shape: bf16[32,64], index: 9, kind: input, shape index: {}]   ;;  %s7012_s10 = inlined_call_operand.vmem [shape: f32[1,64], index: 10, kind: input, shape index: {}]   ;;  %s7013_s11 = inlined_call_operand.vmem [shape: bf16[64,32], index: 11, kind: input, shape index: {}]   ;;  %s7014_s12 = inlined_call_operand.vmem [shape: f32[1,32], index: 12, kind: input, shape index: {}]   ;;  %s7015_s13 = inlined_call_operand.vmem [shape: bf16[32,128], index: 13, kind: input, shape index: {}]   ;;  %s7016_s14 = inlined_call_operand.vmem [shape: f32[1,128], index: 14, kind: input, shape index: {}]   ;;  %s7017_s15 = inlined_call_operand.hbm [shape: f32[32,128], index: 15, kind: output, shape index: {}]  }
   0x1   :  { %21 = vsyncpa [#allocation4], 0  ;;  %s4876_s18 = smov [#allocation2]  }
   0x2   :  { %s29_s19 = sshll.u32 %s4876_s18, 4  ;;  %s30_s19 = int_to_ptr.vmem [resolvable:$true] %s29_s19 }
   0x3   :  { %s4840_s20 = scalar_lea.vmem %s30_s19, 8192  ;;  %p4845_p1 = scmp.lt.s32.totalorder %s30_s19, %s30_s19 }
   0x4   :  { %p4841_p0 = scmp.ne.s32.totalorder %s30_s19, %s4840_s20  ;;  %p4846_p2 = scmp.lt.s32.totalorder %s4840_s20, %s4840_s20 }
   0x6   :  { %p4847_p3 = por %p4846_p2, %p4845_p1 }
   0x8   :  { %p4848_p4 = pnand %p4847_p3, %p4841_p0 }
   0xa   :  { %4851 = shalt.err (!%p4848_p4)
}
   0xb   :  { %s4877_s21 = smov 256   ;;  %s4878_s22 = smov 16  }
   0xc   :  { %35 = dma.hbm_to_vmem [thread:$0]  %s7003_s1, 8192, %s30_s19, [#allocation3], %s4877_s21, %s4877_s21, %s4878_s22  }
   0xd   :  { %4872 = dma.done.wait [#allocation3], 8192  }
   0xe   :  { %4873 = vsyncadd [#allocation3], 4294959104  ;;  %vm249_vm0 = vcmask 1045504   ;;  %v4476_v0 = vld [vmem:[%s7005_s3 + $0x8] sm:$0x3f]   ;;  %v4477_v1 = vld [vmem:[%s7005_s3] sm:$0xff]  }
   0xf   :  { %vm200_vm1 = vcmask 228352   ;;  %4459 = vmatprep.subr.msk.bf16.mxu0 %vm249_vm0, %v4476_v0  ;;  %v251_v2 = vsel %vm249_vm0, %v4476_v0, 0  ;;  %v4478_v3 = vld [vmem:[%s7002_s0] sm:$0xff]   ;;  %v4479_v4 = vld [vmem:[%s7002_s0 + $0x8] sm:$0xff]   ;;  %v4480_v5 = vld [vmem:[%s7002_s0 + $0x10] sm:$0xff]   ;;  %vm414_vm2 = vcmask 261120  }
  0x10   :  { %4264 = vmatpush3.bf16.msra.mxu0 %v251_v2  ;;  %4267 = vmatprep.mubr.msk.bf16.mxu0 %vm200_vm1, %v4478_v3  ;;  %v4481_v6 = vld [vmem:[%s7002_s0 + $0x18] sm:$0xff]   ;;  %v4482_v7 = vld [vmem:[%s7002_s0 + $0x20] sm:$0xff]   ;;  %v4483_v8 = vld [vmem:[%s7002_s0 + $0x28] sm:$0xff]   ;;  %vm3409_vm3 = vcmask 523264   ;;  %s4881_s22 = smov [#allocation5]  }
  0x11   :  { %4265 = vmatprep.subr.bf16.mxu0 %v4477_v1  ;;  %v4484_v9 = vld [vmem:[%s7002_s0 + $0x30] sm:$0xff]   ;;  %v4485_v10 = vld [vmem:[%s7002_s0 + $0x38] sm:$0xff]   ;;  %v4486_v11 = vld [vmem:[%s7002_s0 + $0x40] sm:$0xff]  }
  0x12   :  { %v4487_v12 = vld [vmem:[%s7002_s0 + $0x48] sm:$0xff]   ;;  %v4488_v13 = vld [vmem:[%s7002_s0 + $0x50] sm:$0xff]   ;;  %v4489_v14 = vld [vmem:[%s7002_s0 + $0x58] sm:$0xff]  }
  0x13   :  { %v4490_v15 = vld [vmem:[%s7002_s0 + $0x60] sm:$0xff]   ;;  %v4491_v16 = vld [vmem:[%s7002_s0 + $0x68] sm:$0xff]   ;;  %v4492_v17 = vld [vmem:[%s7002_s0 + $0x70] sm:$0xff]  }
  0x14   :  { %4266 = vmatpush3.bf16.msra.mxu0 %v4477_v1  ;;  %v4493_v18 = vld [vmem:[%s7002_s0 + $0x78] sm:$0xff]   ;;  %v4494_v19 = vld [vmem:[%s7007_s5 + $0x8] sm:$0xff]   ;;  %v4495_v20 = vld [vmem:[%s7007_s5] sm:$0xff]   ;;  %s4879_s5 = smov 96  }
  0x15   :  { %4299 = vmatprep.subr.bf16.mxu1 %v4494_v19  ;;  %v5046_v24 = vld [vmem:[%s7006_s4] ss:$0 sm:$0xff] }
  0x16   :  { %4300 = vmatpush3.bf16.msra.mxu1 %v4494_v19 }
  0x17   :  { %4268 = vmatmul.mubr.msk.bf16.vlgmr.msra.gmra.mxu0 %vm200_vm1, %v4479_v4  ;;  %4301 = vmatprep.subr.bf16.mxu1 %v4495_v20 }
  0x18   :  { %4271 = vmatprep.mubr.msk.bf16.mxu0 %vm200_vm1, %v4480_v5 }
  0x1a   :  { %4302 = vmatpush3.bf16.msra.mxu1 %v4495_v20 }
  0x1f   :  { %4272 = vmatmul.mubr.msk.bf16.gmra.mxu0 %vm200_vm1, %v4481_v6 }
  0x20   :  { %4275 = vmatprep.mubr.msk.bf16.mxu0 %vm200_vm1, %v4482_v7 }
  0x27   :  { %4276 = vmatmul.mubr.msk.bf16.gmra.mxu0 %vm200_vm1, %v4483_v8 }
  0x28   :  { %4279 = vmatprep.mubr.msk.bf16.mxu0 %vm200_vm1, %v4484_v9 }
  0x2f   :  { %4280 = vmatmul.mubr.msk.bf16.gmra.mxu0 %vm200_vm1, %v4485_v10 }
  0x30   :  { %4283 = vmatprep.mubr.msk.bf16.mxu0 %vm200_vm1, %v4486_v11 }
  0x37   :  { %4284 = vmatmul.mubr.msk.bf16.gmra.mxu0 %vm200_vm1, %v4487_v12 }
  0x38   :  { %4287 = vmatprep.mubr.msk.bf16.mxu0 %vm200_vm1, %v4488_v13 }
  0x3f   :  { %4288 = vmatmul.mubr.msk.bf16.gmra.mxu0 %vm200_vm1, %v4489_v14 }
  0x40   :  { %4291 = vmatprep.mubr.msk.bf16.mxu0 %vm200_vm1, %v4490_v15 }
  0x47   :  { %4292 = vmatmul.mubr.msk.bf16.gmra.mxu0 %vm200_vm1, %v4491_v16 }
  0x48   :  { %4295 = vmatprep.mubr.msk.bf16.mxu0 %vm200_vm1, %v4492_v17 }
  0x4f   :  { %4296 = vmatmul.mubr.msk.bf16.gmra.mxu0 %vm200_vm1, %v4493_v18 }
  0xd7   :  { %v4269_v21 = vpop.f32.mrf.mxu0 }
  0xd8   :  { %v5058_v29 = vadd.f32 %v4269_v21, %v5046_v24 }
  0xd9   :  { %v287_v22 = vpop.f32.mrf.mxu0 }
  0xda   :  { %v5052_v27 = vadd.f32 %v5046_v24, %v287_v22  ;;  %7131 = vst [vmem:[#allocation11_spill] sm:$0xff] %v5058_v29 }
  0xdb   :  { %v4270_v23 = vpop.f32.mrf.mxu0 }
  0xdc   :  { %v5049_v25 = vadd.f32 %v4270_v23, %v5046_v24  ;;  %7129 = vst [vmem:[#allocation9_spill] sm:$0xff] %v5052_v27 }
  0xdd   :  { %v290_v26 = vpop.f32.mrf.mxu0 }
  0xde   :  { %7128 = vst [vmem:[#allocation8_spill] sm:$0xff] %v5049_v25  ;;  %v5055_v28 = vadd.f32 %v5046_v24, %v290_v26  ;;  %v837_v32 = vpack.c.bf16 %v5049_v25, %v5058_v29  ;;  %v1530_v29 = vld [vmem:[#allocation2 + $0x108] sm:$0xff] }
  0xdf   :  { %v4273_v30 = vpop.f32.mrf.mxu0 }
  0xe0   :  { %7130 = vst [vmem:[#allocation10_spill] sm:$0xff] %v5055_v28  ;;  %v836_v31 = vpack.c.bf16 %v5055_v28, %v5052_v27  ;;  %v5076_v39 = vadd.f32 %v4273_v30, %v5046_v24 }
  0xe1   :  { %v303_v33 = vpop.f32.mrf.mxu0 }
  0xe2   :  { %4303 = vmatprep.mubr.msk.bf16.mxu1 %vm414_vm2, %v836_v31  ;;  %v5070_v37 = vadd.f32 %v5046_v24, %v303_v33  ;;  %7135 = vst [vmem:[#allocation15_spill] sm:$0xff] %v5076_v39 }
  0xe3   :  { %v4274_v34 = vpop.f32.mrf.mxu0  ;;  %4304 = vmatmul.mubr.msk.bf16.vlgmr.msra.gmra.mxu1 %vm414_vm2, %v837_v32 }
  0xe4   :  { %v5067_v35 = vadd.f32 %v4274_v34, %v5046_v24  ;;  %7133 = vst [vmem:[#allocation13_spill] sm:$0xff] %v5070_v37 }
  0xe5   :  { %v306_v36 = vpop.f32.mrf.mxu0 }
  0xe6   :  { %7132 = vst [vmem:[#allocation12_spill] sm:$0xff] %v5067_v35  ;;  %v5073_v38 = vadd.f32 %v5046_v24, %v306_v36  ;;  %v839_v42 = vpack.c.bf16 %v5067_v35, %v5076_v39  ;;  %v1526_v35 = vld [vmem:[#allocation2 + $0xe8] sm:$0xff] }
  0xe7   :  { %v4277_v40 = vpop.f32.mrf.mxu0 }
  0xe8   :  { %7134 = vst [vmem:[#allocation14_spill] sm:$0xff] %v5073_v38  ;;  %v838_v41 = vpack.c.bf16 %v5073_v38, %v5070_v37  ;;  %v5094_v49 = vadd.f32 %v4277_v40, %v5046_v24  ;;  %v1525_v38 = vld [vmem:[#allocation2 + $0xe0] sm:$0xff]  ;;  %v1528_v37 = vld [vmem:[#allocation2 + $0xf8] sm:$0xff] }
  0xe9   :  { %v319_v43 = vpop.f32.mrf.mxu0 }
  0xea   :  { %4307 = vmatprep.mubr.msk.bf16.mxu1 %vm414_vm2, %v838_v41  ;;  %v5088_v47 = vadd.f32 %v5046_v24, %v319_v43  ;;  %7139 = vst [vmem:[#allocation19_spill] sm:$0xff] %v5094_v49 }
  0xeb   :  { %v4278_v44 = vpop.f32.mrf.mxu0  ;;  %4308 = vmatmul.mubr.msk.bf16.gmra.mxu1 %vm414_vm2, %v839_v42 }
  0xec   :  { %v5085_v45 = vadd.f32 %v4278_v44, %v5046_v24  ;;  %7137 = vst [vmem:[#allocation17_spill] sm:$0xff] %v5088_v47 }
  0xed   :  { %v322_v46 = vpop.f32.mrf.mxu0 }
  0xee   :  { %7136 = vst [vmem:[#allocation16_spill] sm:$0xff] %v5085_v45  ;;  %v5091_v48 = vadd.f32 %v5046_v24, %v322_v46  ;;  %v841_v52 = vpack.c.bf16 %v5085_v45, %v5094_v49 }
  0xef   :  { %v4281_v50 = vpop.f32.mrf.mxu0 }
  0xf0   :  { %7138 = vst [vmem:[#allocation18_spill] sm:$0xff] %v5091_v48  ;;  %v840_v51 = vpack.c.bf16 %v5091_v48, %v5088_v47  ;;  %v5112_v59 = vadd.f32 %v4281_v50, %v5046_v24 }
  0xf1   :  { %v335_v53 = vpop.f32.mrf.mxu0 }
  0xf2   :  { %4311 = vmatprep.mubr.msk.bf16.mxu1 %vm414_vm2, %v840_v51  ;;  %v5106_v57 = vadd.f32 %v5046_v24, %v335_v53  ;;  %7143 = vst [vmem:[#allocation23_spill] sm:$0xff] %v5112_v59  ;;  %v5195_v51 = vld [vmem:[%s7008_s6] ss:$0 sm:$0xff]  ;;  %s4880_s6 = smov 64  }
  0xf3   :  { %v4282_v54 = vpop.f32.mrf.mxu0  ;;  %4312 = vmatmul.mubr.msk.bf16.gmra.mxu1 %vm414_vm2, %v841_v52 }
  0xf4   :  { %v5103_v55 = vadd.f32 %v4282_v54, %v5046_v24  ;;  %7141 = vst [vmem:[#allocation21_spill] sm:$0xff] %v5106_v57 }
  0xf5   :  { %v338_v56 = vpop.f32.mrf.mxu0 }
  0xf6   :  { %7140 = vst [vmem:[#allocation20_spill] sm:$0xff] %v5103_v55  ;;  %v5109_v58 = vadd.f32 %v5046_v24, %v338_v56  ;;  %v843_v62 = vpack.c.bf16 %v5103_v55, %v5112_v59 }
  0xf7   :  { %v4285_v60 = vpop.f32.mrf.mxu0 }
  0xf8   :  { %7142 = vst [vmem:[#allocation22_spill] sm:$0xff] %v5109_v58  ;;  %v842_v61 = vpack.c.bf16 %v5109_v58, %v5106_v57  ;;  %v5130_v5 = vadd.f32 %v4285_v60, %v5046_v24 }
  0xf9   :  { %v351_v63 = vpop.f32.mrf.mxu0 }
  0xfa   :  { %4315 = vmatprep.mubr.msk.bf16.mxu1 %vm414_vm2, %v842_v61  ;;  %v5124_v3 = vadd.f32 %v5046_v24, %v351_v63  ;;  %7147 = vst [vmem:[#allocation27_spill] sm:$0xff] %v5130_v5 }
  0xfb   :  { %v4286_v0 = vpop.f32.mrf.mxu0  ;;  %4316 = vmatmul.mubr.msk.bf16.gmra.mxu1 %vm414_vm2, %v843_v62 }
  0xfc   :  { %v5121_v1 = vadd.f32 %v4286_v0, %v5046_v24  ;;  %7145 = vst [vmem:[#allocation25_spill] sm:$0xff] %v5124_v3 }
  0xfd   :  { %v354_v2 = vpop.f32.mrf.mxu0 }
  0xfe   :  { %7144 = vst [vmem:[#allocation24_spill] sm:$0xff] %v5121_v1  ;;  %v5127_v4 = vadd.f32 %v5046_v24, %v354_v2  ;;  %v845_v8 = vpack.c.bf16 %v5121_v1, %v5130_v5 }
  0xff   :  { %v4289_v6 = vpop.f32.mrf.mxu0 }
 0x100   :  { %7146 = vst [vmem:[#allocation26_spill] sm:$0xff] %v5127_v4  ;;  %v844_v7 = vpack.c.bf16 %v5127_v4, %v5124_v3  ;;  %v5148_v15 = vadd.f32 %v4289_v6, %v5046_v24 }
 0x101   :  { %v367_v9 = vpop.f32.mrf.mxu0 }
 0x102   :  { %4319 = vmatprep.mubr.msk.bf16.mxu1 %vm414_vm2, %v844_v7  ;;  %v5142_v13 = vadd.f32 %v5046_v24, %v367_v9  ;;  %7151 = vst [vmem:[#allocation31_spill] sm:$0xff] %v5148_v15 }
 0x103   :  { %v4290_v10 = vpop.f32.mrf.mxu0  ;;  %4320 = vmatmul.mubr.msk.bf16.gmra.mxu1 %vm414_vm2, %v845_v8 }
 0x104   :  { %v5139_v11 = vadd.f32 %v4290_v10, %v5046_v24  ;;  %7149 = vst [vmem:[#allocation29_spill] sm:$0xff] %v5142_v13 }
 0x105   :  { %v370_v12 = vpop.f32.mrf.mxu0 }
 0x106   :  { %7148 = vst [vmem:[#allocation28_spill] sm:$0xff] %v5139_v11  ;;  %v5145_v14 = vadd.f32 %v5046_v24, %v370_v12  ;;  %v847_v18 = vpack.c.bf16 %v5139_v11, %v5148_v15 }
 0x107   :  { %v4293_v16 = vpop.f32.mrf.mxu0 }
 0x108   :  { %7150 = vst [vmem:[#allocation30_spill] sm:$0xff] %v5145_v14  ;;  %v846_v17 = vpack.c.bf16 %v5145_v14, %v5142_v13  ;;  %v5166_v30 = vadd.f32 %v4293_v16, %v5046_v24 }
 0x109   :  { %v383_v19 = vpop.f32.mrf.mxu0 }
 0x10a   :  { %4323 = vmatprep.mubr.msk.bf16.mxu1 %vm414_vm2, %v846_v17  ;;  %v5160_v23 = vadd.f32 %v5046_v24, %v383_v19  ;;  %7155 = vst [vmem:[#allocation35_spill] sm:$0xff] %v5166_v30 }
 0x10b   :  { %v4294_v20 = vpop.f32.mrf.mxu0  ;;  %4324 = vmatmul.mubr.msk.bf16.gmra.mxu1 %vm414_vm2, %v847_v18 }
 0x10c   :  { %v5157_v21 = vadd.f32 %v4294_v20, %v5046_v24  ;;  %7153 = vst [vmem:[#allocation33_spill] sm:$0xff] %v5160_v23 }
 0x10d   :  { %v386_v22 = vpop.f32.mrf.mxu0 }
 0x10e   :  { %7152 = vst [vmem:[#allocation32_spill] sm:$0xff] %v5157_v21  ;;  %v5163_v26 = vadd.f32 %v5046_v24, %v386_v22  ;;  %v849_v33 = vpack.c.bf16 %v5157_v21, %v5166_v30 }
 0x10f   :  { %v4297_v31 = vpop.f32.mrf.mxu0 }
 0x110   :  { %7154 = vst [vmem:[#allocation34_spill] sm:$0xff] %v5163_v26  ;;  %v848_v32 = vpack.c.bf16 %v5163_v26, %v5160_v23  ;;  %v5184_v44 = vadd.f32 %v4297_v31, %v5046_v24 }
 0x111   :  { %v399_v34 = vpop.f32.mrf.mxu0 }
 0x112   :  { %4327 = vmatprep.mubr.msk.bf16.mxu1 %vm414_vm2, %v848_v32  ;;  %v5178_v42 = vadd.f32 %v5046_v24, %v399_v34  ;;  %7159 = vst [vmem:[#allocation39_spill] sm:$0xff] %v5184_v44 }
 0x113   :  { %v4298_v36 = vpop.f32.mrf.mxu0  ;;  %4328 = vmatmul.mubr.msk.bf16.gmra.mxu1 %vm414_vm2, %v849_v33 }
 0x114   :  { %v5175_v40 = vadd.f32 %v4298_v36, %v5046_v24  ;;  %7157 = vst [vmem:[#allocation37_spill] sm:$0xff] %v5178_v42 }
 0x115   :  { %v402_v41 = vpop.f32.mrf.mxu0 }
 0x116   :  { %7156 = vst [vmem:[#allocation36_spill] sm:$0xff] %v5175_v40  ;;  %v5181_v43 = vadd.f32 %v5046_v24, %v402_v41  ;;  %v851_v50 = vpack.c.bf16 %v5175_v40, %v5184_v44 }
 0x118   :  { %7158 = vst [vmem:[#allocation38_spill] sm:$0xff] %v5181_v43  ;;  %v850_v46 = vpack.c.bf16 %v5181_v43, %v5178_v42 }
 0x11a   :  { %4331 = vmatprep.mubr.msk.bf16.mxu1 %vm414_vm2, %v850_v46 }
 0x11b   :  { %4332 = vmatmul.mubr.msk.bf16.gmra.mxu1 %vm414_vm2, %v851_v50 }
 0x1a3   :  { %v4305_v52 = vpop.f32.mrf.mxu1 }
 0x1a4   :  { %v962_v53 = vadd.f32 %v4305_v52, %v5195_v51 }
 0x1a5   :  { %v953_v24 = vpop.f32.mrf.mxu1 }
 0x1a6   :  { %v954_v61 = vadd.f32 %v5195_v51, %v953_v24 }
 0x1a7   :  { %v4306_v54 = vpop.f32.mrf.mxu1 }
 0x1a8   :  { %v965_v56 = vadd.f32 %v4306_v54, %v5195_v51 }
 0x1a9   :  { %v956_v60 = vpop.f32.mrf.mxu1 }
 0x1aa   :  { %v5200_v62 = vpack.c.bf16 %v965_v56, %v962_v53  ;;  %v957_v63 = vadd.f32 %v5195_v51, %v956_v60 }
 0x1ab   :  { %v4309_v0 = vpop.f32.mrf.mxu1 }
 0x1ac   :  { %v5203_v2 = vpack.c.bf16 %v957_v63, %v954_v61  ;;  %v978_v6 = vadd.f32 %v4309_v0, %v5195_v51 }
 0x1ad   :  { %v969_v7 = vpop.f32.mrf.mxu1 }
 0x1ae   :  { %v970_v8 = vadd.f32 %v5195_v51, %v969_v7  ;;  %4031 = vmatprep.mubr.msk.bf16.mxu0 %vm414_vm2, %v5203_v2 }
 0x1af   :  { %v4310_v9 = vpop.f32.mrf.mxu1 }
 0x1b0   :  { %v981_v10 = vadd.f32 %v4310_v9, %v5195_v51 }
 0x1b1   :  { %v972_v12 = vpop.f32.mrf.mxu1 }
 0x1b2   :  { %v5210_v16 = vpack.c.bf16 %v981_v10, %v978_v6  ;;  %v973_v17 = vadd.f32 %v5195_v51, %v972_v12 }
 0x1b3   :  { %v4313_v18 = vpop.f32.mrf.mxu1 }
 0x1b4   :  { %v5213_v19 = vpack.c.bf16 %v973_v17, %v970_v8  ;;  %v994_v43 = vadd.f32 %v4313_v18, %v5195_v51 }
 0x1b5   :  { %v985_v20 = vpop.f32.mrf.mxu1 }
 0x1b7   :  { %v4314_v22 = vpop.f32.mrf.mxu1 }
 0x1b9   :  { %v988_v31 = vpop.f32.mrf.mxu1 }
 0x1bb   :  { %v4317_v32 = vpop.f32.mrf.mxu1 }
 0x1bc   :  { %v1010_v36 = vadd.f32 %v4317_v32, %v5195_v51 }
 0x1bd   :  { %v1001_v33 = vpop.f32.mrf.mxu1 }
 0x1be   :  { %v1002_v50 = vadd.f32 %v5195_v51, %v1001_v33 }
 0x1bf   :  { %v4318_v34 = vpop.f32.mrf.mxu1 }
 0x1c0   :  { %v1013_v41 = vadd.f32 %v4318_v34, %v5195_v51 }
 0x1c1   :  { %v1004_v46 = vpop.f32.mrf.mxu1 }
 0x1c2   :  { %v5218_v52 = vpack.c.bf16 %v1013_v41, %v1010_v36  ;;  %v1005_v53 = vadd.f32 %v5195_v51, %v1004_v46  ;;  %v997_v46 = vadd.f32 %v4314_v22, %v5195_v51 }
 0x1c3   :  { %v4321_v24 = vpop.f32.mrf.mxu1 }
 0x1c4   :  { %v5221_v54 = vpack.c.bf16 %v1005_v53, %v1002_v50  ;;  %1126 = vrot.lane.b32.xlu0 %v5218_v52, %s4879_s5 }
 0x1c5   :  { %v1017_v56 = vpop.f32.mrf.mxu1 }
 0x1c6   :  { %1124 = vrot.lane.b32.xlu1 %v5221_v54, %s4879_s5 }
 0x1c7   :  { %v4322_v60 = vpop.f32.mrf.mxu1 }
 0x1c9   :  { %v1020_v61 = vpop.f32.mrf.mxu1 }
 0x1cb   :  { %v4325_v63 = vpop.f32.mrf.mxu1 }
 0x1cd   :  { %v1033_v0 = vpop.f32.mrf.mxu1 }
 0x1cf   :  { %v4326_v6 = vpop.f32.mrf.mxu1 }
 0x1d1   :  { %v1036_v7 = vpop.f32.mrf.mxu1 }
 0x1d3   :  { %v4329_v8 = vpop.f32.mrf.mxu1 }
 0x1d4   :  { %v1058_v22 = vadd.f32 %v4329_v8, %v5195_v51 }
 0x1d5   :  { %v1049_v9 = vpop.f32.mrf.mxu1 }
 0x1d7   :  { %v4330_v10 = vpop.f32.mrf.mxu1 }
 0x1d8   :  { %v1061_v21 = vadd.f32 %v4330_v10, %v5195_v51  ;;  %v1037_v10 = vadd.f32 %v5195_v51, %v1036_v7 }
 0x1d9   :  { %v1052_v12 = vpop.f32.mrf.mxu1 }
 0x1da   :  { %v1053_v18 = vadd.f32 %v5195_v51, %v1052_v12 }
 0x1db   :  { %v4333_v17 = vpop.f32.mrf.mxu1 }
 0x1dc   :  { %v1074_v34 = vadd.f32 %v4333_v17, %v5195_v51  ;;  %v5240_v17 = vpack.c.bf16 %v997_v46, %v994_v43  ;;  %v1050_v43 = vadd.f32 %v5195_v51, %v1049_v9  ;;  %v1034_v9 = vadd.f32 %v5195_v51, %v1033_v0 }
 0x1dd   :  { %v1065_v32 = vpop.f32.mrf.mxu1  ;;  %v1018_v0 = vadd.f32 %v5195_v51, %v1017_v56 }
 0x1de   :  { %v1066_v50 = vadd.f32 %v5195_v51, %v1065_v32  ;;  %v986_v32 = vadd.f32 %v5195_v51, %v985_v20  ;;  %v5258_v8 = vpack.c.bf16 %v1053_v18, %v1050_v43  ;;  %v5274_v12 = vpack.c.bf16 %v1037_v10, %v1034_v9 }
 0x1df   :  { %v4334_v33 = vpop.f32.mrf.mxu1 }
 0x1e0   :  { %v1077_v36 = vadd.f32 %v4334_v33, %v5195_v51  ;;  %v989_v33 = vadd.f32 %v5195_v51, %v988_v31  ;;  %v1045_v31 = vadd.f32 %v4326_v6, %v5195_v51  ;;  %v1029_v6 = vadd.f32 %v4322_v60, %v5195_v51 }
 0x1e1   :  { %v1068_v41 = vpop.f32.mrf.mxu1 }
 0x1e2   :  { %v5231_v53 = vpack.c.bf16 %v1077_v36, %v1074_v34  ;;  %v1069_v40 = vadd.f32 %v5195_v51, %v1068_v41  ;;  %v5247_v34 = vpack.c.bf16 %v1061_v21, %v1058_v22  ;;  %v1042_v21 = vadd.f32 %v4325_v63, %v5195_v51 }
 0x1e3   :  { %v1026_v63 = vadd.f32 %v4321_v24, %v5195_v51  ;;  %v1021_v36 = vadd.f32 %v5195_v51, %v1020_v61 }
 0x1e4   :  { %v5236_v44 = vpack.c.bf16 %v1069_v40, %v1066_v50  ;;  %1142 = vrot.lane.b32.xlu0 %v5231_v53, %s4879_s5  ;;  %v5252_v40 = vpack.c.bf16 %v989_v33, %v986_v32  ;;  %v5265_v20 = vpack.c.bf16 %v1045_v31, %v1042_v21 }
 0x1e5   :  { %v5281_v7 = vpack.c.bf16 %v1029_v6, %v1026_v63  ;;  %v5289_v60 = vpack.c.bf16 %v1021_v36, %v1018_v0 }
 0x1e6   :  { %1140 = vrot.lane.b32.xlu1 %v5236_v44, %s4879_s5 }
 0x1e8   :  { %1122 = vrot.lane.b32.xlu0 %v5240_v17, %s4879_s5 }
 0x1ea   :  { %1138 = vrot.lane.b32.xlu1 %v5247_v34, %s4879_s5 }
 0x1ec   :  { %1120 = vrot.lane.b32.xlu0 %v5252_v40, %s4879_s5 }
 0x1ee   :  { %1136 = vrot.lane.b32.xlu1 %v5258_v8, %s4879_s5 }
 0x1f0   :  { %1118 = vrot.lane.b32.xlu0 %v5210_v16, %s4879_s5 }
 0x1f2   :  { %1134 = vrot.lane.b32.xlu1 %v5265_v20, %s4879_s5 }
 0x1f4   :  { %1116 = vrot.lane.b32.xlu0 %v5213_v19, %s4879_s5 }
 0x1f6   :  { %1132 = vrot.lane.b32.xlu1 %v5274_v12, %s4879_s5 }
 0x1f8   :  { %1114 = vrot.lane.b32.xlu0 %v5200_v62, %s4879_s5 }
 0x1fa   :  { %1130 = vrot.lane.b32.xlu1 %v5281_v7, %s4879_s5 }
 0x1fc   :  { %1112 = vrot.lane.b32.xlu0 %v5203_v2, %s4879_s5 }
 0x1fe   :  { %1128 = vrot.lane.b32.xlu1 %v5289_v60, %s4879_s5 }
 0x200   :  { %2183 = vrot.lane.b32.xlu0 %v5218_v52, %s4880_s6 }
 0x202   :  { %2199 = vrot.lane.b32.xlu1 %v5231_v53, %s4880_s6 }
 0x204   :  { %2179 = vrot.lane.b32.xlu0 %v5240_v17, %s4880_s6 }
 0x206   :  { %2181 = vrot.lane.b32.xlu1 %v5221_v54, %s4880_s6 }
 0x208   :  { %2175 = vrot.lane.b32.xlu0 %v5210_v16, %s4880_s6 }
 0x20a   :  { %2195 = vrot.lane.b32.xlu1 %v5247_v34, %s4880_s6 }
 0x20e   :  { %2193 = vrot.lane.b32.xlu1 %v5258_v8, %s4880_s6 }
 0x212   :  { %2177 = vrot.lane.b32.xlu1 %v5252_v40, %s4880_s6 }
 0x216   :  { %2191 = vrot.lane.b32.xlu1 %v5265_v20, %s4880_s6 }
 0x21a   :  { %2189 = vrot.lane.b32.xlu1 %v5274_v12, %s4880_s6 }
 0x21e   :  { %2173 = vrot.lane.b32.xlu1 %v5213_v19, %s4880_s6 }
 0x222   :  { %2187 = vrot.lane.b32.xlu1 %v5281_v7, %s4880_s6 }
 0x226   :  { %2197 = vrot.lane.b32.xlu1 %v5236_v44, %s4880_s6 }
 0x236   :  { %v1127_v51 = vpop.permute.xlu0 %1126 }
 0x237   :  { %v1214_v61 = vsel %vm414_vm2, %v1127_v51, 0 }
 0x238   :  { %v1125_v24 = vpop.permute.xlu1 %1124 }
 0x239   :  { %v1211_v22 = vsel %vm414_vm2, %v1125_v24, 0 }
 0x256   :  { %v1143_v56 = vpop.permute.xlu0 %1142 }
 0x257   :  { %4460 = vmatprep.subr.msk.bf16.mxu0 %vm414_vm2, %v1143_v56 }
 0x258   :  { %4016 = vmatpush3.bf16.xpose.msra.mxu0 %v1214_v61  ;;  %v1141_v41 = vpop.permute.xlu1 %1140 }
 0x259   :  { %4461 = vmatprep.subr.msk.bf16.mxu0 %vm414_vm2, %v1141_v41 }
 0x25a   :  { %v1123_v46 = vpop.permute.xlu0 %1122 }
 0x25b   :  { %v1208_v21 = vsel %vm414_vm2, %v1123_v46, 0 }
 0x25c   :  { %v1139_v50 = vpop.permute.xlu1 %1138 }
 0x25e   :  { %v1121_v33 = vpop.permute.xlu0 %1120 }
 0x25f   :  { %v1205_v63 = vsel %vm414_vm2, %v1121_v33, 0 }
 0x260   :  { %4018 = vmatpush3.bf16.xpose.msra.mxu0 %v1211_v22  ;;  %v1137_v32 = vpop.permute.xlu1 %1136 }
 0x261   :  { %4462 = vmatprep.subr.msk.bf16.mxu0 %vm414_vm2, %v1139_v50 }
 0x262   :  { %v1119_v18 = vpop.permute.xlu0 %1118 }
 0x263   :  { %v1202_v56 = vsel %vm414_vm2, %v1119_v18, 0 }
 0x264   :  { %v1135_v43 = vpop.permute.xlu1 %1134 }
 0x266   :  { %v1117_v31 = vpop.permute.xlu0 %1116 }
 0x267   :  { %v1199_v46 = vsel %vm414_vm2, %v1117_v31, 0 }
 0x268   :  { %4020 = vmatpush3.bf16.xpose.msra.mxu0 %v1208_v21  ;;  %v1133_v10 = vpop.permute.xlu1 %1132 }
 0x269   :  { %4463 = vmatprep.subr.msk.bf16.mxu0 %vm414_vm2, %v1137_v32 }
 0x26a   :  { %v1115_v9 = vpop.permute.xlu0 %1114 }
 0x26b   :  { %v1196_v22 = vsel %vm414_vm2, %v1115_v9, 0 }
 0x26c   :  { %v1131_v6 = vpop.permute.xlu1 %1130 }
 0x26e   :  { %v1113_v36 = vpop.permute.xlu0 %1112 }
 0x26f   :  { %v1193_v18 = vsel %vm414_vm2, %v1113_v36, 0 }
 0x270   :  { %v1129_v0 = vpop.permute.xlu1 %1128  ;;  %4022 = vmatpush3.bf16.xpose.msra.mxu0 %v1205_v63  ;;  %v1500_v63 = vld [vmem:[#allocation2 + $0x18] sm:$0xff] }
 0x271   :  { %4464 = vmatprep.subr.msk.bf16.mxu0 %vm414_vm2, %v1135_v43 }
 0x272   :  { %v2184_v24 = vpop.permute.xlu0 %2183 }
 0x274   :  { %v2200_v51 = vpop.permute.xlu1 %2199 }
 0x275   :  { %4063 = vmatprep.subr.bf16.mxu1 %v2200_v51 }
 0x276   :  { %4064 = vmatpush3.bf16.msra.mxu1 %v2184_v24  ;;  %v2180_v9 = vpop.permute.xlu0 %2179 }
 0x278   :  { %v2182_v61 = vpop.permute.xlu1 %2181  ;;  %4024 = vmatpush3.bf16.xpose.msra.mxu0 %v1202_v56 }
 0x279   :  { %4465 = vmatprep.subr.msk.bf16.mxu0 %vm414_vm2, %v1133_v10 }
 0x27c   :  { %v2196_v41 = vpop.permute.xlu1 %2195 }
 0x280   :  { %v2194_v50 = vpop.permute.xlu1 %2193  ;;  %4026 = vmatpush3.bf16.xpose.msra.mxu0 %v1199_v46  ;;  %v1502_v46 = vld [vmem:[#allocation2 + $0x28] sm:$0xff] }
 0x281   :  { %4466 = vmatprep.subr.msk.bf16.mxu0 %vm414_vm2, %v1131_v6  ;;  %v2176_v6 = vpop.permute.xlu0 %2175 }
 0x284   :  { %v2178_v33 = vpop.permute.xlu1 %2177 }
 0x288   :  { %v2192_v32 = vpop.permute.xlu1 %2191  ;;  %4028 = vmatpush3.bf16.xpose.msra.mxu0 %v1196_v22 }
 0x289   :  { %4467 = vmatprep.subr.msk.bf16.mxu0 %vm414_vm2, %v1129_v0 }
 0x28c   :  { %v2190_v43 = vpop.permute.xlu1 %2189 }
 0x290   :  { %v2174_v21 = vpop.permute.xlu1 %2173  ;;  %4030 = vmatpush3.bf16.xpose.msra.mxu0 %v1193_v18 }
 0x294   :  { %v2188_v10 = vpop.permute.xlu1 %2187 }
 0x297   :  { %4032 = vmatmul.mubr.msk.bf16.vlgmr.msra.gmra.mxu0 %vm414_vm2, %v5203_v2 }
 0x298   :  { %v2198_v31 = vpop.permute.xlu1 %2197  ;;  %4033 = vmatprep.mubr.msk.bf16.mxu0 %vm414_vm2, %v5200_v62 }
 0x299   :  { %4065 = vmatprep.subr.bf16.mxu1 %v2198_v31  ;;  %v1504_v31 = vld [vmem:[#allocation2 + $0x38] sm:$0xff] }
 0x29a   :  { %4066 = vmatpush3.bf16.msra.mxu1 %v2182_v61  ;;  %v1501_v61 = vld [vmem:[#allocation2 + $0x20] sm:$0xff] }
 0x29b   :  { %4067 = vmatprep.subr.bf16.mxu1 %v2196_v41 }
 0x29e   :  { %4068 = vmatpush3.bf16.msra.mxu1 %v2180_v9 }
 0x29f   :  { %4034 = vmatmul.mubr.msk.bf16.gmra.mxu0 %vm414_vm2, %v5200_v62  ;;  %4069 = vmatprep.subr.bf16.mxu1 %v2194_v50 }
 0x2a0   :  { %4035 = vmatprep.mubr.msk.bf16.mxu0 %vm414_vm2, %v5213_v19 }
 0x2a2   :  { %4070 = vmatpush3.bf16.msra.mxu1 %v2178_v33 }
 0x2a3   :  { %4071 = vmatprep.subr.bf16.mxu1 %v2192_v32 }
 0x2a6   :  { %4072 = vmatpush3.bf16.msra.mxu1 %v2176_v6 }
 0x2a7   :  { %4036 = vmatmul.mubr.msk.bf16.gmra.mxu0 %vm414_vm2, %v5213_v19  ;;  %4073 = vmatprep.subr.bf16.mxu1 %v2190_v43 }
 0x2a8   :  { %4037 = vmatprep.mubr.msk.bf16.mxu0 %vm414_vm2, %v5210_v16 }
 0x2aa   :  { %4074 = vmatpush3.bf16.msra.mxu1 %v2174_v21  ;;  %v1503_v21 = vld [vmem:[#allocation2 + $0x30] sm:$0xff] }
 0x2ab   :  { %4075 = vmatprep.subr.bf16.mxu1 %v2188_v10 }
 0x2af   :  { %4038 = vmatmul.mubr.msk.bf16.gmra.mxu0 %vm414_vm2, %v5210_v16 }
 0x2b0   :  { %4039 = vmatprep.mubr.msk.bf16.mxu0 %vm414_vm2, %v5252_v40 }
 0x2b7   :  { %4040 = vmatmul.mubr.msk.bf16.gmra.mxu0 %vm414_vm2, %v5252_v40 }
 0x2b8   :  { %4041 = vmatprep.mubr.msk.bf16.mxu0 %vm414_vm2, %v5240_v17 }
 0x2bf   :  { %4042 = vmatmul.mubr.msk.bf16.gmra.mxu0 %vm414_vm2, %v5240_v17  ;;  %v1498_v17 = vld [vmem:[#allocation2 + $0x8] sm:$0xff] }
 0x2c0   :  { %4043 = vmatprep.mubr.msk.bf16.mxu0 %vm414_vm2, %v5221_v54 }
 0x2c7   :  { %4044 = vmatmul.mubr.msk.bf16.gmra.mxu0 %vm414_vm2, %v5221_v54 }
 0x2c8   :  { %4045 = vmatprep.mubr.msk.bf16.mxu0 %vm414_vm2, %v5218_v52 }
 0x2cf   :  { %4046 = vmatmul.mubr.msk.bf16.gmra.mxu0 %vm414_vm2, %v5218_v52  ;;  %v1497_v52 = vld [vmem:[#allocation2] sm:$0xff] }
 0x2d0   :  { %4047 = vmatprep.mubr.msk.bf16.mxu0 %vm414_vm2, %v5289_v60 }
 0x2d7   :  { %4048 = vmatmul.mubr.msk.bf16.gmra.mxu0 %vm414_vm2, %v5289_v60 }
 0x2d8   :  { %4049 = vmatprep.mubr.msk.bf16.mxu0 %vm414_vm2, %v5281_v7 }
 0x2df   :  { %4050 = vmatmul.mubr.msk.bf16.gmra.mxu0 %vm414_vm2, %v5281_v7  ;;  %v1499_v7 = vld [vmem:[#allocation2 + $0x10] sm:$0xff] }
 0x2e0   :  { %4051 = vmatprep.mubr.msk.bf16.mxu0 %vm414_vm2, %v5274_v12 }
 0x2e7   :  { %4052 = vmatmul.mubr.msk.bf16.gmra.mxu0 %vm414_vm2, %v5274_v12 }
 0x2e8   :  { %4053 = vmatprep.mubr.msk.bf16.mxu0 %vm414_vm2, %v5265_v20 }
 0x2ef   :  { %4054 = vmatmul.mubr.msk.bf16.gmra.mxu0 %vm414_vm2, %v5265_v20 }
 0x2f0   :  { %4055 = vmatprep.mubr.msk.bf16.mxu0 %vm414_vm2, %v5258_v8 }
 0x2f7   :  { %4056 = vmatmul.mubr.msk.bf16.gmra.mxu0 %vm414_vm2, %v5258_v8 }
 0x2f8   :  { %4057 = vmatprep.mubr.msk.bf16.mxu0 %vm414_vm2, %v5247_v34 }
 0x2ff   :  { %4058 = vmatmul.mubr.msk.bf16.gmra.mxu0 %vm414_vm2, %v5247_v34 }
 0x300   :  { %4059 = vmatprep.mubr.msk.bf16.mxu0 %vm414_vm2, %v5236_v44 }
 0x307   :  { %4060 = vmatmul.mubr.msk.bf16.gmra.mxu0 %vm414_vm2, %v5236_v44 }
 0x308   :  { %4061 = vmatprep.mubr.msk.bf16.mxu0 %vm414_vm2, %v5231_v53 }
 0x30f   :  { %4062 = vmatmul.mubr.msk.bf16.gmra.mxu0 %vm414_vm2, %v5231_v53 }
 0x357   :  { %v1274_v16 = vpop.f32.mrf.mxu0 }
 0x358   :  { %v1433_v19 = vmul.f32 0.17677669, %v1274_v16 }
 0x359   :  { %v1276_v54 = vpop.f32.mrf.mxu0 }
 0x35a   :  { %v1434_v40 = vmul.f32 0.17677669, %v1276_v54  ;;  %v5399_v34 = vadd.f32 %v1497_v52, %v1433_v19 }
 0x35b   :  { %v1278_v8 = vpop.f32.mrf.mxu0 }
 0x35c   :  { %v5401_v20 = vadd.f32 %v1498_v17, %v1434_v40  ;;  %v1435_v12 = vmul.f32 0.17677669, %v1278_v8  ;;  %v1505_v17 = vld [vmem:[#allocation2 + $0x40] sm:$0xff]  ;;  %v1506_v8 = vld [vmem:[#allocation2 + $0x48] sm:$0xff] }
 0x35d   :  { %v1280_v44 = vpop.f32.mrf.mxu0 }
 0x35e   :  { %v1436_v36 = vmul.f32 0.17677669, %v1280_v44  ;;  %v1625_v0 = vmax.f32 %v5399_v34, %v5401_v20  ;;  %v5405_v51 = vadd.f32 %v1499_v7, %v1435_v12 }
 0x35f   :  { %v1284_v53 = vpop.f32.mrf.mxu0 }
 0x360   :  { %v1437_v24 = vmul.f32 0.17677669, %v1284_v53  ;;  %1626 = vmax.xlane.f32.xlu0 %v1625_v0  ;;  %v5407_v56 = vadd.f32 %v1500_v63, %v1436_v36  ;;  %v1507_v53 = vld [vmem:[#allocation2 + $0x50] sm:$0xff] }
 0x361   :  { %v1286_v41 = vpop.f32.mrf.mxu0 }
 0x362   :  { %v1438_v50 = vmul.f32 0.17677669, %v1286_v41  ;;  %v1628_v33 = vmax.f32 %v5405_v51, %v5407_v56  ;;  %v5411_v32 = vadd.f32 %v1501_v61, %v1437_v24  ;;  %v1508_v61 = vld [vmem:[#allocation2 + $0x58] sm:$0xff] }
 0x363   :  { %v1288_v22 = vpop.f32.mrf.mxu0 }
 0x364   :  { %v5413_v43 = vadd.f32 %v1502_v46, %v1438_v50  ;;  %v1439_v18 = vmul.f32 0.17677669, %v1288_v22  ;;  %1629 = vmax.xlane.f32.xlu1 %v1628_v33 }
 0x365   :  { %v1290_v10 = vpop.f32.mrf.mxu0 }
 0x366   :  { %v1440_v9 = vmul.f32 0.17677669, %v1290_v10  ;;  %v1631_v6 = vmax.f32 %v5411_v32, %v5413_v43  ;;  %v5417_v19 = vadd.f32 %v1503_v21, %v1439_v18  ;;  %v1509_v21 = vld [vmem:[#allocation2 + $0x60] sm:$0xff] }
 0x367   :  { %v1294_v16 = vpop.f32.mrf.mxu0 }
 0x368   :  { %v1441_v52 = vmul.f32 0.17677669, %v1294_v16  ;;  %1632 = vmax.xlane.f32.xlu0 %v1631_v6  ;;  %v5419_v54 = vadd.f32 %v1504_v31, %v1440_v9  ;;  %v1510_v31 = vld [vmem:[#allocation2 + $0x68] sm:$0xff] }
 0x369   :  { %v1296_v40 = vpop.f32.mrf.mxu0 }
 0x36a   :  { %v1442_v12 = vmul.f32 0.17677669, %v1296_v40  ;;  %v1634_v7 = vmax.f32 %v5417_v19, %v5419_v54  ;;  %v5423_v63 = vadd.f32 %v1505_v17, %v1441_v52 }
 0x36b   :  { %v1298_v44 = vpop.f32.mrf.mxu0 }
 0x36c   :  { %v5425_v36 = vadd.f32 %v1506_v8, %v1442_v12  ;;  %v1443_v0 = vmul.f32 0.17677669, %v1298_v44  ;;  %1635 = vmax.xlane.f32.xlu0 %v1634_v7  ;;  %v1511_v8 = vld [vmem:[#allocation2 + $0x70] sm:$0xff]  ;;  %v1512_v7 = vld [vmem:[#allocation2 + $0x78] sm:$0xff] }
 0x36d   :  { %v1300_v24 = vpop.f32.mrf.mxu0 }
 0x36e   :  { %v1444_v41 = vmul.f32 0.17677669, %v1300_v24  ;;  %v1637_v46 = vmax.f32 %v5423_v63, %v5425_v36  ;;  %v5429_v33 = vadd.f32 %v1507_v53, %v1443_v0 }
 0x36f   :  { %v1304_v50 = vpop.f32.mrf.mxu0 }
 0x370   :  { %v5431_v22 = vadd.f32 %v1508_v61, %v1444_v41  ;;  %v1445_v18 = vmul.f32 0.17677669, %v1304_v50  ;;  %1638 = vmax.xlane.f32.xlu1 %v1637_v46  ;;  %v1513_v46 = vld [vmem:[#allocation2 + $0x80] sm:$0xff] }
 0x371   :  { %v1306_v10 = vpop.f32.mrf.mxu0 }
 0x372   :  { %v1446_v9 = vmul.f32 0.17677669, %v1306_v10  ;;  %v1640_v6 = vmax.f32 %v5429_v33, %v5431_v22  ;;  %v5435_v52 = vadd.f32 %v1509_v21, %v1445_v18  ;;  %v1514_v18 = vld [vmem:[#allocation2 + $0x88] sm:$0xff] }
 0x373   :  { %v1308_v16 = vpop.f32.mrf.mxu0 }
 0x374   :  { %v5437_v17 = vadd.f32 %v1510_v31, %v1446_v9  ;;  %v1447_v40 = vmul.f32 0.17677669, %v1308_v16  ;;  %1641 = vmax.xlane.f32.xlu0 %v1640_v6 }
 0x375   :  { %v1310_v12 = vpop.f32.mrf.mxu0 }
 0x376   :  { %v1448_v44 = vmul.f32 0.17677669, %v1310_v12  ;;  %v1643_v0 = vmax.f32 %v5435_v52, %v5437_v17  ;;  %v5441_v24 = vadd.f32 %v1511_v8, %v1447_v40  ;;  %v1515_v40 = vld [vmem:[#allocation2 + $0x90] sm:$0xff]  ;;  %v1516_v12 = vld [vmem:[#allocation2 + $0x98] sm:$0xff] }
 0x377   :  { %v1314_v53 = vpop.f32.mrf.mxu0 }
 0x378   :  { %v5443_v61 = vadd.f32 %v1512_v7, %v1448_v44  ;;  %v1449_v41 = vmul.f32 0.17677669, %v1314_v53  ;;  %1644 = vmax.xlane.f32.xlu1 %v1643_v0 }
 0x379   :  { %v1316_v50 = vpop.f32.mrf.mxu0 }
 0x37a   :  { %v1450_v21 = vmul.f32 0.17677669, %v1316_v50  ;;  %v1646_v10 = vmax.f32 %v5441_v24, %v5443_v61  ;;  %v5447_v9 = vadd.f32 %v1513_v46, %v1449_v41  ;;  %v1517_v41 = vld [vmem:[#allocation2 + $0xa0] sm:$0xff] }
 0x37b   :  { %v1318_v31 = vpop.f32.mrf.mxu0 }
 0x37c   :  { %v5449_v6 = vadd.f32 %v1514_v18, %v1450_v21  ;;  %v1451_v16 = vmul.f32 0.17677669, %v1318_v31  ;;  %1647 = vmax.xlane.f32.xlu0 %v1646_v10  ;;  %v1518_v18 = vld [vmem:[#allocation2 + $0xa8] sm:$0xff] }
 0x37d   :  { %v1320_v8 = vpop.f32.mrf.mxu0 }
 0x37e   :  { %v1452_v7 = vmul.f32 0.17677669, %v1320_v8  ;;  %v1649_v44 = vmax.f32 %v5447_v9, %v5449_v6  ;;  %v5453_v53 = vadd.f32 %v1515_v40, %v1451_v16  ;;  %v1519_v16 = vld [vmem:[#allocation2 + $0xb0] sm:$0xff] }
 0x37f   :  { %v1324_v0 = vpop.f32.mrf.mxu0 }
 0x380   :  { %v5455_v50 = vadd.f32 %v1516_v12, %v1452_v7  ;;  %v1453_v26 = vmul.f32 0.17677669, %v1324_v0  ;;  %1650 = vmax.xlane.f32.xlu1 %v1649_v44  ;;  %v1520_v12 = vld [vmem:[#allocation2 + $0xb8] sm:$0xff] }
 0x381   :  { %v1326_v46 = vpop.f32.mrf.mxu0 }
 0x382   :  { %v1454_v21 = vmul.f32 0.17677669, %v1326_v46  ;;  %v1652_v10 = vmax.f32 %v5453_v53, %v5455_v50  ;;  %v5459_v42 = vadd.f32 %v1517_v41, %v1453_v26  ;;  %v1521_v26 = vld [vmem:[#allocation2 + $0xc0] sm:$0xff] }
 0x383   :  { %v1328_v31 = vpop.f32.mrf.mxu0 }
 0x384   :  { %7160 = vst [vmem:[#allocation40_spill] sm:$0xff] %v5459_v42  ;;  %v5461_v8 = vadd.f32 %v1518_v18, %v1454_v21  ;;  %v1455_v11 = vmul.f32 0.17677669, %v1328_v31  ;;  %1653 = vmax.xlane.f32.xlu0 %v1652_v10  ;;  %v1522_v18 = vld [vmem:[#allocation2 + $0xc8] sm:$0xff] }
 0x385   :  { %v1330_v40 = vpop.f32.mrf.mxu0 }
 0x386   :  { %7161 = vst [vmem:[#allocation41_spill] sm:$0xff] %v5461_v8  ;;  %v1456_v7 = vmul.f32 0.17677669, %v1330_v40  ;;  %v1655_v44 = vmax.f32 %v5459_v42, %v5461_v8  ;;  %v5465_v30 = vadd.f32 %v1519_v16, %v1455_v11  ;;  %v1523_v11 = vld [vmem:[#allocation2 + $0xd0] sm:$0xff]  ;;  %v1534_v8 = vld [vmem:[#allocation2 + $0x128] sm:$0xff] }
 0x387   :  { %v1334_v0 = vpop.f32.mrf.mxu0 }
 0x388   :  { %7162 = vst [vmem:[#allocation42_spill] sm:$0xff] %v5465_v30  ;;  %v5467_v46 = vadd.f32 %v1520_v12, %v1456_v7  ;;  %v1457_v14 = vmul.f32 0.17677669, %v1334_v0  ;;  %1656 = vmax.xlane.f32.xlu1 %v1655_v44  ;;  %v1524_v12 = vld [vmem:[#allocation2 + $0xd8] sm:$0xff] }
 0x389   :  { %v1336_v41 = vpop.f32.mrf.mxu0 }
 0x38a   :  { %7163 = vst [vmem:[#allocation43_spill] sm:$0xff] %v5467_v46  ;;  %v1458_v21 = vmul.f32 0.17677669, %v1336_v41  ;;  %v1658_v10 = vmax.f32 %v5465_v30, %v5467_v46  ;;  %v5471_v23 = vadd.f32 %v1521_v26, %v1457_v14 }
 0x38b   :  { %v1338_v31 = vpop.f32.mrf.mxu0 }
 0x38c   :  { %7164 = vst [vmem:[#allocation44_spill] sm:$0xff] %v5471_v23  ;;  %v5473_v40 = vadd.f32 %v1522_v18, %v1458_v21  ;;  %v1459_v1 = vmul.f32 0.17677669, %v1338_v31  ;;  %1659 = vmax.xlane.f32.xlu0 %v1658_v10 }
 0x38d   :  { %v1340_v16 = vpop.f32.mrf.mxu0 }
 0x38e   :  { %7165 = vst [vmem:[#allocation45_spill] sm:$0xff] %v5473_v40  ;;  %v1460_v7 = vmul.f32 0.17677669, %v1340_v16  ;;  %v1661_v44 = vmax.f32 %v5471_v23, %v5473_v40  ;;  %v5477_v15 = vadd.f32 %v1523_v11, %v1459_v1  ;;  %v1527_v40 = vld [vmem:[#allocation2 + $0xf0] sm:$0xff]  ;;  %v1529_v23 = vld [vmem:[#allocation2 + $0x100] sm:$0xff] }
 0x38f   :  { %v1344_v0 = vpop.f32.mrf.mxu0 }
 0x390   :  { %7166 = vst [vmem:[#allocation46_spill] sm:$0xff] %v5477_v15  ;;  %v5479_v41 = vadd.f32 %v1524_v12, %v1460_v7  ;;  %1662 = vmax.xlane.f32.xlu1 %v1661_v44  ;;  %v1461_v49 = vmul.f32 0.17677669, %v1344_v0 }
 0x391   :  { %v1346_v4 = vpop.f32.mrf.mxu0 }
 0x392   :  { %7167 = vst [vmem:[#allocation47_spill] sm:$0xff] %v5479_v41  ;;  %v1664_v14 = vmax.f32 %v5477_v15, %v5479_v41  ;;  %v1462_v48 = vmul.f32 0.17677669, %v1346_v4  ;;  %v5507_v27 = vadd.f32 %v1525_v38, %v1461_v49 }
 0x393   :  { %v1348_v26 = vpop.f32.mrf.mxu0 }
 0x394   :  { %1665 = vmax.xlane.f32.xlu0 %v1664_v14  ;;  %v5503_v47 = vadd.f32 %v1526_v35, %v1462_v48  ;;  %v1463_v41 = vmul.f32 0.17677669, %v1348_v26  ;;  %v1532_v35 = vld [vmem:[#allocation2 + $0x118] sm:$0xff] }
 0x395   :  { %v1350_v18 = vpop.f32.mrf.mxu0 }
 0x396   :  { %v1464_v25 = vmul.f32 0.17677669, %v1350_v18  ;;  %v1667_v18 = vmax.f32 %v5507_v27, %v5503_v47  ;;  %v5519_v49 = vadd.f32 %v1527_v40, %v1463_v41 }
 0x397   :  { %v1354_v21 = vpop.f32.mrf.mxu0 }
 0x398   :  { %v1465_v15 = vmul.f32 0.17677669, %v1354_v21  ;;  %v5511_v46 = vadd.f32 %v1528_v37, %v1464_v25  ;;  %v1531_v21 = vld [vmem:[#allocation2 + $0x110] sm:$0xff] }
 0x399   :  { %v1356_v10 = vpop.f32.mrf.mxu0 }
 0x39a   :  { %v1466_v39 = vmul.f32 0.17677669, %v1356_v10  ;;  %v5521_v26 = vadd.f32 %v1529_v23, %v1465_v15  ;;  %v1538_v23 = vld [vmem:[#allocation2 + $0x148] sm:$0xff] }
 0x39b   :  { %v1358_v31 = vpop.f32.mrf.mxu0 }
 0x39c   :  { %v5513_v30 = vadd.f32 %v1530_v29, %v1466_v39  ;;  %v1467_v10 = vmul.f32 0.17677669, %v1358_v31  ;;  %v1533_v29 = vld [vmem:[#allocation2 + $0x120] sm:$0xff]  ;;  %v1670_v31 = vmax.f32 %v5519_v49, %v5511_v46 }
 0x39d   :  { %v1360_v16 = vpop.f32.mrf.mxu0 }
 0x39e   :  { %v1468_v0 = vmul.f32 0.17677669, %v1360_v16  ;;  %7168 = vst [vmem:[#allocation48_spill] sm:$0xff] %v5513_v30  ;;  %v1536_v16 = vld [vmem:[#allocation2 + $0x138] sm:$0xff]  ;;  %v1673_v40 = vmax.f32 %v5521_v26, %v5513_v30  ;;  %v5531_v41 = vadd.f32 %v1531_v21, %v1467_v10 }
 0x39f   :  { %v1364_v13 = vpop.f32.mrf.mxu0 }
 0x3a0   :  { %v1469_v42 = vmul.f32 0.17677669, %v1364_v13  ;;  %v5523_v25 = vadd.f32 %v1532_v35, %v1468_v0  ;;  %v1535_v0 = vld [vmem:[#allocation2 + $0x130] sm:$0xff] }
 0x3a1   :  { %2185 = vrot.lane.b32.xlu1 %v5289_v60, %s4880_s6  ;;  %v1366_v1 = vpop.f32.mrf.mxu0 }
 0x3a2   :  { %v1470_v48 = vmul.f32 0.17677669, %v1366_v1 }
 0x3a3   :  { %v1368_v11 = vpop.f32.mrf.mxu0 }
 0x3a4   :  { %v5525_v39 = vadd.f32 %v1534_v8, %v1470_v48  ;;  %v1471_v15 = vmul.f32 0.17677669, %v1368_v11 }
 0x3a5   :  { %v1370_v12 = vpop.f32.mrf.mxu0 }
 0x3a6   :  { %v1472_v37 = vmul.f32 0.17677669, %v1370_v12  ;;  %7169 = vst [vmem:[#allocation49_spill] sm:$0xff] %v5525_v39  ;;  %v1537_v12 = vld [vmem:[#allocation2 + $0x140] sm:$0xff]  ;;  %v5543_v21 = vadd.f32 %v1535_v0, %v1471_v15  ;;  %v1544_v0 = vld [vmem:[#allocation2 + $0x178] sm:$0xff] }
 0x3a7   :  { %v1374_v7 = vpop.f32.mrf.mxu0 }
 0x3a8   :  { %v1473_v35 = vmul.f32 0.17677669, %v1374_v7  ;;  %v5535_v8 = vadd.f32 %v1536_v16, %v1472_v37 }
 0x3a9   :  { %v1376_v44 = vpop.f32.mrf.mxu0 }
 0x3aa   :  { %2171 = vrot.lane.b32.xlu0 %v5200_v62, %s4880_s6  ;;  %v1474_v1 = vmul.f32 0.17677669, %v1376_v44  ;;  %v1676_v44 = vmax.f32 %v5531_v41, %v5523_v25 }
 0x3ab   :  { %v5487_v55 = vpop.f32.mrf.mxu0 }
 0x3ac   :  { %v5539_v48 = vadd.f32 %v1538_v23, %v1474_v1  ;;  %v1475_v37 = vmul.f32 0.17677669, %v5487_v55  ;;  %v1539_v1 = vld [vmem:[#allocation2 + $0x150] sm:$0xff] }
 0x3ad   :  { %v1380_v14 = vpop.f32.mrf.mxu0 }
 0x3ae   :  { %7170 = vst [vmem:[#allocation50_spill] sm:$0xff] %v5539_v48  ;;  %v1476_v30 = vmul.f32 0.17677669, %v1380_v14  ;;  %v1682_v14 = vmax.f32 %v5543_v21, %v5535_v8 }
 0x3af   :  { %v5489_v5 = vpop.f32.mrf.mxu0 }
 0x3b0   :  { %v1477_v16 = vmul.f32 0.17677669, %v5489_v5 }
 0x3b1   :  { %v1386_v58 = vpop.f32.mrf.mxu0 }
 0x3b2   :  { %v1478_v10 = vmul.f32 0.17677669, %v1386_v58 }
 0x3b3   :  { %v5491_v3 = vpop.f32.mrf.mxu0 }
 0x3b4   :  { %v1479_v5 = vmul.f32 0.17677669, %v5491_v3 }
 0x3b5   :  { %v5493_v45 = vpop.f32.mrf.mxu0 }
 0x3b6   :  { %v1480_v58 = vmul.f32 0.17677669, %v5493_v45 }
 0x3b7   :  { %v5495_v59 = vpop.f32.mrf.mxu0 }
 0x3b9   :  { %v5497_v60 = vpop.f32.mrf.mxu0 }
 0x3bb   :  { %v5499_v57 = vpop.f32.mrf.mxu0 }
 0x3bd   :  { %v5501_v62 = vpop.f32.mrf.mxu0 }
 0x3bf   :  { %v5505_v28 = vpop.f32.mrf.mxu0 }
 0x3c1   :  { %v5509_v4 = vpop.f32.mrf.mxu0 }
 0x3c2   :  { %v1486_v3 = vmul.f32 0.17677669, %v5509_v4 }
 0x3c3   :  { %v5517_v38 = vpop.f32.mrf.mxu0 }
 0x3c5   :  { %1668 = vmax.xlane.f32.xlu1 %v1667_v18  ;;  %v1410_v13 = vpop.f32.mrf.mxu0  ;;  %v5533_v18 = vadd.f32 %v1533_v29, %v1469_v42  ;;  %v1540_v42 = vld [vmem:[#allocation2 + $0x158] sm:$0xff]  ;;  %v1542_v29 = vld [vmem:[#allocation2 + $0x168] sm:$0xff] }
 0x3c6   :  { %v5552_v15 = vadd.f32 %v1540_v42, %v1476_v30  ;;  %v5554_v23 = vadd.f32 %v1542_v29, %v1478_v10  ;;  %v1481_v30 = vmul.f32 0.17677669, %v5495_v59  ;;  %v5565_v10 = vadd.f32 %v1544_v0, %v1480_v58  ;;  %v1545_v42 = vld [vmem:[#allocation2 + $0x180] sm:$0xff] }
 0x3c7   :  { %v1679_v11 = vmax.f32 %v5533_v18, %v5525_v39  ;;  %v1414_v7 = vpop.f32.mrf.mxu0  ;;  %v1543_v39 = vld [vmem:[#allocation2 + $0x170] sm:$0xff]  ;;  %v1483_v59 = vmul.f32 0.17677669, %v5499_v57  ;;  %v1485_v0 = vmul.f32 0.17677669, %v5505_v28 }
 0x3c8   :  { %7171 = vst [vmem:[#allocation51_spill] sm:$0xff] %v5554_v23 }
 0x3c9   :  { %1671 = vmax.xlane.f32.xlu0 %v1670_v31  ;;  %1674 = vmax.xlane.f32.xlu1 %v1673_v40  ;;  %v5545_v31 = vadd.f32 %v1537_v12, %v1473_v35  ;;  %v1541_v40 = vld [vmem:[#allocation2 + $0x160] sm:$0xff]  ;;  %v1482_v35 = vmul.f32 0.17677669, %v5497_v60  ;;  %v1546_v12 = vld [vmem:[#allocation2 + $0x188] sm:$0xff]  ;;  %v1484_v60 = vmul.f32 0.17677669, %v5501_v62 }
 0x3ca   :  { %v5562_v45 = vadd.f32 %v1541_v40, %v1477_v16  ;;  %v1550_v40 = vld [vmem:[#allocation2 + $0x1a8] sm:$0xff]  ;;  %v1547_v62 = vld [vmem:[#allocation2 + $0x190] sm:$0xff] }
 0x3cb   :  { %v1685_v55 = vmax.f32 %v5545_v31, %v5539_v48  ;;  %v5568_v29 = vadd.f32 %v1546_v12, %v1482_v35  ;;  %v1548_v48 = vld [vmem:[#allocation2 + $0x198] sm:$0xff]  ;;  %v1549_v35 = vld [vmem:[#allocation2 + $0x1a0] sm:$0xff]  ;;  %v5585_v12 = vadd.f32 %v1550_v40, %v1486_v3 }
 0x3cc   :  { %v1691_v16 = vmax.f32 %v5562_v45, %v5554_v23  ;;  %v5581_v4 = vadd.f32 %v1548_v48, %v1484_v60  ;;  %v1554_v23 = vld [vmem:[#allocation2 + $0x1c8] sm:$0xff]  ;;  %v1487_v48 = vmul.f32 0.17677669, %v5517_v38  ;;  %v1489_v60 = vmul.f32 0.17677669, %v1414_v7  ;;  %v1553_v3 = vld [vmem:[#allocation2 + $0x1c0] sm:$0xff] }
 0x3cd   :  { %1677 = vmax.xlane.f32.xlu0 %v1676_v44  ;;  %1680 = vmax.xlane.f32.xlu1 %v1679_v11  ;;  %v1416_v44 = vpop.f32.mrf.mxu0  ;;  %v5560_v11 = vadd.f32 %v1539_v1, %v1475_v37  ;;  %v5575_v1 = vadd.f32 %v1543_v39, %v1479_v5  ;;  %v1488_v39 = vmul.f32 0.17677669, %v1410_v13 }
 0x3ce   :  { %v1490_v5 = vmul.f32 0.17677669, %v1416_v44  ;;  %v5604_v38 = vadd.f32 %v1553_v3, %v1489_v60 }
 0x3cf   :  { %v1688_v37 = vmax.f32 %v5560_v11, %v5552_v15  ;;  %v1418_v58 = vpop.f32.mrf.mxu0 }
 0x3d0   :  { %v5598_v40 = vadd.f32 %v1554_v23, %v1490_v5  ;;  %v1491_v7 = vmul.f32 0.17677669, %v1418_v58 }
 0x3d1   :  { %1683 = vmax.xlane.f32.xlu0 %v1682_v14  ;;  %1686 = vmax.xlane.f32.xlu1 %v1685_v55  ;;  %v5578_v14 = vadd.f32 %v1545_v42, %v1481_v30  ;;  %v1694_v55 = vmax.f32 %v5575_v1, %v5565_v10  ;;  %v5589_v30 = vadd.f32 %v1547_v62, %v1483_v59  ;;  %v1552_v42 = vld [vmem:[#allocation2 + $0x1b8] sm:$0xff]  ;;  %v1420_v28 = vpop.f32.mrf.mxu0 }
 0x3d2   :  { %v5596_v44 = vadd.f32 %v1552_v42, %v1488_v39  ;;  %v1492_v59 = vmul.f32 0.17677669, %v1420_v28  ;;  %v1709_v23 = vmax.f32 %v5604_v38, %v5598_v40 }
 0x3d3   :  { %v1697_v57 = vmax.f32 %v5578_v14, %v5568_v29  ;;  %v1700_v13 = vmax.f32 %v5589_v30, %v5581_v4 }
 0x3d5   :  { %1689 = vmax.xlane.f32.xlu0 %v1688_v37  ;;  %1692 = vmax.xlane.f32.xlu1 %v1691_v16  ;;  %v5591_v37 = vadd.f32 %v1549_v35, %v1485_v0  ;;  %v1551_v16 = vld [vmem:[#allocation2 + $0x1b0] sm:$0xff]  ;;  %v1556_v0 = vld [vmem:[#allocation2 + $0x1d8] sm:$0xff] }
 0x3d6   :  { %v5602_v35 = vadd.f32 %v1551_v16, %v1487_v48 }
 0x3d7   :  { %v1703_v62 = vmax.f32 %v5591_v37, %v5585_v12 }
 0x3d8   :  { %v1706_v39 = vmax.f32 %v5602_v35, %v5596_v44 }
 0x3d9   :  { %1695 = vmax.xlane.f32.xlu0 %v1694_v55  ;;  %1698 = vmax.xlane.f32.xlu1 %v1697_v57  ;;  %v1555_v55 = vld [vmem:[#allocation2 + $0x1d0] sm:$0xff]  ;;  %v5606_v57 = vadd.f32 %v1556_v0, %v1492_v59 }
 0x3da   :  { %v5612_v5 = vadd.f32 %v1555_v55, %v1491_v7 }
 0x3dc   :  { %v1712_v42 = vmax.f32 %v5612_v5, %v5606_v57 }
 0x3dd   :  { %1701 = vmax.xlane.f32.xlu0 %v1700_v13  ;;  %1704 = vmax.xlane.f32.xlu1 %v1703_v62 }
 0x3e1   :  { %1707 = vmax.xlane.f32.xlu0 %v1706_v39  ;;  %1710 = vmax.xlane.f32.xlu1 %v1709_v23 }
 0x3e5   :  { %1713 = vmax.xlane.f32.xlu0 %v1712_v42 }
 0x3e9   :  { %v1627_v58 = vpop.xlane.xlu0 %1626 }
 0x3ea   :  { %v1721_v28 = vsub.f32 %v5399_v34, %v1627_v58  ;;  %v1722_v48 = vsub.f32 %v5401_v20, %v1627_v58 }
 0x3ec   :  { %v1785_v60 = vmul.f32 1.442695, %v1721_v28  ;;  %v1787_v16 = vmul.f32 1.442695, %v1722_v48 }
 0x3ed   :  { %v1630_v3 = vpop.xlane.xlu1 %1629 }
 0x3ee   :  { %4512 = vpow2.f32 %v1785_v60  ;;  %v1723_v13 = vsub.f32 %v5405_v51, %v1630_v3  ;;  %v1724_v59 = vsub.f32 %v5407_v56, %v1630_v3 }
 0x3ef   :  { %4514 = vpow2.f32 %v1787_v16 }
 0x3f0   :  { %v1789_v62 = vmul.f32 1.442695, %v1723_v13  ;;  %v1791_v0 = vmul.f32 1.442695, %v1724_v59 }
 0x3f1   :  { %v1633_v7 = vpop.xlane.xlu0 %1632 }
 0x3f2   :  { %4516 = vpow2.f32 %v1789_v62  ;;  %v1725_v55 = vsub.f32 %v5411_v32, %v1633_v7  ;;  %v1726_v39 = vsub.f32 %v5413_v43, %v1633_v7  ;;  %2169 = vrot.lane.b32.xlu1 %v5203_v2, %s4880_s6 }
 0x3f3   :  { %4518 = vpow2.f32 %v1791_v0 }
 0x3f4   :  { %v1793_v34 = vmul.f32 1.442695, %v1725_v55  ;;  %v1795_v20 = vmul.f32 1.442695, %v1726_v39 }
 0x3f5   :  { %v1636_v23 = vpop.xlane.xlu0 %1635 }
 0x3f6   :  { %4520 = vpow2.f32 %v1793_v34  ;;  %v1727_v51 = vsub.f32 %v5417_v19, %v1636_v23  ;;  %v1728_v56 = vsub.f32 %v5419_v54, %v1636_v23  ;;  %v1424_v23 = vpop.f32.mrf.mxu0 }
 0x3f7   :  { %4522 = vpow2.f32 %v1795_v20 }
 0x3f8   :  { %v1797_v42 = vmul.f32 1.442695, %v1727_v51  ;;  %v1799_v58 = vmul.f32 1.442695, %v1728_v56 }
 0x3f9   :  { %v1639_v28 = vpop.xlane.xlu1 %1638 }
 0x3fa   :  { %4524 = vpow2.f32 %v1797_v42  ;;  %v1729_v32 = vsub.f32 %v5423_v63, %v1639_v28  ;;  %v1730_v43 = vsub.f32 %v5425_v36, %v1639_v28 }
 0x3fb   :  { %v5628_v48 = vpop.eup %4512  ;;  %4526 = vpow2.f32 %v1799_v58 }
 0x3fc   :  { %v5630_v2 = vpop.eup %4514  ;;  %v1801_v60 = vmul.f32 1.442695, %v1729_v32  ;;  %v1803_v16 = vmul.f32 1.442695, %v1730_v43  ;;  %v1426_v43 = vpop.f32.mrf.mxu0 }
 0x3fd   :  { %v1642_v3 = vpop.xlane.xlu0 %1641  ;;  %v1913_v19 = vadd.f32 %v5630_v2, %v5628_v48 }
 0x3fe   :  { %4528 = vpow2.f32 %v1801_v60  ;;  %v1731_v54 = vsub.f32 %v5429_v33, %v1642_v3  ;;  %v1732_v13 = vsub.f32 %v5431_v22, %v1642_v3 }
 0x3ff   :  { %v5636_v59 = vpop.eup %4516  ;;  %4530 = vpow2.f32 %v1803_v16  ;;  %1914 = vadd.xlane.f32.xlu0 %v1913_v19 }
 0x400   :  { %v5638_v63 = vpop.eup %4518  ;;  %v1805_v36 = vmul.f32 1.442695, %v1731_v54  ;;  %v1807_v62 = vmul.f32 1.442695, %v1732_v13  ;;  %v1494_v54 = vmul.f32 0.17677669, %v1426_v43 }
 0x401   :  { %v1645_v0 = vpop.xlane.xlu1 %1644  ;;  %v1916_v7 = vadd.f32 %v5638_v63, %v5636_v59 }
 0x402   :  { %4532 = vpow2.f32 %v1805_v36  ;;  %v1733_v55 = vsub.f32 %v5435_v52, %v1645_v0  ;;  %v1734_v39 = vsub.f32 %v5437_v17, %v1645_v0 }
 0x403   :  { %v5644_v33 = vpop.eup %4520  ;;  %4534 = vpow2.f32 %v1807_v62  ;;  %1917 = vadd.xlane.f32.xlu0 %v1916_v7  ;;  %v1558_v62 = vld [vmem:[#allocation2 + $0x1e8] sm:$0xff] }
 0x404   :  { %v5646_v22 = vpop.eup %4522  ;;  %v1809_v34 = vmul.f32 1.442695, %v1733_v55  ;;  %v1811_v20 = vmul.f32 1.442695, %v1734_v39  ;;  %v1493_v55 = vmul.f32 0.17677669, %v1424_v23  ;;  %v1428_v39 = vpop.f32.mrf.mxu0 }
 0x405   :  { %v1648_v51 = vpop.xlane.xlu0 %1647  ;;  %v1919_v56 = vadd.f32 %v5646_v22, %v5644_v33 }
 0x406   :  { %4536 = vpow2.f32 %v1809_v34  ;;  %v1735_v42 = vsub.f32 %v5441_v24, %v1648_v51  ;;  %v1736_v52 = vsub.f32 %v5443_v61, %v1648_v51 }
 0x407   :  { %v5652_v58 = vpop.eup %4524  ;;  %4538 = vpow2.f32 %v1811_v20  ;;  %1920 = vadd.xlane.f32.xlu0 %v1919_v56  ;;  %v1557_v20 = vld [vmem:[#allocation2 + $0x1e0] sm:$0xff]  ;;  %v5672_v56 = vadd.f32 %v1558_v62, %v1494_v54 }
 0x408   :  { %v5654_v17 = vpop.eup %4526  ;;  %v1813_v28 = vmul.f32 1.442695, %v1735_v42  ;;  %v1815_v32 = vmul.f32 1.442695, %v1736_v52 }
 0x409   :  { %v1651_v60 = vpop.xlane.xlu1 %1650  ;;  %v1922_v16 = vadd.f32 %v5654_v17, %v5652_v58 }
 0x40a   :  { %4540 = vpow2.f32 %v1813_v28  ;;  %v1737_v3 = vsub.f32 %v5447_v9, %v1651_v60  ;;  %v1738_v24 = vsub.f32 %v5449_v6, %v1651_v60  ;;  %v7173_v60 = vld [vmem:[#allocation41_spill] sm:$0xff] }
 0x40b   :  { %v5660_v19 = vpop.eup %4528  ;;  %4542 = vpow2.f32 %v1815_v32  ;;  %1923 = vadd.xlane.f32.xlu0 %v1922_v16  ;;  %v5676_v32 = vadd.f32 %v1557_v20, %v1493_v55  ;;  %v1560_v55 = vld [vmem:[#allocation2 + $0x1f8] sm:$0xff] }
 0x40c   :  { %v5662_v61 = vpop.eup %4530  ;;  %v1817_v13 = vmul.f32 1.442695, %v1737_v3  ;;  %v1819_v36 = vmul.f32 1.442695, %v1738_v24  ;;  %v7176_v20 = vld [vmem:[#allocation43_spill] sm:$0xff] }
 0x40d   :  { %v1654_v0 = vpop.xlane.xlu0 %1653  ;;  %v1925_v7 = vadd.f32 %v5662_v61, %v5660_v19 }
 0x40e   :  { %4544 = vpow2.f32 %v1817_v13  ;;  %v1739_v9 = vsub.f32 %v5453_v53, %v1654_v0  ;;  %v1740_v6 = vsub.f32 %v5455_v50, %v1654_v0  ;;  %v1430_v53 = vpop.f32.mrf.mxu0  ;;  %v7172_v50 = vld [vmem:[#allocation40_spill] sm:$0xff] }
 0x40f   :  { %v5668_v34 = vpop.eup %4532  ;;  %4546 = vpow2.f32 %v1819_v36  ;;  %1926 = vadd.xlane.f32.xlu0 %v1925_v7  ;;  %v1715_v36 = vmax.f32 %v5676_v32, %v5672_v56  ;;  %v1496_v62 = vmul.f32 0.17677669, %v1430_v53 }
 0x410   :  { %v5670_v51 = vpop.eup %4534  ;;  %v1821_v42 = vmul.f32 1.442695, %v1739_v9  ;;  %v1823_v52 = vmul.f32 1.442695, %v1740_v6  ;;  %v7175_v9 = vld [vmem:[#allocation42_spill] sm:$0xff] }
 0x411   :  { %v1657_v28 = vpop.xlane.xlu1 %1656  ;;  %v1928_v23 = vadd.f32 %v5670_v51, %v5668_v34 }
 0x412   :  { %4548 = vpow2.f32 %v1821_v42  ;;  %v1741_v43 = vsub.f32 %v7172_v50, %v1657_v28  ;;  %v1742_v16 = vsub.f32 %v7173_v60, %v1657_v28  ;;  %v1495_v28 = vmul.f32 0.17677669, %v1428_v39  ;;  %v1559_v50 = vld [vmem:[#allocation2 + $0x1f0] sm:$0xff] }
 0x413   :  { %v5680_v3 = vpop.eup %4536  ;;  %4550 = vpow2.f32 %v1823_v52  ;;  %1929 = vadd.xlane.f32.xlu0 %v1928_v23  ;;  %v5694_v60 = vadd.f32 %v1560_v55, %v1496_v62 }
 0x414   :  { %7174 = vst [vmem:[#allocation40_spill] sm:$0xff] %v5680_v3  ;;  %v5682_v24 = vpop.eup %4538  ;;  %v1825_v54 = vmul.f32 1.442695, %v1741_v43  ;;  %v1827_v13 = vmul.f32 1.442695, %v1742_v16  ;;  %v5702_v39 = vadd.f32 %v1559_v50, %v1495_v28 }
 0x415   :  { %v1660_v0 = vpop.xlane.xlu0 %1659  ;;  %v1931_v7 = vadd.f32 %v5682_v24, %v5680_v3 }
 0x416   :  { %4552 = vpow2.f32 %v1825_v54  ;;  %v1743_v6 = vsub.f32 %v7175_v9, %v1660_v0  ;;  %v1744_v42 = vsub.f32 %v7176_v20, %v1660_v0  ;;  %1716 = vmax.xlane.f32.xlu1 %v1715_v36  ;;  %v7177_v9 = vld [vmem:[#allocation44_spill] sm:$0xff]  ;;  %v7178_v36 = vld [vmem:[#allocation45_spill] sm:$0xff] }
 0x417   :  { %v5690_v52 = vpop.eup %4540  ;;  %4554 = vpow2.f32 %v1827_v13  ;;  %1932 = vadd.xlane.f32.xlu0 %v1931_v7 }
 0x418   :  { %v5692_v23 = vpop.eup %4542  ;;  %v1829_v53 = vmul.f32 1.442695, %v1743_v6  ;;  %v1831_v43 = vmul.f32 1.442695, %v1744_v42  ;;  %v1718_v42 = vmax.f32 %v5702_v39, %v5694_v60 }
 0x419   :  { %v1663_v16 = vpop.xlane.xlu1 %1662  ;;  %v1934_v54 = vadd.f32 %v5692_v23, %v5690_v52 }
 0x41a   :  { %4556 = vpow2.f32 %v1829_v53  ;;  %v1745_v0 = vsub.f32 %v7177_v9, %v1663_v16  ;;  %v1746_v20 = vsub.f32 %v7178_v36, %v1663_v16  ;;  %v7180_v53 = vld [vmem:[#allocation46_spill] sm:$0xff]  ;;  %v7181_v9 = vld [vmem:[#allocation47_spill] sm:$0xff] }
 0x41b   :  { %v5700_v3 = vpop.eup %4544  ;;  %4558 = vpow2.f32 %v1831_v43  ;;  %1935 = vadd.xlane.f32.xlu0 %v1934_v54 }
 0x41c   :  { %7179 = vst [vmem:[#allocation41_spill] sm:$0xff] %v5700_v3  ;;  %v5704_v13 = vpop.eup %4546  ;;  %v1833_v7 = vmul.f32 1.442695, %v1745_v0  ;;  %v1835_v62 = vmul.f32 1.442695, %v1746_v20 }
 0x41d   :  { %v1666_v55 = vpop.xlane.xlu0 %1665  ;;  %v1937_v6 = vadd.f32 %v5704_v13, %v5700_v3  ;;  %v2186_v3 = vpop.permute.xlu1 %2185 }
 0x41e   :  { %4560 = vpow2.f32 %v1833_v7  ;;  %v1747_v16 = vsub.f32 %v7180_v53, %v1666_v55  ;;  %v1748_v36 = vsub.f32 %v7181_v9, %v1666_v55 }
 0x41f   :  { %v5712_v28 = vpop.eup %4548  ;;  %4562 = vpow2.f32 %v1835_v62  ;;  %1938 = vadd.xlane.f32.xlu1 %v1937_v6  ;;  %1719 = vmax.xlane.f32.xlu0 %v1718_v42 }
 0x420   :  { %7182 = vst [vmem:[#allocation42_spill] sm:$0xff] %v5712_v28  ;;  %v5714_v50 = vpop.eup %4550  ;;  %v1837_v43 = vmul.f32 1.442695, %v1747_v16  ;;  %v1839_v54 = vmul.f32 1.442695, %v1748_v36 }
 0x421   :  { %7183 = vst [vmem:[#allocation43_spill] sm:$0xff] %v5714_v50  ;;  %v2172_v0 = vpop.permute.xlu0 %2171  ;;  %v1940_v20 = vadd.f32 %v5714_v50, %v5712_v28 }
 0x422   :  { %4564 = vpow2.f32 %v1837_v43  ;;  %4076 = vmatpush3.bf16.msra.mxu1 %v2172_v0 }
 0x423   :  { %v5718_v7 = vpop.eup %4552  ;;  %4566 = vpow2.f32 %v1839_v54  ;;  %1941 = vadd.xlane.f32.xlu0 %v1940_v20  ;;  %4077 = vmatprep.subr.bf16.mxu1 %v2186_v3 }
 0x424   :  { %7184 = vst [vmem:[#allocation44_spill] sm:$0xff] %v5718_v7  ;;  %v5720_v55 = vpop.eup %4554 }
 0x425   :  { %7185 = vst [vmem:[#allocation45_spill] sm:$0xff] %v5720_v55  ;;  %v1943_v62 = vadd.f32 %v5720_v55, %v5718_v7  ;;  %v7192_v55 = vld [vmem:[#allocation48_spill] sm:$0xff] }
 0x427   :  { %v5724_v6 = vpop.eup %4556  ;;  %1944 = vadd.xlane.f32.xlu1 %v1943_v62 }
 0x428   :  { %7186 = vst [vmem:[#allocation46_spill] sm:$0xff] %v5724_v6  ;;  %v5726_v42 = vpop.eup %4558 }
 0x429   :  { %7187 = vst [vmem:[#allocation47_spill] sm:$0xff] %v5726_v42  ;;  %v1946_v53 = vadd.f32 %v5726_v42, %v5724_v6 }
 0x42b   :  { %v5730_v16 = vpop.eup %4560  ;;  %1947 = vadd.xlane.f32.xlu0 %v1946_v53 }
 0x42c   :  { %7188 = vst [vmem:[#allocation52_spill] sm:$0xff] %v5730_v16  ;;  %v5732_v9 = vpop.eup %4562 }
 0x42d   :  { %7189 = vst [vmem:[#allocation53_spill] sm:$0xff] %v5732_v9  ;;  %v1949_v3 = vadd.f32 %v5732_v9, %v5730_v16 }
 0x42f   :  { %v5736_v36 = vpop.eup %4564  ;;  %1950 = vadd.xlane.f32.xlu1 %v1949_v3 }
 0x430   :  { %7190 = vst [vmem:[#allocation54_spill] sm:$0xff] %v5736_v36  ;;  %v5738_v43 = vpop.eup %4566 }
 0x431   :  { %7191 = vst [vmem:[#allocation55_spill] sm:$0xff] %v5738_v43  ;;  %v1952_v54 = vadd.f32 %v5738_v43, %v5736_v36 }
 0x433   :  { %1953 = vadd.xlane.f32.xlu0 %v1952_v54 }
 0x44e   :  { %v1669_v0 = vpop.xlane.xlu1 %1668 }
 0x44f   :  { %v1749_v20 = vsub.f32 %v5507_v27, %v1669_v0  ;;  %v1750_v62 = vsub.f32 %v5503_v47, %v1669_v0 }
 0x451   :  { %v1841_v53 = vmul.f32 1.442695, %v1749_v20  ;;  %v1843_v7 = vmul.f32 1.442695, %v1750_v62 }
 0x452   :  { %v1672_v6 = vpop.xlane.xlu0 %1671  ;;  %v1675_v42 = vpop.xlane.xlu1 %1674 }
 0x453   :  { %4568 = vpow2.f32 %v1841_v53  ;;  %v1751_v16 = vsub.f32 %v5519_v49, %v1672_v6  ;;  %v1752_v3 = vsub.f32 %v5511_v46, %v1672_v6  ;;  %v1753_v9 = vsub.f32 %v5521_v26, %v1675_v42  ;;  %v7193_v46 = vld [vmem:[#allocation49_spill] sm:$0xff] }
 0x454   :  { %4570 = vpow2.f32 %v1843_v7  ;;  %v1754_v36 = vsub.f32 %v7192_v55, %v1675_v42 }
 0x455   :  { %v1845_v54 = vmul.f32 1.442695, %v1751_v16  ;;  %v1847_v43 = vmul.f32 1.442695, %v1752_v3  ;;  %v1849_v28 = vmul.f32 1.442695, %v1753_v9 }
 0x456   :  { %v1851_v27 = vmul.f32 1.442695, %v1754_v36  ;;  %v1678_v50 = vpop.xlane.xlu0 %1677  ;;  %v1681_v47 = vpop.xlane.xlu1 %1680 }
 0x457   :  { %4572 = vpow2.f32 %v1845_v54  ;;  %v1755_v0 = vsub.f32 %v5531_v41, %v1678_v50  ;;  %v1756_v20 = vsub.f32 %v5523_v25, %v1678_v50  ;;  %v1757_v49 = vsub.f32 %v5533_v18, %v1681_v47  ;;  %v7194_v18 = vld [vmem:[#allocation50_spill] sm:$0xff] }
 0x458   :  { %4574 = vpow2.f32 %v1847_v43  ;;  %v1758_v6 = vsub.f32 %v7193_v46, %v1681_v47 }
 0x459   :  { %4576 = vpow2.f32 %v1849_v28  ;;  %v1853_v26 = vmul.f32 1.442695, %v1755_v0  ;;  %v1855_v7 = vmul.f32 1.442695, %v1756_v20  ;;  %v1857_v55 = vmul.f32 1.442695, %v1757_v49 }
 0x45a   :  { %4578 = vpow2.f32 %v1851_v27  ;;  %v1859_v42 = vmul.f32 1.442695, %v1758_v6  ;;  %v1684_v16 = vpop.xlane.xlu0 %1683  ;;  %v1687_v9 = vpop.xlane.xlu1 %1686 }
 0x45b   :  { %4580 = vpow2.f32 %v1853_v26  ;;  %v1759_v36 = vsub.f32 %v5543_v21, %v1684_v16  ;;  %v1760_v41 = vsub.f32 %v5535_v8, %v1684_v16  ;;  %v1761_v25 = vsub.f32 %v5545_v31, %v1687_v9  ;;  %v7195_v31 = vld [vmem:[#allocation51_spill] sm:$0xff] }
 0x45c   :  { %4582 = vpow2.f32 %v1855_v7  ;;  %v1762_v50 = vsub.f32 %v7194_v18, %v1687_v9 }
 0x45d   :  { %4584 = vpow2.f32 %v1857_v55  ;;  %v1861_v43 = vmul.f32 1.442695, %v1759_v36  ;;  %v1863_v28 = vmul.f32 1.442695, %v1760_v41  ;;  %v1865_v62 = vmul.f32 1.442695, %v1761_v25 }
 0x45e   :  { %4586 = vpow2.f32 %v1859_v42  ;;  %v1867_v53 = vmul.f32 1.442695, %v1762_v50  ;;  %v1690_v3 = vpop.xlane.xlu0 %1689  ;;  %v1693_v54 = vpop.xlane.xlu1 %1692 }
 0x45f   :  { %4588 = vpow2.f32 %v1861_v43  ;;  %v1763_v27 = vsub.f32 %v5560_v11, %v1690_v3  ;;  %v1764_v21 = vsub.f32 %v5552_v15, %v1690_v3  ;;  %v1765_v8 = vsub.f32 %v5562_v45, %v1693_v54 }
 0x460   :  { %v5759_v47 = vpop.eup %4568  ;;  %4590 = vpow2.f32 %v1863_v28  ;;  %v1766_v0 = vsub.f32 %v7195_v31, %v1693_v54 }
 0x461   :  { %v5762_v20 = vpop.eup %4570  ;;  %4592 = vpow2.f32 %v1865_v62  ;;  %v1869_v49 = vmul.f32 1.442695, %v1763_v27  ;;  %v1871_v46 = vmul.f32 1.442695, %v1764_v21  ;;  %v1873_v6 = vmul.f32 1.442695, %v1765_v8 }
 0x462   :  { %4594 = vpow2.f32 %v1867_v53  ;;  %v1875_v26 = vmul.f32 1.442695, %v1766_v0  ;;  %v1696_v7 = vpop.xlane.xlu0 %1695  ;;  %v1699_v55 = vpop.xlane.xlu1 %1698  ;;  %v1955_v15 = vadd.f32 %v5762_v20, %v5759_v47 }
 0x463   :  { %4596 = vpow2.f32 %v1869_v49  ;;  %v1767_v11 = vsub.f32 %v5575_v1, %v1696_v7  ;;  %v1768_v45 = vsub.f32 %v5565_v10, %v1696_v7  ;;  %v1769_v42 = vsub.f32 %v5578_v14, %v1699_v55 }
 0x464   :  { %v5769_v16 = vpop.eup %4572  ;;  %4598 = vpow2.f32 %v1871_v46  ;;  %v1770_v9 = vsub.f32 %v5568_v29, %v1699_v55  ;;  %1956 = vadd.xlane.f32.xlu1 %v1955_v15 }
 0x465   :  { %v5772_v36 = vpop.eup %4574  ;;  %4600 = vpow2.f32 %v1873_v6  ;;  %v1877_v41 = vmul.f32 1.442695, %v1767_v11  ;;  %v1879_v25 = vmul.f32 1.442695, %v1768_v45  ;;  %v1881_v18 = vmul.f32 1.442695, %v1769_v42 }
 0x466   :  { %v5774_v50 = vpop.eup %4576  ;;  %4602 = vpow2.f32 %v1875_v26  ;;  %v1883_v1 = vmul.f32 1.442695, %v1770_v9  ;;  %v1702_v43 = vpop.xlane.xlu0 %1701  ;;  %v1958_v14 = vadd.f32 %v5772_v36, %v5769_v16 }
 0x467   :  { %v1705_v10 = vpop.xlane.xlu1 %1704  ;;  %v5778_v28 = vpop.eup %4578  ;;  %4604 = vpow2.f32 %v1877_v41  ;;  %v1771_v29 = vsub.f32 %v5589_v30, %v1702_v43  ;;  %v1772_v62 = vsub.f32 %v5581_v4, %v1702_v43 }
 0x468   :  { %v1773_v53 = vsub.f32 %v5591_v37, %v1705_v10  ;;  %v5783_v3 = vpop.eup %4580  ;;  %4606 = vpow2.f32 %v1879_v25  ;;  %v1774_v54 = vsub.f32 %v5585_v12, %v1705_v10  ;;  %v1961_v27 = vadd.f32 %v5778_v28, %v5774_v50  ;;  %1959 = vadd.xlane.f32.xlu0 %v1958_v14 }
 0x469   :  { %v5788_v21 = vpop.eup %4582  ;;  %4608 = vpow2.f32 %v1881_v18  ;;  %v1885_v8 = vmul.f32 1.442695, %v1771_v29  ;;  %v1887_v31 = vmul.f32 1.442695, %v1772_v62 }
 0x46a   :  { %v1889_v0 = vmul.f32 1.442695, %v1773_v53  ;;  %v5790_v30 = vpop.eup %4584  ;;  %4610 = vpow2.f32 %v1883_v1  ;;  %v1891_v4 = vmul.f32 1.442695, %v1774_v54  ;;  %1962 = vadd.xlane.f32.xlu1 %v1961_v27  ;;  %v1708_v37 = vpop.xlane.xlu0 %1707  ;;  %v1964_v12 = vadd.f32 %v5788_v21, %v5783_v3 }
 0x46b   :  { %v1711_v49 = vpop.xlane.xlu1 %1710  ;;  %v5794_v46 = vpop.eup %4586  ;;  %4612 = vpow2.f32 %v1885_v8  ;;  %v1775_v6 = vsub.f32 %v5602_v35, %v1708_v37  ;;  %v1776_v26 = vsub.f32 %v5596_v44, %v1708_v37 }
 0x46c   :  { %v1777_v7 = vsub.f32 %v5604_v38, %v1711_v49  ;;  %v5799_v55 = vpop.eup %4588  ;;  %4614 = vpow2.f32 %v1887_v31  ;;  %v1778_v15 = vsub.f32 %v5598_v40, %v1711_v49  ;;  %v1967_v11 = vadd.f32 %v5794_v46, %v5790_v30  ;;  %1965 = vadd.xlane.f32.xlu0 %v1964_v12 }
 0x46d   :  { %v5804_v45 = vpop.eup %4590  ;;  %4616 = vpow2.f32 %v1889_v0  ;;  %v1893_v42 = vmul.f32 1.442695, %v1775_v6  ;;  %v1895_v9 = vmul.f32 1.442695, %v1776_v26 }
 0x46e   :  { %v1897_v41 = vmul.f32 1.442695, %v1777_v7  ;;  %v5806_v35 = vpop.eup %4592  ;;  %4618 = vpow2.f32 %v1891_v4  ;;  %v1899_v44 = vmul.f32 1.442695, %v1778_v15  ;;  %1968 = vadd.xlane.f32.xlu1 %v1967_v11  ;;  %v1714_v25 = vpop.xlane.xlu0 %1713  ;;  %v1970_v40 = vadd.f32 %v5804_v45, %v5799_v55 }
 0x46f   :  { %v2170_v38 = vpop.permute.xlu1 %2169  ;;  %v5810_v18 = vpop.eup %4594  ;;  %4620 = vpow2.f32 %v1893_v42  ;;  %v1779_v1 = vsub.f32 %v5612_v5, %v1714_v25  ;;  %v1780_v43 = vsub.f32 %v5606_v57, %v1714_v25 }
 0x470   :  { %4078 = vmatpush3.bf16.msra.mxu1 %v2170_v38  ;;  %v5814_v10 = vpop.eup %4596  ;;  %4622 = vpow2.f32 %v1895_v9  ;;  %v1973_v14 = vadd.f32 %v5810_v18, %v5806_v35  ;;  %1971 = vadd.xlane.f32.xlu0 %v1970_v40 }
 0x471   :  { %v5818_v29 = vpop.eup %4598  ;;  %4624 = vpow2.f32 %v1897_v41  ;;  %v1901_v62 = vmul.f32 1.442695, %v1779_v1  ;;  %v1903_v53 = vmul.f32 1.442695, %v1780_v43 }
 0x472   :  { %v5820_v54 = vpop.eup %4600  ;;  %4626 = vpow2.f32 %v1899_v44  ;;  %1974 = vadd.xlane.f32.xlu1 %v1973_v14  ;;  %v1976_v57 = vadd.f32 %v5818_v29, %v5814_v10 }
 0x473   :  { %v5824_v5 = vpop.eup %4602  ;;  %4628 = vpow2.f32 %v1901_v62 }
 0x474   :  { %v5826_v27 = vpop.eup %4604  ;;  %4630 = vpow2.f32 %v1903_v53  ;;  %v1979_v8 = vadd.f32 %v5824_v5, %v5820_v54  ;;  %1977 = vadd.xlane.f32.xlu0 %v1976_v57 }
 0x475   :  { %v5830_v31 = vpop.eup %4606 }
 0x476   :  { %v5832_v0 = vpop.eup %4608  ;;  %1980 = vadd.xlane.f32.xlu1 %v1979_v8  ;;  %v1982_v4 = vadd.f32 %v5830_v31, %v5826_v27 }
 0x477   :  { %v5836_v37 = vpop.eup %4610 }
 0x478   :  { %v5838_v49 = vpop.eup %4612  ;;  %v1985_v12 = vadd.f32 %v5836_v37, %v5832_v0  ;;  %1983 = vadd.xlane.f32.xlu0 %v1982_v4 }
 0x479   :  { %v5842_v6 = vpop.eup %4614 }
 0x47a   :  { %v5844_v26 = vpop.eup %4616  ;;  %1986 = vadd.xlane.f32.xlu1 %v1985_v12  ;;  %v1988_v7 = vadd.f32 %v5842_v6, %v5838_v49 }
 0x47b   :  { %v5848_v15 = vpop.eup %4618 }
 0x47c   :  { %v5850_v11 = vpop.eup %4620  ;;  %v1991_v42 = vadd.f32 %v5848_v15, %v5844_v26  ;;  %1989 = vadd.xlane.f32.xlu0 %v1988_v7 }
 0x47d   :  { %v5854_v9 = vpop.eup %4622 }
 0x47e   :  { %v5856_v41 = vpop.eup %4624  ;;  %1992 = vadd.xlane.f32.xlu1 %v1991_v42  ;;  %v1994_v44 = vadd.f32 %v5854_v9, %v5850_v11 }
 0x47f   :  { %7196 = vst [vmem:[#allocation48_spill] sm:$0xff] %v5856_v41  ;;  %v5860_v38 = vpop.eup %4626 }
 0x480   :  { %7197 = vst [vmem:[#allocation49_spill] sm:$0xff] %v5860_v38  ;;  %v5862_v25 = vpop.eup %4628  ;;  %v1997_v40 = vadd.f32 %v5860_v38, %v5856_v41  ;;  %1995 = vadd.xlane.f32.xlu0 %v1994_v44 }
 0x481   :  { %7198 = vst [vmem:[#allocation50_spill] sm:$0xff] %v5862_v25  ;;  %v5866_v1 = vpop.eup %4630 }
 0x482   :  { %1998 = vadd.xlane.f32.xlu1 %v1997_v40  ;;  %v2000_v43 = vadd.f32 %v5866_v1, %v5862_v25 }
 0x484   :  { %2001 = vadd.xlane.f32.xlu0 %v2000_v43 }
 0x488   :  { %v1915_v14 = vpop.xlane.xlu0 %1914 }
 0x489   :  { %4632 = vrcp.f32 %v1915_v14 }
 0x48c   :  { %v1918_v62 = vpop.xlane.xlu0 %1917 }
 0x48d   :  { %4634 = vrcp.f32 %v1918_v62 }
 0x490   :  { %v1921_v53 = vpop.xlane.xlu0 %1920 }
 0x491   :  { %4636 = vrcp.f32 %v1921_v53 }
 0x494   :  { %v1924_v57 = vpop.xlane.xlu0 %1923 }
 0x495   :  { %4638 = vrcp.f32 %v1924_v57 }
 0x496   :  { %v4633_v8 = vpop.eup %4632 }
 0x497   :  { %v2074_v7 = vmul.f32 %v4633_v8, %v5630_v2  ;;  %v2073_v44 = vmul.f32 %v4633_v8, %v5628_v48 }
 0x498   :  { %v1927_v4 = vpop.xlane.xlu0 %1926 }
 0x499   :  { %4640 = vrcp.f32 %v1927_v4 }
 0x49a   :  { %v4635_v12 = vpop.eup %4634 }
 0x49b   :  { %v2076_v42 = vmul.f32 %v4635_v12, %v5638_v63  ;;  %v2075_v40 = vmul.f32 %v4635_v12, %v5636_v59 }
 0x49c   :  { %v1930_v43 = vpop.xlane.xlu0 %1929 }
 0x49d   :  { %4642 = vrcp.f32 %v1930_v43  ;;  %v2138_v14 = vpack.c.bf16 %v2076_v42, %v2074_v7  ;;  %v2137_v62 = vpack.c.bf16 %v2075_v40, %v2073_v44 }
 0x49e   :  { %v4637_v41 = vpop.eup %4636 }
 0x49f   :  { %2249 = vmatprep.mubr.bf16.mxu1 %v2138_v14  ;;  %v1717_v53 = vpop.xlane.xlu1 %1716  ;;  %v2078_v48 = vmul.f32 %v4637_v41, %v5646_v22  ;;  %v2077_v8 = vmul.f32 %v4637_v41, %v5644_v33 }
 0x4a0   :  { %2250 = vmatmul.mubr.bf16.vlgmr.msra.gmra.mxu1 %v2137_v62  ;;  %v1933_v57 = vpop.xlane.xlu0 %1932  ;;  %v1781_v25 = vsub.f32 %v5676_v32, %v1717_v53  ;;  %v1782_v4 = vsub.f32 %v5672_v56, %v1717_v53 }
 0x4a1   :  { %4644 = vrcp.f32 %v1933_v57 }
 0x4a2   :  { %v4639_v2 = vpop.eup %4638  ;;  %v1905_v38 = vmul.f32 1.442695, %v1781_v25  ;;  %v1907_v63 = vmul.f32 1.442695, %v1782_v4 }
 0x4a3   :  { %v2080_v59 = vmul.f32 %v4639_v2, %v5654_v17  ;;  %v2079_v12 = vmul.f32 %v4639_v2, %v5652_v58 }
 0x4a4   :  { %4646 = vpow2.f32 %v1905_v38  ;;  %v1936_v7 = vpop.xlane.xlu0 %1935 }
 0x4a5   :  { %4648 = vpow2.f32 %v1907_v63  ;;  %v2140_v42 = vpack.c.bf16 %v2080_v59, %v2078_v48  ;;  %v2139_v44 = vpack.c.bf16 %v2079_v12, %v2077_v8  ;;  %v7199_v48 = vld [vmem:[#allocation40_spill] sm:$0xff] }
 0x4a6   :  { %4650 = vrcp.f32 %v1936_v7  ;;  %v4641_v32 = vpop.eup %4640 }
 0x4a7   :  { %2257 = vmatprep.mubr.bf16.mxu1 %v2140_v42  ;;  %v2082_v33 = vmul.f32 %v4641_v32, %v5662_v61  ;;  %v2081_v58 = vmul.f32 %v4641_v32, %v5660_v19 }
 0x4a8   :  { %2258 = vmatmul.mubr.bf16.gmra.mxu1 %v2139_v44  ;;  %v1720_v56 = vpop.xlane.xlu0 %1719  ;;  %v1939_v25 = vpop.xlane.xlu1 %1938  ;;  %v7200_v44 = vld [vmem:[#allocation9_spill] sm:$0xff] }
 0x4a9   :  { %v1783_v22 = vsub.f32 %v5702_v39, %v1720_v56  ;;  %v1784_v40 = vsub.f32 %v5694_v60, %v1720_v56  ;;  %4652 = vrcp.f32 %v1939_v25  ;;  %v415_v32 = vsel %vm414_vm2, %v7200_v44, 0.0 }
 0x4aa   :  { %v4643_v17 = vpop.eup %4642 }
 0x4ab   :  { %v1909_v41 = vmul.f32 1.442695, %v1783_v22  ;;  %v1911_v38 = vmul.f32 1.442695, %v1784_v40  ;;  %v2084_v43 = vmul.f32 %v4643_v17, %v5670_v51  ;;  %v2083_v14 = vmul.f32 %v4643_v17, %v5668_v34  ;;  %v7201_v40 = vld [vmem:[#allocation11_spill] sm:$0xff] }
 0x4ac   :  { %v1942_v62 = vpop.xlane.xlu0 %1941  ;;  %v421_v17 = vsel %vm414_vm2, %v7201_v40, 0.0 }
 0x4ad   :  { %4654 = vpow2.f32 %v1909_v41  ;;  %v2142_v53 = vpack.c.bf16 %v2084_v43, %v2082_v33  ;;  %v2141_v57 = vpack.c.bf16 %v2083_v14, %v2081_v58  ;;  %v7202_v58 = vld [vmem:[#allocation43_spill] sm:$0xff]  ;;  %v7204_v14 = vld [vmem:[#allocation42_spill] sm:$0xff] }
 0x4ae   :  { %4656 = vpow2.f32 %v1911_v38  ;;  %v4645_v60 = vpop.eup %4644  ;;  %v7203_v38 = vld [vmem:[#allocation41_spill] sm:$0xff] }
 0x4af   :  { %4658 = vrcp.f32 %v1942_v62  ;;  %2265 = vmatprep.mubr.bf16.mxu1 %v2142_v53  ;;  %v2086_v2 = vmul.f32 %v4645_v60, %v5682_v24  ;;  %v2085_v59 = vmul.f32 %v4645_v60, %v7199_v48  ;;  %v7208_v48 = vld [vmem:[#allocation47_spill] sm:$0xff] }
 0x4b0   :  { %2266 = vmatmul.mubr.bf16.gmra.mxu1 %v2141_v57  ;;  %v1945_v39 = vpop.xlane.xlu1 %1944 }
 0x4b1   :  { %v5886_v61 = vpop.eup %4646  ;;  %4660 = vrcp.f32 %v1945_v39  ;;  %v7205_v39 = vld [vmem:[#allocation13_spill] sm:$0xff] }
 0x4b2   :  { %v5888_v19 = vpop.eup %4648 }
 0x4b3   :  { %v4651_v4 = vpop.eup %4650  ;;  %v2003_v34 = vadd.f32 %v5888_v19, %v5886_v61 }
 0x4b4   :  { %v1948_v51 = vpop.xlane.xlu0 %1947  ;;  %v2088_v63 = vmul.f32 %v4651_v4, %v5692_v23  ;;  %v2087_v8 = vmul.f32 %v4651_v4, %v5690_v52  ;;  %v427_v4 = vsel %vm414_vm2, %v7205_v39, 0.0 }
 0x4b5   :  { %4662 = vrcp.f32 %v1948_v51  ;;  %2004 = vadd.xlane.f32.xlu1 %v2003_v34  ;;  %v7206_v34 = vld [vmem:[#allocation10_spill] sm:$0xff] }
 0x4b6   :  { %v2144_v12 = vpack.c.bf16 %v2088_v63, %v2086_v2  ;;  %v2143_v7 = vpack.c.bf16 %v2087_v8, %v2085_v59  ;;  %v4653_v56 = vpop.eup %4652  ;;  %v418_v51 = vsel %vm414_vm2, %v7206_v34, 0.0  ;;  %v7207_v2 = vld [vmem:[#allocation45_spill] sm:$0xff]  ;;  %v7209_v8 = vld [vmem:[#allocation46_spill] sm:$0xff] }
 0x4b7   :  { %v2090_v33 = vmul.f32 %v4653_v56, %v5704_v13  ;;  %v2089_v43 = vmul.f32 %v4653_v56, %v7203_v38  ;;  %v7214_v38 = vld [vmem:[#allocation14_spill] sm:$0xff] }
 0x4b8   :  { %2273 = vmatprep.mubr.bf16.mxu1 %v2144_v12  ;;  %v1951_v42 = vpop.xlane.xlu1 %1950 }
 0x4b9   :  { %2274 = vmatmul.mubr.bf16.gmra.mxu1 %v2143_v7  ;;  %416 = vadd.xlane.f32.xlu1 %v415_v32  ;;  %4664 = vrcp.f32 %v1951_v42  ;;  %v7210_v7 = vld [vmem:[#allocation15_spill] sm:$0xff]  ;;  %v7211_v32 = vld [vmem:[#allocation44_spill] sm:$0xff] }
 0x4ba   :  { %v5898_v25 = vpop.eup %4654  ;;  %v433_v42 = vsel %vm414_vm2, %v7210_v7, 0.0 }
 0x4bb   :  { %v5900_v24 = vpop.eup %4656 }
 0x4bc   :  { %v4659_v23 = vpop.eup %4658  ;;  %v1954_v22 = vpop.xlane.xlu0 %1953  ;;  %v2006_v52 = vadd.f32 %v5900_v24, %v5898_v25 }
 0x4bd   :  { %4666 = vrcp.f32 %v1954_v22  ;;  %422 = vadd.xlane.f32.xlu1 %v421_v17  ;;  %v2092_v41 = vmul.f32 %v4659_v23, %v7202_v58  ;;  %v2091_v62 = vmul.f32 %v4659_v23, %v7204_v14  ;;  %v7212_v23 = vld [vmem:[#allocation8_spill] sm:$0xff]  ;;  %v7213_v58 = vld [vmem:[#allocation17_spill] sm:$0xff] }
 0x4be   :  { %2007 = vadd.xlane.f32.xlu0 %v2006_v52  ;;  %v4661_v60 = vpop.eup %4660  ;;  %v424_v22 = vsel %vm414_vm2, %v7212_v23, 0.0 }
 0x4bf   :  { %v2146_v53 = vpack.c.bf16 %v2092_v41, %v2090_v33  ;;  %v2145_v57 = vpack.c.bf16 %v2091_v62, %v2089_v43  ;;  %v2094_v63 = vmul.f32 %v4661_v60, %v7207_v2  ;;  %v2093_v56 = vmul.f32 %v4661_v60, %v7211_v32  ;;  %v7215_v62 = vld [vmem:[#allocation53_spill] sm:$0xff] }
 0x4c0   :  { %v439_v41 = vsel %vm414_vm2, %v7213_v58, 0.0  ;;  %v430_v43 = vsel %vm414_vm2, %v7214_v38, 0.0  ;;  %v7221_v32 = vld [vmem:[#allocation21_spill] sm:$0xff] }
 0x4c1   :  { %2281 = vmatprep.mubr.bf16.mxu1 %v2146_v53  ;;  %428 = vadd.xlane.f32.xlu1 %v427_v4  ;;  %v7217_v4 = vld [vmem:[#allocation54_spill] sm:$0xff] }
 0x4c2   :  { %v4663_v13 = vpop.eup %4662  ;;  %2282 = vmatmul.mubr.bf16.gmra.mxu1 %v2145_v57  ;;  %419 = vadd.xlane.f32.xlu0 %v418_v51  ;;  %v7216_v57 = vld [vmem:[#allocation55_spill] sm:$0xff] }
 0x4c3   :  { %v2096_v59 = vmul.f32 %v4663_v13, %v7208_v48  ;;  %v2095_v12 = vmul.f32 %v4663_v13, %v7209_v8  ;;  %v7218_v13 = vld [vmem:[#allocation19_spill] sm:$0xff] }
 0x4c4   :  { %v445_v2 = vsel %vm414_vm2, %v7218_v13, 0.0 }
 0x4c5   :  { %434 = vadd.xlane.f32.xlu1 %v433_v42  ;;  %v2148_v52 = vpack.c.bf16 %v2096_v59, %v2094_v63  ;;  %v2147_v17 = vpack.c.bf16 %v2095_v12, %v2093_v56  ;;  %v7219_v63 = vld [vmem:[#allocation52_spill] sm:$0xff]  ;;  %v451_v56 = vsel %vm414_vm2, %v7221_v32, 0.0 }
 0x4c6   :  { %425 = vadd.xlane.f32.xlu0 %v424_v22  ;;  %v4665_v33 = vpop.eup %4664  ;;  %v7220_v59 = vld [vmem:[#allocation12_spill] sm:$0xff]  ;;  %v7222_v22 = vld [vmem:[#allocation18_spill] sm:$0xff] }
 0x4c7   :  { %2289 = vmatprep.mubr.bf16.mxu1 %v2148_v52  ;;  %v2098_v53 = vmul.f32 %v4665_v33, %v7215_v62  ;;  %v2097_v48 = vmul.f32 %v4665_v33, %v7219_v63  ;;  %v436_v8 = vsel %vm414_vm2, %v7220_v59, 0.0  ;;  %v442_v52 = vsel %vm414_vm2, %v7222_v22, 0.0  ;;  %v7229_v63 = vld [vmem:[#allocation29_spill] sm:$0xff] }
 0x4c9   :  { %440 = vadd.xlane.f32.xlu1 %v439_v41  ;;  %v7224_v41 = vld [vmem:[#allocation16_spill] sm:$0xff] }
 0x4ca   :  { %v4667_v14 = vpop.eup %4666  ;;  %2290 = vmatmul.mubr.bf16.gmra.mxu1 %v2147_v17  ;;  %431 = vadd.xlane.f32.xlu0 %v430_v43  ;;  %v7223_v17 = vld [vmem:[#allocation23_spill] sm:$0xff]  ;;  %v448_v43 = vsel %vm414_vm2, %v7224_v41, 0.0 }
 0x4cb   :  { %v2100_v60 = vmul.f32 %v4667_v14, %v7216_v57  ;;  %v2099_v51 = vmul.f32 %v4667_v14, %v7217_v4  ;;  %v457_v33 = vsel %vm414_vm2, %v7223_v17, 0.0  ;;  %v7225_v14 = vld [vmem:[#allocation25_spill] sm:$0xff] }
 0x4cc   :  { %v463_v62 = vsel %vm414_vm2, %v7225_v14, 0.0 }
 0x4cd   :  { %446 = vadd.xlane.f32.xlu1 %v445_v2  ;;  %v2150_v12 = vpack.c.bf16 %v2100_v60, %v2098_v53  ;;  %v2149_v42 = vpack.c.bf16 %v2099_v51, %v2097_v48  ;;  %v7226_v53 = vld [vmem:[#allocation22_spill] sm:$0xff]  ;;  %v7227_v60 = vld [vmem:[#allocation27_spill] sm:$0xff]  ;;  %v7228_v51 = vld [vmem:[#allocation20_spill] sm:$0xff]  ;;  %v475_v48 = vsel %vm414_vm2, %v7229_v63, 0.0 }
 0x4ce   :  { %437 = vadd.xlane.f32.xlu0 %v436_v8  ;;  %v454_v57 = vsel %vm414_vm2, %v7226_v53, 0.0  ;;  %v469_v4 = vsel %vm414_vm2, %v7227_v60, 0.0  ;;  %v460_v2 = vsel %vm414_vm2, %v7228_v51, 0.0  ;;  %v7230_v8 = vld [vmem:[#allocation26_spill] sm:$0xff] }
 0x4cf   :  { %2297 = vmatprep.mubr.bf16.mxu1 %v2150_v12  ;;  %v466_v12 = vsel %vm414_vm2, %v7230_v8, 0.0  ;;  %v7236_v8 = vld [vmem:[#allocation28_spill] sm:$0xff] }
 0x4d1   :  { %452 = vadd.xlane.f32.xlu1 %v451_v56 }
 0x4d2   :  { %2298 = vmatmul.mubr.bf16.gmra.mxu1 %v2149_v42  ;;  %443 = vadd.xlane.f32.xlu0 %v442_v52  ;;  %v7231_v42 = vld [vmem:[#allocation31_spill] sm:$0xff]  ;;  %v7232_v52 = vld [vmem:[#allocation24_spill] sm:$0xff] }
 0x4d3   :  { %v481_v56 = vsel %vm414_vm2, %v7231_v42, 0.0 }
 0x4d5   :  { %458 = vadd.xlane.f32.xlu1 %v457_v33  ;;  %v472_v33 = vsel %vm414_vm2, %v7232_v52, 0.0  ;;  %v7242_v52 = vld [vmem:[#allocation36_spill] sm:$0xff] }
 0x4d6   :  { %449 = vadd.xlane.f32.xlu0 %v448_v43  ;;  %v7233_v43 = vld [vmem:[#allocation33_spill] sm:$0xff] }
 0x4d9   :  { %464 = vadd.xlane.f32.xlu1 %v463_v62  ;;  %v487_v62 = vsel %vm414_vm2, %v7233_v43, 0.0 }
 0x4da   :  { %455 = vadd.xlane.f32.xlu0 %v454_v57  ;;  %v7234_v57 = vld [vmem:[#allocation30_spill] sm:$0xff] }
 0x4dd   :  { %470 = vadd.xlane.f32.xlu1 %v469_v4  ;;  %v478_v4 = vsel %vm414_vm2, %v7234_v57, 0.0 }
 0x4de   :  { %461 = vadd.xlane.f32.xlu0 %v460_v2  ;;  %v7235_v2 = vld [vmem:[#allocation35_spill] sm:$0xff] }
 0x4e1   :  { %476 = vadd.xlane.f32.xlu1 %v475_v48  ;;  %v493_v48 = vsel %vm414_vm2, %v7235_v2, 0.0  ;;  %v7238_v2 = vld [vmem:[#allocation34_spill] sm:$0xff] }
 0x4e2   :  { %467 = vadd.xlane.f32.xlu0 %v466_v12  ;;  %v4496_v12 = vld [vmem:[%s7009_s7 + $0x8] sm:$0xff]   ;;  %v490_v57 = vsel %vm414_vm2, %v7238_v2, 0.0 }
 0x4e3   :  { %4335 = vmatprep.subr.bf16.mxu0 %v4496_v12  ;;  %4455 = vmatprep.subr.bf16.mxu1 %v4496_v12 }
 0x4e4   :  { %4336 = vmatpush3.bf16.msra.mxu0 %v4496_v12  ;;  %4457 = vmatpush3.bf16.msra.mxu1 %v4496_v12 }
 0x4e5   :  { %482 = vadd.xlane.f32.xlu1 %v481_v56  ;;  %v484_v56 = vsel %vm414_vm2, %v7236_v8, 0.0 }
 0x4e6   :  { %473 = vadd.xlane.f32.xlu0 %v472_v33  ;;  %v7237_v33 = vld [vmem:[#allocation37_spill] sm:$0xff] }
 0x4e9   :  { %488 = vadd.xlane.f32.xlu1 %v487_v62  ;;  %v499_v62 = vsel %vm414_vm2, %v7237_v33, 0.0  ;;  %v7240_v33 = vld [vmem:[#allocation32_spill] sm:$0xff] }
 0x4ea   :  { %479 = vadd.xlane.f32.xlu0 %v478_v4  ;;  %v4497_v4 = vld [vmem:[%s7009_s7] sm:$0xff]   ;;  %v496_v8 = vsel %vm414_vm2, %v7240_v33, 0.0 }
 0x4eb   :  { %4337 = vmatprep.subr.bf16.mxu0 %v4497_v4  ;;  %4456 = vmatprep.subr.bf16.mxu1 %v4497_v4 }
 0x4ec   :  { %4338 = vmatpush3.bf16.msra.mxu0 %v4497_v4  ;;  %4458 = vmatpush3.bf16.msra.mxu1 %v4497_v4 }
 0x4ed   :  { %v1957_v42 = vpop.xlane.xlu1 %1956  ;;  %494 = vadd.xlane.f32.xlu1 %v493_v48 }
 0x4ee   :  { %485 = vadd.xlane.f32.xlu0 %v484_v56  ;;  %4668 = vrcp.f32 %v1957_v42  ;;  %v7239_v42 = vld [vmem:[#allocation39_spill] sm:$0xff] }
 0x4ef   :  { %v505_v56 = vsel %vm414_vm2, %v7239_v42, 0.0  ;;  %v508_v42 = vsel %vm414_vm2, %v7242_v52, 0.0 }
 0x4f1   :  { %v1960_v43 = vpop.xlane.xlu0 %1959  ;;  %500 = vadd.xlane.f32.xlu1 %v499_v62 }
 0x4f2   :  { %491 = vadd.xlane.f32.xlu0 %v490_v57  ;;  %4670 = vrcp.f32 %v1960_v43  ;;  %v7241_v57 = vld [vmem:[#allocation38_spill] sm:$0xff] }
 0x4f3   :  { %v1963_v48 = vpop.xlane.xlu1 %1962  ;;  %v502_v43 = vsel %vm414_vm2, %v7241_v57, 0.0 }
 0x4f4   :  { %4672 = vrcp.f32 %v1963_v48 }
 0x4f5   :  { %v1966_v12 = vpop.xlane.xlu0 %1965  ;;  %506 = vadd.xlane.f32.xlu1 %v505_v56 }
 0x4f6   :  { %497 = vadd.xlane.f32.xlu0 %v496_v8  ;;  %4674 = vrcp.f32 %v1966_v12 }
 0x4f7   :  { %v1969_v2 = vpop.xlane.xlu1 %1968 }
 0x4f8   :  { %4676 = vrcp.f32 %v1969_v2 }
 0x4f9   :  { %v1972_v62 = vpop.xlane.xlu0 %1971 }
 0x4fa   :  { %503 = vadd.xlane.f32.xlu0 %v502_v43  ;;  %4678 = vrcp.f32 %v1972_v62 }
 0x4fb   :  { %v4669_v48 = vpop.eup %4668  ;;  %v1975_v33 = vpop.xlane.xlu1 %1974 }
 0x4fc   :  { %v2102_v56 = vmul.f32 %v4669_v48, %v5762_v20  ;;  %v2101_v2 = vmul.f32 %v4669_v48, %v5759_v47 }
 0x4fd   :  { %v1978_v4 = vpop.xlane.xlu0 %1977 }
 0x4fe   :  { %509 = vadd.xlane.f32.xlu0 %v508_v42  ;;  %4680 = vrcp.f32 %v1978_v4 }
 0x4ff   :  { %v4671_v63 = vpop.eup %4670  ;;  %4682 = vrcp.f32 %v1975_v33 }
 0x500   :  { %v2104_v8 = vmul.f32 %v4671_v63, %v5772_v36  ;;  %v2103_v12 = vmul.f32 %v4671_v63, %v5769_v16  ;;  %v1981_v36 = vpop.xlane.xlu1 %1980 }
 0x501   :  { %v4673_v57 = vpop.eup %4672  ;;  %v1984_v60 = vpop.xlane.xlu0 %1983 }
 0x502   :  { %v2152_v43 = vpack.c.bf16 %v2104_v8, %v2102_v56  ;;  %v2151_v62 = vpack.c.bf16 %v2103_v12, %v2101_v2  ;;  %v2106_v52 = vmul.f32 %v4673_v57, %v5778_v28  ;;  %4684 = vrcp.f32 %v1984_v60 }
 0x503   :  { %v4675_v51 = vpop.eup %4674  ;;  %v2105_v63 = vmul.f32 %v4673_v57, %v5774_v50  ;;  %4686 = vrcp.f32 %v1981_v36 }
 0x504   :  { %2305 = vmatprep.mubr.bf16.mxu1 %v2152_v43  ;;  %v2108_v42 = vmul.f32 %v4675_v51, %v5788_v21  ;;  %v2107_v47 = vmul.f32 %v4675_v51, %v5783_v3  ;;  %v1987_v8 = vpop.xlane.xlu1 %1986 }
 0x505   :  { %2306 = vmatmul.mubr.bf16.gmra.mxu1 %v2151_v62  ;;  %v4677_v20 = vpop.eup %4676  ;;  %v1990_v56 = vpop.xlane.xlu0 %1989 }
 0x506   :  { %v2154_v4 = vpack.c.bf16 %v2108_v42, %v2106_v52  ;;  %v2110_v33 = vmul.f32 %v4677_v20, %v5794_v46  ;;  %v2153_v28 = vpack.c.bf16 %v2107_v47, %v2105_v63  ;;  %4688 = vrcp.f32 %v1990_v56 }
 0x507   :  { %v4679_v53 = vpop.eup %4678  ;;  %4690 = vrcp.f32 %v1987_v8 }
 0x508   :  { %2313 = vmatprep.mubr.bf16.mxu1 %v2154_v4  ;;  %v2112_v16 = vmul.f32 %v4679_v53, %v5804_v45  ;;  %v2111_v2 = vmul.f32 %v4679_v53, %v5799_v55  ;;  %v2109_v45 = vmul.f32 %v4677_v20, %v5790_v30  ;;  %v1993_v43 = vpop.xlane.xlu1 %1992 }
 0x509   :  { %v1996_v57 = vpop.xlane.xlu0 %1995 }
 0x50a   :  { %v2156_v48 = vpack.c.bf16 %v2112_v16, %v2110_v33  ;;  %v2155_v60 = vpack.c.bf16 %v2111_v2, %v2109_v45  ;;  %4692 = vrcp.f32 %v1996_v57 }
 0x50b   :  { %v4681_v21 = vpop.eup %4680  ;;  %4694 = vrcp.f32 %v1993_v43 }
 0x50c   :  { %v4683_v52 = vpop.eup %4682  ;;  %v2116_v3 = vmul.f32 %v4681_v21, %v5818_v29  ;;  %v2115_v62 = vmul.f32 %v4681_v21, %v5814_v10  ;;  %v1999_v36 = vpop.xlane.xlu1 %1998 }
 0x50d   :  { %2314 = vmatmul.mubr.bf16.gmra.mxu1 %v2153_v28  ;;  %v2114_v50 = vmul.f32 %v4683_v52, %v5810_v18  ;;  %v2113_v29 = vmul.f32 %v4683_v52, %v5806_v35  ;;  %v2002_v20 = vpop.xlane.xlu0 %2001 }
 0x50e   :  { %2321 = vmatprep.mubr.bf16.mxu1 %v2156_v48  ;;  %4696 = vrcp.f32 %v2002_v20 }
 0x50f   :  { %v2158_v46 = vpack.c.bf16 %v2116_v3, %v2114_v50  ;;  %v4685_v51 = vpop.eup %4684  ;;  %v2157_v53 = vpack.c.bf16 %v2115_v62, %v2113_v29  ;;  %4698 = vrcp.f32 %v1999_v36  ;;  %v7243_v3 = vld [vmem:[#allocation49_spill] sm:$0xff]  ;;  %v7245_v50 = vld [vmem:[#allocation48_spill] sm:$0xff] }
 0x510   :  { %v4687_v12 = vpop.eup %4686  ;;  %v2120_v55 = vmul.f32 %v4685_v51, %v5830_v31  ;;  %v2119_v47 = vmul.f32 %v4685_v51, %v5826_v27 }
 0x511   :  { %v2118_v30 = vmul.f32 %v4687_v12, %v5824_v5  ;;  %v2117_v31 = vmul.f32 %v4687_v12, %v5820_v54 }
 0x513   :  { %v2160_v18 = vpack.c.bf16 %v2120_v55, %v2118_v30  ;;  %v4689_v42 = vpop.eup %4688  ;;  %v2159_v16 = vpack.c.bf16 %v2119_v47, %v2117_v31 }
 0x514   :  { %v4691_v4 = vpop.eup %4690  ;;  %v2124_v10 = vmul.f32 %v4689_v42, %v5842_v6  ;;  %v2123_v28 = vmul.f32 %v4689_v42, %v5838_v49 }
 0x515   :  { %2322 = vmatmul.mubr.bf16.gmra.mxu1 %v2155_v60  ;;  %v2122_v35 = vmul.f32 %v4691_v4, %v5836_v37  ;;  %v2121_v27 = vmul.f32 %v4691_v4, %v5832_v0  ;;  %v7244_v0 = vld [vmem:[#allocation50_spill] sm:$0xff] }
 0x516   :  { %2329 = vmatprep.mubr.bf16.mxu1 %v2158_v46 }
 0x517   :  { %v2162_v5 = vpack.c.bf16 %v2124_v10, %v2122_v35  ;;  %v4693_v63 = vpop.eup %4692  ;;  %v2161_v6 = vpack.c.bf16 %v2123_v28, %v2121_v27 }
 0x518   :  { %v4695_v33 = vpop.eup %4694  ;;  %v2128_v48 = vmul.f32 %v4693_v63, %v5854_v9  ;;  %v2127_v52 = vmul.f32 %v4693_v63, %v5850_v11 }
 0x519   :  { %v2126_v21 = vmul.f32 %v4695_v33, %v5848_v15  ;;  %v2125_v2 = vmul.f32 %v4695_v33, %v5844_v26 }
 0x51b   :  { %v2164_v56 = vpack.c.bf16 %v2128_v48, %v2126_v21  ;;  %v4697_v54 = vpop.eup %4696  ;;  %v2163_v45 = vpack.c.bf16 %v2127_v52, %v2125_v2 }
 0x51c   :  { %v4699_v37 = vpop.eup %4698  ;;  %v2132_v8 = vmul.f32 %v4697_v54, %v5866_v1  ;;  %v2131_v15 = vmul.f32 %v4697_v54, %v7244_v0 }
 0x51d   :  { %2330 = vmatmul.mubr.bf16.gmra.mxu1 %v2157_v53  ;;  %v2130_v49 = vmul.f32 %v4699_v37, %v7243_v3  ;;  %v2129_v60 = vmul.f32 %v4699_v37, %v7245_v50 }
 0x51e   :  { %2337 = vmatprep.mubr.bf16.mxu1 %v2160_v18 }
 0x51f   :  { %v2166_v9 = vpack.c.bf16 %v2132_v8, %v2130_v49  ;;  %v2165_v46 = vpack.c.bf16 %v2131_v15, %v2129_v60 }
 0x525   :  { %2338 = vmatmul.mubr.bf16.gmra.mxu1 %v2159_v16 }
 0x526   :  { %2345 = vmatprep.mubr.bf16.mxu1 %v2162_v5 }
 0x52d   :  { %2346 = vmatmul.mubr.bf16.gmra.mxu1 %v2161_v6 }
 0x52e   :  { %2353 = vmatprep.mubr.bf16.mxu1 %v2164_v56 }
 0x535   :  { %2354 = vmatmul.mubr.bf16.gmra.mxu1 %v2163_v45 }
 0x536   :  { %2361 = vmatprep.mubr.bf16.mxu1 %v2166_v9 }
 0x53d   :  { %2362 = vmatmul.mubr.bf16.gmra.mxu1 %v2165_v46 }
 0x53e   :  { %v2005_v51 = vpop.xlane.xlu1 %2004 }
 0x53f   :  { %4700 = vrcp.f32 %v2005_v51 }
 0x542   :  { %v417_v57 = vpop.xlane.xlu1 %416 }
 0x543   :  { %v512_v12 = vmul.f32 0.03125, %v417_v57 }
 0x545   :  { %v6017_v11 = vsub.f32 %v7200_v44, %v512_v12 }
 0x546   :  { %v423_v26 = vpop.xlane.xlu1 %422 }
 0x547   :  { %v2008_v1 = vpop.xlane.xlu0 %2007  ;;  %v514_v43 = vmul.f32 0.03125, %v423_v26  ;;  %v576_v62 = vmul.f32 %v6017_v11, %v6017_v11 }
 0x548   :  { %4702 = vrcp.f32 %v2008_v1 }
 0x549   :  { %v6022_v55 = vsub.f32 %v7201_v40, %v514_v43  ;;  %v608_v29 = vsel %vm414_vm2, %v576_v62, 0.0 }
 0x54a   :  { %609 = vadd.xlane.f32.xlu1 %v608_v29  ;;  %v429_v30 = vpop.xlane.xlu1 %428 }
 0x54b   :  { %v420_v53 = vpop.xlane.xlu0 %419  ;;  %v516_v18 = vmul.f32 0.03125, %v429_v30  ;;  %v578_v44 = vmul.f32 %v6022_v55, %v6022_v55 }
 0x54c   :  { %v513_v42 = vmul.f32 0.03125, %v420_v53  ;;  %v4701_v63 = vpop.eup %4700 }
 0x54d   :  { %v6028_v20 = vsub.f32 %v7205_v39, %v516_v18  ;;  %v614_v4 = vsel %vm414_vm2, %v578_v44, 0.0  ;;  %v2134_v37 = vmul.f32 %v4701_v63, %v5888_v19  ;;  %v2133_v52 = vmul.f32 %v4701_v63, %v5886_v61 }
 0x54e   :  { %v6032_v36 = vsub.f32 %v7206_v34, %v513_v42  ;;  %615 = vadd.xlane.f32.xlu1 %v614_v4  ;;  %v435_v40 = vpop.xlane.xlu1 %434 }
 0x54f   :  { %v426_v47 = vpop.xlane.xlu0 %425  ;;  %v518_v10 = vmul.f32 0.03125, %v435_v40  ;;  %v580_v31 = vmul.f32 %v6028_v20, %v6028_v20 }
 0x550   :  { %v515_v35 = vmul.f32 0.03125, %v426_v47  ;;  %v577_v16 = vmul.f32 %v6032_v36, %v6032_v36 }
 0x551   :  { %v6039_v5 = vsub.f32 %v7210_v7, %v518_v10  ;;  %v620_v39 = vsel %vm414_vm2, %v580_v31, 0.0 }
 0x552   :  { %v6043_v34 = vsub.f32 %v7212_v23, %v515_v35  ;;  %v611_v33 = vsel %vm414_vm2, %v577_v16, 0.0  ;;  %621 = vadd.xlane.f32.xlu1 %v620_v39  ;;  %v441_v28 = vpop.xlane.xlu1 %440 }
 0x553   :  { %612 = vadd.xlane.f32.xlu0 %v611_v33  ;;  %v432_v48 = vpop.xlane.xlu0 %431  ;;  %v520_v27 = vmul.f32 0.03125, %v441_v28  ;;  %v582_v21 = vmul.f32 %v6039_v5, %v6039_v5 }
 0x554   :  { %v517_v6 = vmul.f32 0.03125, %v432_v48  ;;  %v579_v7 = vmul.f32 %v6043_v34, %v6043_v34  ;;  %v7246_v48 = vld [vmem:[#allocation22_spill] sm:$0xff] }
 0x555   :  { %v4703_v56 = vpop.eup %4702  ;;  %v6051_v54 = vsub.f32 %v7213_v58, %v520_v27  ;;  %v626_v23 = vsel %vm414_vm2, %v582_v21, 0.0 }
 0x556   :  { %v6057_v8 = vsub.f32 %v7214_v38, %v517_v6  ;;  %v617_v2 = vsel %vm414_vm2, %v579_v7, 0.0  ;;  %627 = vadd.xlane.f32.xlu1 %v626_v23  ;;  %v447_v3 = vpop.xlane.xlu1 %446  ;;  %v2136_v49 = vmul.f32 %v4703_v56, %v5900_v24  ;;  %v2135_v45 = vmul.f32 %v4703_v56, %v5898_v25 }
 0x557   :  { %618 = vadd.xlane.f32.xlu0 %v617_v2  ;;  %v438_v58 = vpop.xlane.xlu0 %437  ;;  %v522_v9 = vmul.f32 0.03125, %v447_v3  ;;  %v584_v0 = vmul.f32 %v6051_v54, %v6051_v54 }
 0x558   :  { %v519_v19 = vmul.f32 0.03125, %v438_v58  ;;  %v2168_v15 = vpack.c.bf16 %v2136_v49, %v2134_v37  ;;  %v2167_v61 = vpack.c.bf16 %v2135_v45, %v2133_v52  ;;  %v581_v38 = vmul.f32 %v6057_v8, %v6057_v8  ;;  %v7247_v58 = vld [vmem:[#allocation27_spill] sm:$0xff] }
 0x559   :  { %v6067_v50 = vsub.f32 %v7218_v13, %v522_v9  ;;  %v632_v60 = vsel %vm414_vm2, %v584_v0, 0.0 }
 0x55a   :  { %v6071_v24 = vsub.f32 %v7220_v59, %v519_v19  ;;  %2369 = vmatprep.mubr.bf16.mxu1 %v2168_v15  ;;  %v623_v25 = vsel %vm414_vm2, %v581_v38, 0.0  ;;  %633 = vadd.xlane.f32.xlu1 %v632_v60  ;;  %v453_v46 = vpop.xlane.xlu1 %452  ;;  %v7248_v19 = vld [vmem:[#allocation20_spill] sm:$0xff] }
 0x55b   :  { %2370 = vmatmul.mubr.bf16.gmra.mxu1 %v2167_v61  ;;  %624 = vadd.xlane.f32.xlu0 %v623_v25  ;;  %v444_v51 = vpop.xlane.xlu0 %443  ;;  %v524_v57 = vmul.f32 0.03125, %v453_v46  ;;  %v586_v12 = vmul.f32 %v6067_v50, %v6067_v50 }
 0x55c   :  { %v521_v26 = vmul.f32 0.03125, %v444_v51  ;;  %v583_v13 = vmul.f32 %v6071_v24, %v6071_v24 }
 0x55d   :  { %v6079_v1 = vsub.f32 %v7221_v32, %v524_v57  ;;  %v638_v59 = vsel %vm414_vm2, %v586_v12, 0.0 }
 0x55e   :  { %v6083_v43 = vsub.f32 %v7222_v22, %v521_v26  ;;  %v629_v62 = vsel %vm414_vm2, %v583_v13, 0.0  ;;  %639 = vadd.xlane.f32.xlu1 %v638_v59  ;;  %v459_v29 = vpop.xlane.xlu1 %458  ;;  %v7249_v13 = vld [vmem:[#allocation29_spill] sm:$0xff] }
 0x55f   :  { %630 = vadd.xlane.f32.xlu0 %v629_v62  ;;  %v450_v30 = vpop.xlane.xlu0 %449  ;;  %v526_v53 = vmul.f32 0.03125, %v459_v29  ;;  %v588_v18 = vmul.f32 %v6079_v1, %v6079_v1  ;;  %v7250_v29 = vld [vmem:[#allocation26_spill] sm:$0xff] }
 0x560   :  { %v523_v44 = vmul.f32 0.03125, %v450_v30  ;;  %v4079_v42 = vpop.f32.mrf.mxu1  ;;  %v585_v32 = vmul.f32 %v6083_v43, %v6083_v43 }
 0x561   :  { %v6091_v4 = vsub.f32 %v7223_v17, %v526_v53  ;;  %v644_v22 = vsel %vm414_vm2, %v588_v18, 0.0 }
 0x562   :  { %v6095_v40 = vsub.f32 %v7224_v41, %v523_v44  ;;  %v4080_v47 = vpop.f32.mrf.mxu1  ;;  %v635_v10 = vsel %vm414_vm2, %v585_v32, 0.0  ;;  %645 = vadd.xlane.f32.xlu1 %v644_v22  ;;  %v465_v31 = vpop.xlane.xlu1 %464 }
 0x563   :  { %636 = vadd.xlane.f32.xlu0 %v635_v10  ;;  %v456_v35 = vpop.xlane.xlu0 %455  ;;  %v528_v16 = vmul.f32 0.03125, %v465_v31  ;;  %v590_v39 = vmul.f32 %v6091_v4, %v6091_v4  ;;  %v4081_v56 = vadd.f32 %v4080_v47, %v4079_v42 }
 0x564   :  { %v525_v63 = vmul.f32 0.03125, %v456_v35  ;;  %v4082_v33 = vpop.f32.mrf.mxu1  ;;  %v587_v17 = vmul.f32 %v6095_v40, %v6095_v40 }
 0x565   :  { %v6103_v28 = vsub.f32 %v7225_v14, %v528_v16  ;;  %v650_v41 = vsel %vm414_vm2, %v590_v39, 0.0 }
 0x566   :  { %v6107_v27 = vsub.f32 %v7246_v48, %v525_v63  ;;  %v4083_v21 = vpop.f32.mrf.mxu1  ;;  %v641_v6 = vsel %vm414_vm2, %v587_v17, 0.0  ;;  %651 = vadd.xlane.f32.xlu1 %v650_v41  ;;  %v471_v7 = vpop.xlane.xlu1 %470  ;;  %v7251_v63 = vld [vmem:[#allocation31_spill] sm:$0xff]  ;;  %v7252_v41 = vld [vmem:[#allocation24_spill] sm:$0xff] }
 0x567   :  { %v4084_v23 = vadd.f32 %v4083_v21, %v4082_v33  ;;  %642 = vadd.xlane.f32.xlu0 %v641_v6  ;;  %v462_v37 = vpop.xlane.xlu0 %461  ;;  %v530_v52 = vmul.f32 0.03125, %v471_v7  ;;  %v592_v2 = vmul.f32 %v6103_v28, %v6103_v28 }
 0x568   :  { %v527_v14 = vmul.f32 0.03125, %v462_v37  ;;  %v4085_v3 = vpop.f32.mrf.mxu1  ;;  %v589_v49 = vmul.f32 %v6107_v27, %v6107_v27 }
 0x569   :  { %v2382_v45 = vpack.c.bf16 %v4084_v23, %v4081_v56  ;;  %v6115_v9 = vsub.f32 %v7247_v58, %v530_v52  ;;  %v656_v0 = vsel %vm414_vm2, %v592_v2, 0.0  ;;  %v7254_v58 = vld [vmem:[#allocation30_spill] sm:$0xff] }
 0x56a   :  { %v6119_v15 = vsub.f32 %v7248_v19, %v527_v14  ;;  %v4086_v61 = vpop.f32.mrf.mxu1  ;;  %v647_v38 = vsel %vm414_vm2, %v589_v49, 0.0  ;;  %657 = vadd.xlane.f32.xlu1 %v656_v0  ;;  %v477_v60 = vpop.xlane.xlu1 %476 }
 0x56b   :  { %648 = vadd.xlane.f32.xlu0 %v647_v38  ;;  %v468_v25 = vpop.xlane.xlu0 %467  ;;  %v532_v46 = vmul.f32 0.03125, %v477_v60  ;;  %4339 = vmatprep.mubr.msk.bf16.mxu0 %vm414_vm2, %v2382_v45  ;;  %v594_v51 = vmul.f32 %v6115_v9, %v6115_v9  ;;  %v4087_v42 = vadd.f32 %v4086_v61, %v4085_v3  ;;  %v7253_v3 = vld [vmem:[#allocation33_spill] sm:$0xff] }
 0x56c   :  { %v529_v57 = vmul.f32 0.03125, %v468_v25  ;;  %v4088_v12 = vpop.f32.mrf.mxu1  ;;  %v591_v26 = vmul.f32 %v6119_v15, %v6119_v15 }
 0x56d   :  { %v6128_v59 = vsub.f32 %v7249_v13, %v532_v46  ;;  %v662_v62 = vsel %vm414_vm2, %v594_v51, 0.0 }
 0x56e   :  { %v6132_v30 = vsub.f32 %v7250_v29, %v529_v57  ;;  %v4089_v53 = vpop.f32.mrf.mxu1  ;;  %v653_v18 = vsel %vm414_vm2, %v591_v26, 0.0  ;;  %663 = vadd.xlane.f32.xlu1 %v662_v62  ;;  %v483_v44 = vpop.xlane.xlu1 %482  ;;  %v7255_v62 = vld [vmem:[#allocation35_spill] sm:$0xff] }
 0x56f   :  { %v4090_v32 = vadd.f32 %v4089_v53, %v4088_v12  ;;  %654 = vadd.xlane.f32.xlu0 %v653_v18  ;;  %v474_v22 = vpop.xlane.xlu0 %473  ;;  %v534_v47 = vmul.f32 0.03125, %v483_v44  ;;  %v596_v10 = vmul.f32 %v6128_v59, %v6128_v59  ;;  %v7256_v44 = vld [vmem:[#allocation28_spill] sm:$0xff] }
 0x570   :  { %v531_v31 = vmul.f32 0.03125, %v474_v22  ;;  %v4091_v35 = vpop.f32.mrf.mxu1  ;;  %v593_v16 = vmul.f32 %v6132_v30, %v6132_v30 }
 0x571   :  { %v2383_v39 = vpack.c.bf16 %v4090_v32, %v4087_v42  ;;  %v6140_v33 = vsub.f32 %v7251_v63, %v534_v47  ;;  %v668_v17 = vsel %vm414_vm2, %v596_v10, 0.0  ;;  %v7257_v63 = vld [vmem:[#allocation37_spill] sm:$0xff] }
 0x572   :  { %v6144_v48 = vsub.f32 %v7252_v41, %v531_v31  ;;  %v4092_v21 = vpop.f32.mrf.mxu1  ;;  %v659_v6 = vsel %vm414_vm2, %v593_v16, 0.0  ;;  %669 = vadd.xlane.f32.xlu1 %v668_v17  ;;  %v489_v7 = vpop.xlane.xlu1 %488 }
 0x573   :  { %660 = vadd.xlane.f32.xlu0 %v659_v6  ;;  %v480_v56 = vpop.xlane.xlu0 %479  ;;  %v536_v23 = vmul.f32 0.03125, %v489_v7  ;;  %4340 = vmatmul.mubr.msk.bf16.vlgmr.msra.gmra.mxu0 %vm414_vm2, %v2383_v39  ;;  %v598_v37 = vmul.f32 %v6140_v33, %v6140_v33  ;;  %v4093_v60 = vadd.f32 %v4092_v21, %v4091_v35  ;;  %v7258_v6 = vld [vmem:[#allocation34_spill] sm:$0xff] }
 0x574   :  { %v533_v52 = vmul.f32 0.03125, %v480_v56  ;;  %v4094_v2 = vpop.f32.mrf.mxu1  ;;  %v595_v14 = vmul.f32 %v6144_v48, %v6144_v48 }
 0x575   :  { %v6153_v49 = vsub.f32 %v7253_v3, %v536_v23  ;;  %v674_v45 = vsel %vm414_vm2, %v598_v37, 0.0 }
 0x576   :  { %v6157_v0 = vsub.f32 %v7254_v58, %v533_v52  ;;  %v4095_v19 = vpop.f32.mrf.mxu1  ;;  %v665_v61 = vsel %vm414_vm2, %v595_v14, 0.0  ;;  %675 = vadd.xlane.f32.xlu1 %v674_v45  ;;  %v495_v38 = vpop.xlane.xlu1 %494 }
 0x577   :  { %v4096_v25 = vadd.f32 %v4095_v19, %v4094_v2  ;;  %666 = vadd.xlane.f32.xlu0 %v665_v61  ;;  %v486_v46 = vpop.xlane.xlu0 %485  ;;  %v538_v51 = vmul.f32 0.03125, %v495_v38  ;;  %v600_v57 = vmul.f32 %v6153_v49, %v6153_v49  ;;  %v7259_v61 = vld [vmem:[#allocation39_spill] sm:$0xff] }
 0x578   :  { %v535_v12 = vmul.f32 0.03125, %v486_v46  ;;  %v597_v26 = vmul.f32 %v6157_v0, %v6157_v0  ;;  %v7260_v46 = vld [vmem:[#allocation32_spill] sm:$0xff] }
 0x579   :  { %v2384_v13 = vpack.c.bf16 %v4096_v25, %v4093_v60  ;;  %v6165_v29 = vsub.f32 %v7255_v62, %v538_v51  ;;  %v4097_v53 = vpop.f32.mrf.mxu1  ;;  %v680_v18 = vsel %vm414_vm2, %v600_v57, 0.0 }
 0x57a   :  { %v6169_v42 = vsub.f32 %v7256_v44, %v535_v12  ;;  %v671_v32 = vsel %vm414_vm2, %v597_v26, 0.0  ;;  %681 = vadd.xlane.f32.xlu1 %v680_v18  ;;  %v501_v22 = vpop.xlane.xlu1 %500 }
 0x57b   :  { %v4098_v47 = vpop.f32.mrf.mxu1  ;;  %672 = vadd.xlane.f32.xlu0 %v671_v32  ;;  %v492_v10 = vpop.xlane.xlu0 %491  ;;  %v540_v31 = vmul.f32 0.03125, %v501_v22  ;;  %4343 = vmatprep.mubr.msk.bf16.mxu0 %vm414_vm2, %v2384_v13  ;;  %v602_v35 = vmul.f32 %v6165_v29, %v6165_v29  ;;  %v7261_v32 = vld [vmem:[#allocation38_spill] sm:$0xff] }
 0x57c   :  { %v537_v16 = vmul.f32 0.03125, %v492_v10  ;;  %v599_v39 = vmul.f32 %v6169_v42, %v6169_v42  ;;  %v4099_v3 = vadd.f32 %v4098_v47, %v4097_v53 }
 0x57d   :  { %v6178_v17 = vsub.f32 %v7257_v63, %v540_v31  ;;  %v4100_v41 = vpop.f32.mrf.mxu1  ;;  %v686_v21 = vsel %vm414_vm2, %v602_v35, 0.0 }
 0x57e   :  { %v6182_v7 = vsub.f32 %v7258_v6, %v537_v16  ;;  %v677_v56 = vsel %vm414_vm2, %v599_v39, 0.0  ;;  %687 = vadd.xlane.f32.xlu1 %v686_v21  ;;  %v507_v23 = vpop.xlane.xlu1 %506  ;;  %v7262_v21 = vld [vmem:[#allocation36_spill] sm:$0xff] }
 0x57f   :  { %v4101_v37 = vpop.f32.mrf.mxu1  ;;  %678 = vadd.xlane.f32.xlu0 %v677_v56  ;;  %v498_v52 = vpop.xlane.xlu0 %497  ;;  %v542_v2 = vmul.f32 0.03125, %v507_v23  ;;  %v604_v14 = vmul.f32 %v6178_v17, %v6178_v17 }
 0x580   :  { %v4102_v45 = vadd.f32 %v4101_v37, %v4100_v41  ;;  %v539_v58 = vmul.f32 0.03125, %v498_v52  ;;  %v601_v19 = vmul.f32 %v6182_v7, %v6182_v7 }
 0x581   :  { %v6190_v38 = vsub.f32 %v7259_v61, %v542_v2  ;;  %v692_v60 = vsel %vm414_vm2, %v604_v14, 0.0 }
 0x582   :  { %v2385_v25 = vpack.c.bf16 %v4102_v45, %v4099_v3  ;;  %v6194_v51 = vsub.f32 %v7260_v46, %v539_v58  ;;  %v4103_v57 = vpop.f32.mrf.mxu1  ;;  %v683_v12 = vsel %vm414_vm2, %v601_v19, 0.0  ;;  %693 = vadd.xlane.f32.xlu1 %v692_v60 }
 0x583   :  { %684 = vadd.xlane.f32.xlu0 %v683_v12  ;;  %v504_v26 = vpop.xlane.xlu0 %503  ;;  %v606_v13 = vmul.f32 %v6190_v38, %v6190_v38 }
 0x584   :  { %v4104_v62 = vpop.f32.mrf.mxu1  ;;  %v541_v53 = vmul.f32 0.03125, %v504_v26  ;;  %4344 = vmatmul.mubr.msk.bf16.gmra.mxu0 %vm414_vm2, %v2385_v25  ;;  %v603_v18 = vmul.f32 %v6194_v51, %v6194_v51 }
 0x585   :  { %v698_v44 = vsel %vm414_vm2, %v606_v13, 0.0  ;;  %v4105_v63 = vadd.f32 %v4104_v62, %v4103_v57  ;;  %v4498_v62 = vld [vmem:[%s7011_s9 + $0x8] sm:$0xff]  }
 0x586   :  { %v6204_v22 = vsub.f32 %v7261_v32, %v541_v53  ;;  %v4106_v47 = vpop.f32.mrf.mxu1  ;;  %v689_v10 = vsel %vm414_vm2, %v603_v18, 0.0  ;;  %699 = vadd.xlane.f32.xlu1 %v698_v44  ;;  %4371 = vmatprep.subr.bf16.mxu1 %v4498_v62 }
 0x587   :  { %690 = vadd.xlane.f32.xlu0 %v689_v10  ;;  %v510_v31 = vpop.xlane.xlu0 %509 }
 0x588   :  { %v4107_v35 = vpop.f32.mrf.mxu1  ;;  %v543_v16 = vmul.f32 0.03125, %v510_v31  ;;  %v605_v39 = vmul.f32 %v6204_v22, %v6204_v22 }
 0x589   :  { %v4108_v41 = vadd.f32 %v4107_v35, %v4106_v47 }
 0x58a   :  { %v6210_v6 = vsub.f32 %v7262_v21, %v543_v16  ;;  %v4109_v56 = vpop.f32.mrf.mxu1  ;;  %v695_v23 = vsel %vm414_vm2, %v605_v39, 0.0 }
 0x58b   :  { %v2386_v37 = vpack.c.bf16 %v4108_v41, %v4105_v63  ;;  %696 = vadd.xlane.f32.xlu0 %v695_v23 }
 0x58c   :  { %v4110_v52 = vpop.f32.mrf.mxu1  ;;  %v607_v2 = vmul.f32 %v6210_v6, %v6210_v6 }
 0x58d   :  { %4347 = vmatprep.mubr.msk.bf16.mxu0 %vm414_vm2, %v2386_v37  ;;  %v4111_v58 = vadd.f32 %v4110_v52, %v4109_v56 }
 0x58e   :  { %v4112_v14 = vpop.f32.mrf.mxu1  ;;  %v701_v3 = vsel %vm414_vm2, %v607_v2, 0.0 }
 0x58f   :  { %702 = vadd.xlane.f32.xlu0 %v701_v3 }
 0x590   :  { %v4113_v45 = vpop.f32.mrf.mxu1 }
 0x591   :  { %v4114_v19 = vadd.f32 %v4113_v45, %v4112_v14 }
 0x592   :  { %v4115_v61 = vpop.f32.mrf.mxu1 }
 0x593   :  { %v2387_v60 = vpack.c.bf16 %v4114_v19, %v4111_v58 }
 0x594   :  { %v4116_v25 = vpop.f32.mrf.mxu1 }
 0x595   :  { %4348 = vmatmul.mubr.msk.bf16.gmra.mxu0 %vm414_vm2, %v2387_v60  ;;  %v4117_v12 = vadd.f32 %v4116_v25, %v4115_v61 }
 0x596   :  { %v4118_v46 = vpop.f32.mrf.mxu1 }
 0x598   :  { %v4119_v57 = vpop.f32.mrf.mxu1 }
 0x599   :  { %v4120_v26 = vadd.f32 %v4119_v57, %v4118_v46 }
 0x59b   :  { %v2388_v13 = vpack.c.bf16 %v4120_v26, %v4117_v12 }
 0x59d   :  { %4351 = vmatprep.mubr.msk.bf16.mxu0 %vm414_vm2, %v2388_v13 }
 0x5c5   :  { %v4121_v53 = vpop.f32.mrf.mxu1 }
 0x5c7   :  { %v4122_v18 = vpop.f32.mrf.mxu1 }
 0x5c8   :  { %v4123_v47 = vadd.f32 %v4122_v18, %v4121_v53 }
 0x5c9   :  { %v4124_v44 = vpop.f32.mrf.mxu1 }
 0x5cb   :  { %v4125_v32 = vpop.f32.mrf.mxu1 }
 0x5cc   :  { %v4126_v10 = vadd.f32 %v4125_v32, %v4124_v44 }
 0x5cd   :  { %v4127_v31 = vpop.f32.mrf.mxu1 }
 0x5ce   :  { %v2389_v35 = vpack.c.bf16 %v4126_v10, %v4123_v47 }
 0x5cf   :  { %v4128_v16 = vpop.f32.mrf.mxu1 }
 0x5d0   :  { %4352 = vmatmul.mubr.msk.bf16.gmra.mxu0 %vm414_vm2, %v2389_v35  ;;  %v4129_v41 = vadd.f32 %v4128_v16, %v4127_v31 }
 0x5d1   :  { %v4130_v39 = vpop.f32.mrf.mxu1 }
 0x5d3   :  { %v4131_v63 = vpop.f32.mrf.mxu1 }
 0x5d4   :  { %v4132_v21 = vadd.f32 %v4131_v63, %v4130_v39 }
 0x5d5   :  { %v4133_v56 = vpop.f32.mrf.mxu1 }
 0x5d6   :  { %v2390_v23 = vpack.c.bf16 %v4132_v21, %v4129_v41 }
 0x5d7   :  { %v4134_v37 = vpop.f32.mrf.mxu1 }
 0x5d8   :  { %4355 = vmatprep.mubr.msk.bf16.mxu0 %vm414_vm2, %v2390_v23  ;;  %v4135_v14 = vadd.f32 %v4134_v37, %v4133_v56 }
 0x5d9   :  { %v4136_v52 = vpop.f32.mrf.mxu1 }
 0x5db   :  { %v4137_v2 = vpop.f32.mrf.mxu1 }
 0x5dc   :  { %v4138_v3 = vadd.f32 %v4137_v2, %v4136_v52 }
 0x5dd   :  { %v4139_v45 = vpop.f32.mrf.mxu1 }
 0x5de   :  { %v2391_v58 = vpack.c.bf16 %v4138_v3, %v4135_v14  ;;  %v4499_v3 = vld [vmem:[%s7011_s9] sm:$0xff]   ;;  %s3829_s9 = sshll.u32 %s4881_s22, 4  ;;  %s3830_s9 = int_to_ptr.vmem [resolvable:$true] %s3829_s9 }
 0x5df   :  { %v4140_v19 = vpop.f32.mrf.mxu1  ;;  %s4852_s23 = scalar_lea.vmem %s3830_s9, 512  ;;  %p4857_p6 = scmp.lt.s32.totalorder %s3830_s9, %s3830_s9 }
 0x5e0   :  { %4356 = vmatmul.mubr.msk.bf16.gmra.mxu0 %vm414_vm2, %v2391_v58  ;;  %v4141_v25 = vadd.f32 %v4140_v19, %v4139_v45  ;;  %p4853_p5 = scmp.ne.s32.totalorder %s3830_s9, %s4852_s23  ;;  %p4858_p7 = scmp.lt.s32.totalorder %s4852_s23, %s4852_s23 }
 0x5e1   :  { %v4142_v61 = vpop.f32.mrf.mxu1 }
 0x5e2   :  { %p4859_p8 = por %p4858_p7, %p4857_p6 }
 0x5e3   :  { %v4143_v60 = vpop.f32.mrf.mxu1 }
 0x5e4   :  { %v4144_v46 = vadd.f32 %v4143_v60, %v4142_v61  ;;  %p4860_p9 = pnand %p4859_p8, %p4853_p5 }
 0x5e5   :  { %v4145_v57 = vpop.f32.mrf.mxu1 }
 0x5e6   :  { %v2392_v12 = vpack.c.bf16 %v4144_v46, %v4141_v25  ;;  %v613_v46 = vpop.xlane.xlu0 %612 }
 0x5e7   :  { %v4146_v26 = vpop.f32.mrf.mxu1 }
 0x5e8   :  { %4359 = vmatprep.mubr.msk.bf16.mxu0 %vm414_vm2, %v2392_v12  ;;  %v4147_v18 = vadd.f32 %v4146_v26, %v4145_v57  ;;  %v610_v57 = vpop.xlane.xlu1 %609 }
 0x5e9   :  { %v4148_v13 = vpop.f32.mrf.mxu1 }
 0x5eb   :  { %v4149_v53 = vpop.f32.mrf.mxu1 }
 0x5ec   :  { %v4150_v44 = vadd.f32 %v4149_v53, %v4148_v13  ;;  %v619_v13 = vpop.xlane.xlu0 %618 }
 0x5ed   :  { %v4151_v32 = vpop.f32.mrf.mxu1 }
 0x5ee   :  { %v2393_v47 = vpack.c.bf16 %v4150_v44, %v4147_v18  ;;  %v704_v18 = vmul.f32 0.03125, %v610_v57  ;;  %v616_v44 = vpop.xlane.xlu1 %615 }
 0x5ef   :  { %v4152_v10 = vpop.f32.mrf.mxu1 }
 0x5f0   :  { %4360 = vmatmul.mubr.msk.bf16.gmra.mxu0 %vm414_vm2, %v2393_v47  ;;  %v4153_v16 = vadd.f32 %v4152_v10, %v4151_v32  ;;  %v707_v32 = vmul.f32 0.03125, %v619_v13  ;;  %v705_v10 = vmul.f32 0.03125, %v613_v46 }
 0x5f1   :  { %v4154_v31 = vpop.f32.mrf.mxu1 }
 0x5f3   :  { %v4155_v35 = vpop.f32.mrf.mxu1 }
 0x5f4   :  { %v4156_v39 = vadd.f32 %v4155_v35, %v4154_v31  ;;  %v706_v35 = vmul.f32 0.03125, %v616_v44 }
 0x5f5   :  { %v4157_v63 = vpop.f32.mrf.mxu1 }
 0x5f6   :  { %v2394_v41 = vpack.c.bf16 %v4156_v39, %v4153_v16  ;;  %v736_v16 = vadd.f32 1e-05, %v704_v18 }
 0x5f7   :  { %v4158_v21 = vpop.f32.mrf.mxu1 }
 0x5f8   :  { %4363 = vmatprep.mubr.msk.bf16.mxu1 %vm414_vm2, %v2394_v41  ;;  %v4159_v37 = vadd.f32 %v4158_v21, %v4157_v63  ;;  %v739_v63 = vadd.f32 1e-05, %v707_v32  ;;  %v737_v41 = vadd.f32 1e-05, %v705_v10  ;;  %v738_v21 = vadd.f32 1e-05, %v706_v35 }
 0x5f9   :  { %v4160_v56 = vpop.f32.mrf.mxu1  ;;  %4704 = vrsqrt.f32 %v736_v16 }
 0x5fa   :  { %4706 = vrsqrt.f32 %v739_v63 }
 0x5fb   :  { %v4161_v23 = vpop.f32.mrf.mxu1  ;;  %4708 = vrsqrt.f32 %v737_v41 }
 0x5fc   :  { %v4162_v52 = vadd.f32 %v4161_v23, %v4160_v56  ;;  %v622_v56 = vpop.xlane.xlu1 %621  ;;  %v625_v23 = vpop.xlane.xlu0 %624  ;;  %4710 = vrsqrt.f32 %v738_v21 }
 0x5fd   :  { %v4163_v2 = vpop.f32.mrf.mxu1 }
 0x5fe   :  { %v2395_v14 = vpack.c.bf16 %v4162_v52, %v4159_v37 }
 0x5ff   :  { %v4164_v45 = vpop.f32.mrf.mxu1 }
 0x600   :  { %4364 = vmatmul.mubr.msk.bf16.vlgmr.msra.gmra.mxu1 %vm414_vm2, %v2395_v14  ;;  %v4165_v61 = vadd.f32 %v4164_v45, %v4163_v2  ;;  %v628_v37 = vpop.xlane.xlu1 %627  ;;  %v631_v52 = vpop.xlane.xlu0 %630  ;;  %v708_v2 = vmul.f32 0.03125, %v622_v56 }
 0x601   :  { %v4166_v58 = vpop.f32.mrf.mxu1  ;;  %4372 = vmatpush3.bf16.msra.mxu1 %v4498_v62  ;;  %v711_v14 = vmul.f32 0.03125, %v631_v52 }
 0x602   :  { %4373 = vmatprep.subr.bf16.mxu1 %v4499_v3 }
 0x603   :  { %v4167_v19 = vpop.f32.mrf.mxu1  ;;  %v743_v57 = vadd.f32 1e-05, %v711_v14 }
 0x604   :  { %v4168_v60 = vadd.f32 %v4167_v19, %v4166_v58  ;;  %v710_v58 = vmul.f32 0.03125, %v628_v37  ;;  %v637_v10 = vpop.xlane.xlu0 %636 }
 0x605   :  { %4374 = vmatpush3.bf16.msra.mxu1 %v4499_v3  ;;  %v709_v3 = vmul.f32 0.03125, %v625_v23 }
 0x606   :  { %v2396_v25 = vpack.c.bf16 %v4168_v60, %v4165_v61  ;;  %v4705_v19 = vpop.eup %4704  ;;  %v740_v61 = vadd.f32 1e-05, %v708_v2  ;;  %v634_v60 = vpop.xlane.xlu1 %633  ;;  %v742_v44 = vadd.f32 1e-05, %v710_v58  ;;  %v713_v58 = vmul.f32 0.03125, %v637_v10 }
 0x607   :  { %v4707_v46 = vpop.eup %4706  ;;  %v741_v13 = vadd.f32 1e-05, %v709_v3  ;;  %v800_v16 = vmul.f32 %v4705_v19, %v6017_v11  ;;  %v712_v14 = vmul.f32 0.03125, %v634_v60 }
 0x608   :  { %4367 = vmatprep.mubr.msk.bf16.mxu1 %vm414_vm2, %v2396_v25  ;;  %4712 = vrsqrt.f32 %v740_v61 }
 0x609   :  { %4714 = vrsqrt.f32 %v743_v57 }
 0x60a   :  { %4716 = vrsqrt.f32 %v741_v13  ;;  %v640_v41 = vpop.xlane.xlu1 %639  ;;  %v745_v13 = vadd.f32 1e-05, %v713_v58 }
 0x60b   :  { %4718 = vrsqrt.f32 %v742_v44  ;;  %v714_v52 = vmul.f32 0.03125, %v640_v41 }
 0x61b   :  { %v4169_v12 = vpop.f32.mrf.mxu1 }
 0x61d   :  { %v4170_v26 = vpop.f32.mrf.mxu1 }
 0x61e   :  { %v4171_v62 = vadd.f32 %v4170_v26, %v4169_v12  ;;  %v6237_v12 = vld [vmem:[%s7010_s8] ss:$0 sm:$0xff]  ;;  %v4709_v26 = vpop.eup %4708 }
 0x61f   :  { %v4172_v53 = vpop.f32.mrf.mxu1  ;;  %v4711_v18 = vpop.eup %4710 }
 0x620   :  { %v802_v21 = vmul.f32 %v4711_v18, %v6022_v55  ;;  %v746_v55 = vadd.f32 1e-05, %v714_v52  ;;  %v4713_v61 = vpop.eup %4712 }
 0x621   :  { %v4173_v47 = vpop.f32.mrf.mxu1  ;;  %v4715_v57 = vpop.eup %4714 }
 0x622   :  { %v4174_v31 = vadd.f32 %v4173_v47, %v4172_v53  ;;  %4720 = vrsqrt.f32 %v746_v55 }
 0x624   :  { %v2397_v39 = vpack.c.bf16 %v4174_v31, %v4171_v62  ;;  %v803_v31 = vmul.f32 %v4707_v46, %v6043_v34 }
 0x626   :  { %4368 = vmatmul.mubr.msk.bf16.gmra.mxu1 %vm414_vm2, %v2397_v39  ;;  %v801_v39 = vmul.f32 %v4709_v26, %v6032_v36  ;;  %v643_v36 = vpop.xlane.xlu0 %642  ;;  %v4717_v26 = vpop.eup %4716 }
 0x627   :  { %v715_v3 = vmul.f32 0.03125, %v643_v36  ;;  %v4719_v18 = vpop.eup %4718 }
 0x633   :  { %v4341_v45 = vpop.f32.mrf.mxu0 }
 0x634   :  { %v2508_v62 = vadd.f32 %v4341_v45, %v6237_v12  ;;  %v744_v45 = vadd.f32 1e-05, %v712_v14 }
 0x635   :  { %v2499_v25 = vpop.f32.mrf.mxu0 }
 0x636   :  { %v2500_v32 = vadd.f32 %v6237_v12, %v2499_v25  ;;  %v6253_v34 = vadd.f32 %v2508_v62, %v802_v21  ;;  %v747_v25 = vadd.f32 1e-05, %v715_v3  ;;  %4722 = vrsqrt.f32 %v744_v45 }
 0x637   :  { %v4342_v53 = vpop.f32.mrf.mxu0  ;;  %v804_v62 = vmul.f32 %v4713_v61, %v6028_v20 }
 0x638   :  { %v2511_v47 = vadd.f32 %v4342_v53, %v6237_v12  ;;  %v6249_v23 = vadd.f32 %v2500_v32, %v800_v16  ;;  %4724 = vrsqrt.f32 %v747_v25  ;;  %v806_v16 = vmul.f32 %v4719_v18, %v6039_v5 }
 0x639   :  { %v2502_v35 = vpop.f32.mrf.mxu0  ;;  %4726 = vrsqrt.f32 %v745_v13 }
 0x63a   :  { %v2503_v63 = vadd.f32 %v6237_v12, %v2502_v35  ;;  %v6247_v56 = vadd.f32 %v2511_v47, %v803_v31  ;;  %v807_v47 = vmul.f32 %v4715_v57, %v6071_v24  ;;  %v805_v31 = vmul.f32 %v4717_v26, %v6057_v8  ;;  %v4721_v8 = vpop.eup %4720 }
 0x63c   :  { %v6251_v37 = vadd.f32 %v2503_v63, %v801_v39  ;;  %v3079_v2 = vpack.c.bf16 %v6247_v56, %v6253_v34 }
 0x63e   :  { %v3078_v11 = vpack.c.bf16 %v6251_v37, %v6249_v23 }
 0x640   :  { %4375 = vmatprep.mubr.msk.bf16.mxu1 %vm414_vm2, %v3078_v11  ;;  %v810_v11 = vmul.f32 %v4721_v8, %v6067_v50 }
 0x641   :  { %4376 = vmatmul.mubr.msk.bf16.vlgmr.msra.gmra.mxu1 %vm414_vm2, %v3079_v2 }
 0x643   :  { %v4723_v5 = vpop.eup %4722 }
 0x644   :  { %v4345_v19 = vpop.f32.mrf.mxu0  ;;  %v808_v3 = vmul.f32 %v4723_v5, %v6051_v54 }
 0x645   :  { %v2524_v32 = vadd.f32 %v4345_v19, %v6237_v12  ;;  %v4725_v2 = vpop.eup %4724 }
 0x646   :  { %v2515_v46 = vpop.f32.mrf.mxu0  ;;  %v4727_v58 = vpop.eup %4726  ;;  %v811_v25 = vmul.f32 %v4725_v2, %v6095_v40  ;;  %v4501_v2 = vld [vmem:[%s7013_s11 + $0x10] sm:$0xff]  }
 0x647   :  { %v2516_v60 = vadd.f32 %v6237_v12, %v2515_v46  ;;  %v6275_v21 = vadd.f32 %v2524_v32, %v806_v16  ;;  %v809_v13 = vmul.f32 %v4727_v58, %v6083_v43  ;;  %v646_v32 = vpop.xlane.xlu1 %645 }
 0x648   :  { %v4346_v53 = vpop.f32.mrf.mxu0 }
 0x649   :  { %v2527_v44 = vadd.f32 %v4346_v53, %v6237_v12  ;;  %v6271_v63 = vadd.f32 %v2516_v60, %v804_v62 }
 0x64a   :  { %v2518_v10 = vpop.f32.mrf.mxu0 }
 0x64b   :  { %v2519_v35 = vadd.f32 %v6237_v12, %v2518_v10  ;;  %v6269_v39 = vadd.f32 %v2527_v44, %v807_v47  ;;  %v649_v47 = vpop.xlane.xlu0 %648  ;;  %v652_v10 = vpop.xlane.xlu1 %651 }
 0x64c   :  { %v718_v62 = vmul.f32 0.03125, %v652_v10  ;;  %v717_v5 = vmul.f32 0.03125, %v649_v47 }
 0x64d   :  { %v6273_v41 = vadd.f32 %v2519_v35, %v805_v31  ;;  %v3081_v20 = vpack.c.bf16 %v6269_v39, %v6275_v21  ;;  %v716_v35 = vmul.f32 0.03125, %v646_v32 }
 0x64e   :  { %v750_v16 = vadd.f32 1e-05, %v718_v62 }
 0x64f   :  { %v3080_v24 = vpack.c.bf16 %v6273_v41, %v6271_v63  ;;  %v655_v31 = vpop.xlane.xlu0 %654  ;;  %v748_v8 = vadd.f32 1e-05, %v716_v35 }
 0x650   :  { %4728 = vrsqrt.f32 %v750_v16 }
 0x651   :  { %4379 = vmatprep.mubr.msk.bf16.mxu1 %vm414_vm2, %v3080_v24  ;;  %v719_v24 = vmul.f32 0.03125, %v655_v31  ;;  %4730 = vrsqrt.f32 %v748_v8 }
 0x652   :  { %4380 = vmatmul.mubr.msk.bf16.gmra.mxu1 %vm414_vm2, %v3081_v20  ;;  %v4500_v20 = vld [vmem:[%s7013_s11 + $0x18] sm:$0xff]  }
 0x653   :  { %4407 = vmatprep.subr.bf16.mxu0 %v4500_v20 }
 0x654   :  { %4408 = vmatpush3.bf16.msra.mxu0 %v4500_v20 }
 0x655   :  { %v4349_v52 = vpop.f32.mrf.mxu0  ;;  %4409 = vmatprep.subr.bf16.mxu0 %v4501_v2 }
 0x656   :  { %v2540_v36 = vadd.f32 %v4349_v52, %v6237_v12  ;;  %v751_v52 = vadd.f32 1e-05, %v719_v24 }
 0x657   :  { %v2531_v14 = vpop.f32.mrf.mxu0 }
 0x658   :  { %v6285_v55 = vadd.f32 %v2540_v36, %v810_v11  ;;  %v2532_v45 = vadd.f32 %v6237_v12, %v2531_v14  ;;  %v749_v11 = vadd.f32 1e-05, %v717_v5  ;;  %v658_v36 = vpop.xlane.xlu1 %657  ;;  %4732 = vrsqrt.f32 %v751_v52  ;;  %v661_v14 = vpop.xlane.xlu0 %660  ;;  %4410 = vmatpush3.bf16.msra.mxu0 %v4501_v2 }
 0x659   :  { %v4350_v19 = vpop.f32.mrf.mxu0 }
 0x65a   :  { %v6289_v61 = vadd.f32 %v2532_v45, %v808_v3  ;;  %v2543_v46 = vadd.f32 %v4350_v19, %v6237_v12  ;;  %v2688_v50 = vsel %vm414_vm2, %v6285_v55, 0.0  ;;  %4734 = vrsqrt.f32 %v749_v11  ;;  %v4502_v3 = vld [vmem:[%s7013_s11 + $0x8] sm:$0xff]  }
 0x65b   :  { %v2534_v57 = vpop.f32.mrf.mxu0  ;;  %2689 = vadd.xlane.f32.xlu1 %v2688_v50  ;;  %4411 = vmatprep.subr.bf16.mxu0 %v4502_v3  ;;  %v720_v19 = vmul.f32 0.03125, %v658_v36 }
 0x65c   :  { %v6295_v26 = vadd.f32 %v2543_v46, %v811_v25  ;;  %v2535_v54 = vadd.f32 %v6237_v12, %v2534_v57  ;;  %v2682_v40 = vsel %vm414_vm2, %v6289_v61, 0.0  ;;  %v664_v45 = vpop.xlane.xlu1 %663  ;;  %v667_v58 = vpop.xlane.xlu0 %666  ;;  %4412 = vmatpush3.bf16.msra.mxu0 %v4502_v3  ;;  %v4503_v25 = vld [vmem:[%s7013_s11] sm:$0xff]   ;;  %v721_v57 = vmul.f32 0.03125, %v661_v14 }
 0x65d   :  { %v4729_v46 = vpop.eup %4728  ;;  %v723_v50 = vmul.f32 0.03125, %v667_v58  ;;  %4413 = vmatprep.subr.bf16.mxu0 %v4503_v25 }
 0x65e   :  { %v6299_v53 = vadd.f32 %v2535_v54, %v809_v13  ;;  %v2691_v18 = vsel %vm414_vm2, %v6295_v26, 0.0  ;;  %v3083_v44 = vpack.c.bf16 %v6295_v26, %v6285_v55  ;;  %v4731_v13 = vpop.eup %4730  ;;  %v752_v54 = vadd.f32 1e-05, %v720_v19 }
 0x65f   :  { %2692 = vadd.xlane.f32.xlu0 %v2691_v18  ;;  %2683 = vadd.xlane.f32.xlu1 %v2682_v40  ;;  %v722_v18 = vmul.f32 0.03125, %v664_v45  ;;  %v755_v47 = vadd.f32 1e-05, %v723_v50  ;;  %v753_v62 = vadd.f32 1e-05, %v721_v57  ;;  %v812_v35 = vmul.f32 %v4731_v13, %v6079_v1 }
 0x660   :  { %v3082_v60 = vpack.c.bf16 %v6299_v53, %v6289_v61  ;;  %v2685_v43 = vsel %vm414_vm2, %v6299_v53, 0.0  ;;  %4414 = vmatpush3.bf16.msra.mxu0 %v4503_v25  ;;  %v670_v40 = vpop.xlane.xlu1 %669  ;;  %4736 = vrsqrt.f32 %v752_v54  ;;  %v673_v8 = vpop.xlane.xlu0 %672 }
 0x661   :  { %v754_v20 = vadd.f32 1e-05, %v722_v18  ;;  %4738 = vrsqrt.f32 %v755_v47  ;;  %v724_v18 = vmul.f32 0.03125, %v670_v40 }
 0x662   :  { %4383 = vmatprep.mubr.msk.bf16.mxu1 %vm414_vm2, %v3082_v60  ;;  %4740 = vrsqrt.f32 %v753_v62 }
 0x663   :  { %2686 = vadd.xlane.f32.xlu0 %v2685_v43  ;;  %4384 = vmatmul.mubr.msk.bf16.gmra.mxu1 %vm414_vm2, %v3083_v44  ;;  %v814_v44 = vmul.f32 %v4729_v46, %v6091_v4  ;;  %4742 = vrsqrt.f32 %v754_v20 }
 0x664   :  { %v676_v2 = vpop.xlane.xlu1 %675  ;;  %v679_v46 = vpop.xlane.xlu0 %678 }
 0x665   :  { %v4733_v32 = vpop.eup %4732  ;;  %v726_v58 = vmul.f32 0.03125, %v676_v2  ;;  %v727_v13 = vmul.f32 0.03125, %v679_v46 }
 0x666   :  { %v815_v4 = vmul.f32 %v4733_v32, %v6119_v15 }
 0x667   :  { %v4735_v24 = vpop.eup %4734  ;;  %v758_v57 = vadd.f32 1e-05, %v726_v58  ;;  %v759_v47 = vadd.f32 1e-05, %v727_v13 }
 0x668   :  { %v813_v3 = vmul.f32 %v4735_v24, %v6107_v27  ;;  %v685_v24 = vpop.xlane.xlu0 %684 }
 0x669   :  { %4744 = vrsqrt.f32 %v758_v57 }
 0x66a   :  { %4746 = vrsqrt.f32 %v759_v47 }
 0x66d   :  { %v4737_v32 = vpop.eup %4736 }
 0x690   :  { %v4353_v60 = vpop.f32.mrf.mxu0 }
 0x691   :  { %v2556_v43 = vadd.f32 %v4353_v60, %v6237_v12  ;;  %v725_v60 = vmul.f32 0.03125, %v673_v8 }
 0x692   :  { %v2547_v10 = vpop.f32.mrf.mxu0 }
 0x693   :  { %v6327_v31 = vadd.f32 %v2556_v43, %v814_v44  ;;  %v2548_v16 = vadd.f32 %v6237_v12, %v2547_v10  ;;  %v682_v44 = vpop.xlane.xlu1 %681  ;;  %v756_v10 = vadd.f32 1e-05, %v724_v18 }
 0x694   :  { %v4354_v5 = vpop.f32.mrf.mxu0 }
 0x695   :  { %v6331_v52 = vadd.f32 %v2548_v16, %v812_v35  ;;  %v2559_v11 = vadd.f32 %v4354_v5, %v6237_v12  ;;  %v2700_v36 = vsel %vm414_vm2, %v6327_v31, 0.0  ;;  %v4739_v35 = vpop.eup %4738  ;;  %v757_v16 = vadd.f32 1e-05, %v725_v60 }
 0x696   :  { %v2550_v14 = vpop.f32.mrf.mxu0  ;;  %2701 = vadd.xlane.f32.xlu1 %v2700_v36  ;;  %v4741_v20 = vpop.eup %4740  ;;  %4748 = vrsqrt.f32 %v756_v10  ;;  %v819_v2 = vmul.f32 %v4739_v35, %v6144_v48  ;;  %v728_v48 = vmul.f32 0.03125, %v682_v44 }
 0x697   :  { %v6337_v1 = vadd.f32 %v2559_v11, %v815_v4  ;;  %v2551_v45 = vadd.f32 %v6237_v12, %v2550_v14  ;;  %v2694_v25 = vsel %vm414_vm2, %v6331_v52, 0.0  ;;  %v4743_v4 = vpop.eup %4742  ;;  %v688_v8 = vpop.xlane.xlu1 %687  ;;  %4750 = vrsqrt.f32 %v757_v16 }
 0x698   :  { %v730_v46 = vmul.f32 0.03125, %v688_v8  ;;  %v760_v60 = vadd.f32 1e-05, %v728_v48 }
 0x699   :  { %v6341_v19 = vadd.f32 %v2551_v45, %v813_v3  ;;  %v2703_v15 = vsel %vm414_vm2, %v6337_v1, 0.0  ;;  %v3085_v27 = vpack.c.bf16 %v6337_v1, %v6327_v31  ;;  %v816_v3 = vmul.f32 %v4737_v32, %v6103_v28 }
 0x69a   :  { %2704 = vadd.xlane.f32.xlu0 %v2703_v15  ;;  %2695 = vadd.xlane.f32.xlu1 %v2694_v25  ;;  %v817_v45 = vmul.f32 %v4741_v20, %v6132_v30  ;;  %v818_v15 = vmul.f32 %v4743_v4, %v6115_v9  ;;  %v762_v18 = vadd.f32 1e-05, %v730_v46  ;;  %v4745_v9 = vpop.eup %4744 }
 0x69b   :  { %v3084_v50 = vpack.c.bf16 %v6341_v19, %v6331_v52  ;;  %v2697_v54 = vsel %vm414_vm2, %v6341_v19, 0.0  ;;  %v822_v44 = vmul.f32 %v4745_v9, %v6140_v33 }
 0x69c   :  { %4752 = vrsqrt.f32 %v762_v18 }
 0x69d   :  { %4387 = vmatprep.mubr.msk.bf16.mxu1 %vm414_vm2, %v3084_v50  ;;  %v691_v50 = vpop.xlane.xlu0 %690  ;;  %4754 = vrsqrt.f32 %v760_v60 }
 0x69e   :  { %2698 = vadd.xlane.f32.xlu0 %v2697_v54  ;;  %4388 = vmatmul.mubr.msk.bf16.gmra.mxu1 %vm414_vm2, %v3085_v27  ;;  %v731_v54 = vmul.f32 0.03125, %v691_v50 }
 0x6a0   :  { %v4357_v43 = vpop.f32.mrf.mxu0  ;;  %v763_v32 = vadd.f32 1e-05, %v731_v54 }
 0x6a1   :  { %v2572_v36 = vadd.f32 %v4357_v43, %v6237_v12  ;;  %v729_v43 = vmul.f32 0.03125, %v685_v24 }
 0x6a2   :  { %v2563_v62 = vpop.f32.mrf.mxu0  ;;  %4756 = vrsqrt.f32 %v763_v32 }
 0x6a3   :  { %v2564_v40 = vadd.f32 %v6237_v12, %v2563_v62  ;;  %v6369_v13 = vadd.f32 %v2572_v36, %v818_v15  ;;  %v4747_v62 = vpop.eup %4746  ;;  %v761_v20 = vadd.f32 1e-05, %v729_v43 }
 0x6a4   :  { %v4358_v5 = vpop.f32.mrf.mxu0  ;;  %v4749_v16 = vpop.eup %4748  ;;  %v823_v24 = vmul.f32 %v4747_v62, %v6169_v42 }
 0x6a5   :  { %v2575_v11 = vadd.f32 %v4358_v5, %v6237_v12  ;;  %v6365_v27 = vadd.f32 %v2564_v40, %v816_v3  ;;  %v4751_v4 = vpop.eup %4750  ;;  %v820_v36 = vmul.f32 %v4749_v16, %v6128_v59  ;;  %4758 = vrsqrt.f32 %v761_v20 }
 0x6a6   :  { %v2566_v14 = vpop.f32.mrf.mxu0  ;;  %v821_v3 = vmul.f32 %v4751_v4, %v6157_v0 }
 0x6a7   :  { %v2567_v58 = vadd.f32 %v6237_v12, %v2566_v14  ;;  %v6363_v25 = vadd.f32 %v2575_v11, %v819_v2 }
 0x6a9   :  { %v6367_v57 = vadd.f32 %v2567_v58, %v817_v45  ;;  %v3087_v30 = vpack.c.bf16 %v6363_v25, %v6369_v13  ;;  %v4753_v50 = vpop.eup %4752 }
 0x6aa   :  { %v4755_v0 = vpop.eup %4754  ;;  %v826_v54 = vmul.f32 %v4753_v50, %v6165_v29 }
 0x6ab   :  { %v3086_v28 = vpack.c.bf16 %v6367_v57, %v6365_v27  ;;  %v824_v60 = vmul.f32 %v4755_v0, %v6153_v49 }
 0x6ad   :  { %4391 = vmatprep.mubr.msk.bf16.mxu1 %vm414_vm2, %v3086_v28 }
 0x6ae   :  { %4392 = vmatmul.mubr.msk.bf16.gmra.mxu1 %vm414_vm2, %v3087_v30 }
 0x6af   :  { %v4757_v28 = vpop.eup %4756 }
 0x6b0   :  { %v4361_v47 = vpop.f32.mrf.mxu0 }
 0x6b1   :  { %v2588_v10 = vadd.f32 %v4361_v47, %v6237_v12 }
 0x6b2   :  { %v2579_v35 = vpop.f32.mrf.mxu0  ;;  %v4759_v32 = vpop.eup %4758 }
 0x6b3   :  { %v6379_v5 = vadd.f32 %v2588_v10, %v822_v44  ;;  %v2580_v11 = vadd.f32 %v6237_v12, %v2579_v35  ;;  %v827_v10 = vmul.f32 %v4757_v28, %v6194_v51  ;;  %v694_v35 = vpop.xlane.xlu1 %693  ;;  %v825_v49 = vmul.f32 %v4759_v32, %v6182_v7 }
 0x6b4   :  { %v4362_v40 = vpop.f32.mrf.mxu0 }
 0x6b5   :  { %v2591_v8 = vadd.f32 %v4362_v40, %v6237_v12  ;;  %v2724_v33 = vsel %vm414_vm2, %v6379_v5, 0.0  ;;  %v6391_v58 = vadd.f32 %v2580_v11, %v820_v36 }
 0x6b6   :  { %v2582_v2 = vpop.f32.mrf.mxu0  ;;  %2725 = vadd.xlane.f32.xlu1 %v2724_v33 }
 0x6b7   :  { %v6387_v14 = vadd.f32 %v2591_v8, %v823_v24  ;;  %v2583_v45 = vadd.f32 %v6237_v12, %v2582_v2  ;;  %v697_v24 = vpop.xlane.xlu0 %696  ;;  %v700_v33 = vpop.xlane.xlu1 %699 }
 0x6b8   :  { %v734_v2 = vmul.f32 0.03125, %v700_v33  ;;  %v733_v50 = vmul.f32 0.03125, %v697_v24 }
 0x6b9   :  { %v6393_v15 = vadd.f32 %v2583_v45, %v821_v3  ;;  %v2727_v42 = vsel %vm414_vm2, %v6387_v14, 0.0  ;;  %v3089_v46 = vpack.c.bf16 %v6387_v14, %v6379_v5  ;;  %v732_v45 = vmul.f32 0.03125, %v694_v35 }
 0x6ba   :  { %2728 = vadd.xlane.f32.xlu0 %v2727_v42  ;;  %v766_v42 = vadd.f32 1e-05, %v734_v2  ;;  %v2718_v2 = vsel %vm414_vm2, %v6391_v58, 0.0 }
 0x6bb   :  { %v3088_v59 = vpack.c.bf16 %v6393_v15, %v6391_v58  ;;  %v703_v3 = vpop.xlane.xlu0 %702 }
 0x6bc   :  { %4760 = vrsqrt.f32 %v766_v42  ;;  %v2721_v42 = vsel %vm414_vm2, %v6393_v15, 0.0 }
 0x6bd   :  { %4395 = vmatprep.mubr.msk.bf16.mxu1 %vm414_vm2, %v3088_v59  ;;  %v735_v59 = vmul.f32 0.03125, %v703_v3  ;;  %v2679_v3 = vsel %vm414_vm2, %v6269_v39, 0.0 }
 0x6be   :  { %4396 = vmatmul.mubr.msk.bf16.gmra.mxu1 %vm414_vm2, %v3089_v46  ;;  %v764_v46 = vadd.f32 1e-05, %v732_v45  ;;  %v2670_v45 = vsel %vm414_vm2, %v6271_v63, 0.0 }
 0x6bf   :  { %v767_v0 = vadd.f32 1e-05, %v735_v59 }
 0x6c0   :  { %v4365_v48 = vpop.f32.mrf.mxu1  ;;  %4762 = vrsqrt.f32 %v764_v46  ;;  %v2712_v46 = vsel %vm414_vm2, %v6369_v13, 0.0 }
 0x6c1   :  { %v2604_v30 = vadd.f32 %v4365_v48, %v6237_v12  ;;  %v765_v48 = vadd.f32 1e-05, %v733_v50  ;;  %4764 = vrsqrt.f32 %v767_v0  ;;  %v2673_v50 = vsel %vm414_vm2, %v6273_v41, 0.0 }
 0x6c2   :  { %v2595_v18 = vpop.f32.mrf.mxu1 }
 0x6c3   :  { %v6405_v9 = vadd.f32 %v2604_v30, %v826_v54  ;;  %v2596_v43 = vadd.f32 %v6237_v12, %v2595_v18  ;;  %4766 = vrsqrt.f32 %v765_v48 }
 0x6c4   :  { %v4366_v47 = vpop.f32.mrf.mxu1 }
 0x6c5   :  { %v6409_v44 = vadd.f32 %v2596_v43, %v824_v60  ;;  %v2607_v62 = vadd.f32 %v4366_v47, %v6237_v12  ;;  %v2736_v29 = vsel %vm414_vm2, %v6405_v9, 0.0 }
 0x6c6   :  { %v2598_v16 = vpop.f32.mrf.mxu1  ;;  %2737 = vadd.xlane.f32.xlu1 %v2736_v29 }
 0x6c7   :  { %v6415_v20 = vadd.f32 %v2607_v62, %v827_v10  ;;  %v2599_v4 = vadd.f32 %v6237_v12, %v2598_v16  ;;  %v2730_v51 = vsel %vm414_vm2, %v6409_v44, 0.0 }
 0x6c9   :  { %v6419_v40 = vadd.f32 %v2599_v4, %v825_v49  ;;  %v2739_v11 = vsel %vm414_vm2, %v6415_v20, 0.0  ;;  %v3091_v7 = vpack.c.bf16 %v6415_v20, %v6405_v9  ;;  %v4761_v28 = vpop.eup %4760 }
 0x6ca   :  { %2740 = vadd.xlane.f32.xlu0 %v2739_v11  ;;  %2731 = vadd.xlane.f32.xlu1 %v2730_v51  ;;  %v830_v18 = vmul.f32 %v4761_v28, %v6190_v38 }
 0x6cb   :  { %v3090_v8 = vpack.c.bf16 %v6419_v40, %v6409_v44  ;;  %v2733_v36 = vsel %vm414_vm2, %v6419_v40, 0.0 }
 0x6cd   :  { %4399 = vmatprep.mubr.msk.bf16.mxu1 %vm414_vm2, %v3090_v8  ;;  %v4763_v30 = vpop.eup %4762 }
 0x6ce   :  { %2734 = vadd.xlane.f32.xlu0 %v2733_v36  ;;  %4400 = vmatmul.mubr.msk.bf16.gmra.mxu1 %vm414_vm2, %v3091_v7  ;;  %v4765_v43 = vpop.eup %4764  ;;  %v828_v10 = vmul.f32 %v4763_v30, %v6178_v17  ;;  %v2664_v30 = vsel %vm414_vm2, %v6253_v34, 0.0 }
 0x6cf   :  { %v831_v4 = vmul.f32 %v4765_v43, %v6210_v6  ;;  %v2715_v43 = vsel %vm414_vm2, %v6363_v25, 0.0 }
 0x6d0   :  { %v4767_v29 = vpop.eup %4766 }
 0x6d1   :  { %v829_v24 = vmul.f32 %v4767_v29, %v6204_v22  ;;  %v2676_v22 = vsel %vm414_vm2, %v6275_v21, 0.0 }
 0x6e4   :  { %v2690_v59 = vpop.xlane.xlu1 %2689 }
 0x6e5   :  { %v2764_v48 = vmul.f32 0.03125, %v2690_v59  ;;  %v2709_v59 = vsel %vm414_vm2, %v6367_v57, 0.0 }
 0x6e6   :  { %v4369_v54 = vpop.f32.mrf.mxu1 }
 0x6e7   :  { %v2620_v60 = vadd.f32 %v4369_v54, %v6237_v12  ;;  %v6489_v29 = vsub.f32 %v6285_v55, %v2764_v48 }
 0x6e8   :  { %v2611_v47 = vpop.f32.mrf.mxu1  ;;  %v2693_v28 = vpop.xlane.xlu0 %2692 }
 0x6e9   :  { %v6435_v32 = vadd.f32 %v2620_v60, %v830_v18  ;;  %v2612_v62 = vadd.f32 %v6237_v12, %v2611_v47  ;;  %v2684_v18 = vpop.xlane.xlu1 %2683  ;;  %v6482_v60 = vld [vmem:[%s7012_s10] ss:$0 sm:$0xff]  ;;  %7263 = vst [vmem:[#allocation51_spill] sm:$0xff] %v6489_v29 }
 0x6ea   :  { %v4370_v35 = vpop.f32.mrf.mxu1 }
 0x6eb   :  { %v2748_v16 = vsel %vm414_vm2, %v6435_v32, 0.0  ;;  %v6441_v49 = vadd.f32 %v2612_v62, %v828_v10  ;;  %v2623_v38 = vadd.f32 %v4370_v35, %v6237_v12  ;;  %v2762_v35 = vmul.f32 0.03125, %v2684_v18 }
 0x6ec   :  { %2749 = vadd.xlane.f32.xlu1 %v2748_v16  ;;  %v2614_v11 = vpop.f32.mrf.mxu1 }
 0x6ed   :  { %v6445_v51 = vadd.f32 %v2623_v38, %v831_v4  ;;  %v2615_v17 = vadd.f32 %v6237_v12, %v2614_v11  ;;  %v2742_v8 = vsel %vm414_vm2, %v6441_v49, 0.0  ;;  %v2706_v38 = vsel %vm414_vm2, %v6365_v27, 0.0 }
 0x6ee   :  { %v2765_v11 = vmul.f32 0.03125, %v2693_v28 }
 0x6ef   :  { %v6451_v33 = vadd.f32 %v2615_v17, %v829_v24  ;;  %v2751_v7 = vsel %vm414_vm2, %v6445_v51, 0.0  ;;  %v3093_v36 = vpack.c.bf16 %v6445_v51, %v6435_v32  ;;  %v2667_v24 = vsel %vm414_vm2, %v6247_v56, 0.0 }
 0x6f0   :  { %2743 = vadd.xlane.f32.xlu1 %v2742_v8  ;;  %2752 = vadd.xlane.f32.xlu0 %v2751_v7  ;;  %v2687_v8 = vpop.xlane.xlu0 %2686 }
 0x6f1   :  { %v3092_v6 = vpack.c.bf16 %v6451_v33, %v6441_v49  ;;  %v2745_v12 = vsel %vm414_vm2, %v6451_v33, 0.0 }
 0x6f3   :  { %4403 = vmatprep.mubr.msk.bf16.mxu1 %vm414_vm2, %v3092_v6 }
 0x6f4   :  { %2677 = vadd.xlane.f32.xlu1 %v2676_v22  ;;  %2746 = vadd.xlane.f32.xlu0 %v2745_v12  ;;  %v6500_v22 = vsub.f32 %v6289_v61, %v2762_v35 }
 0x6f5   :  { %4404 = vmatmul.mubr.msk.bf16.gmra.mxu1 %vm414_vm2, %v3093_v36  ;;  %v2658_v36 = vsel %vm414_vm2, %v6249_v23, 0.0 }
 0x6f6   :  { %7264 = vst [vmem:[#allocation40_spill] sm:$0xff] %v6500_v22 }
 0x6f8   :  { %2719 = vadd.xlane.f32.xlu1 %v2718_v2  ;;  %2680 = vadd.xlane.f32.xlu0 %v2679_v3  ;;  %v2828_v2 = vmul.f32 %v6489_v29, %v6489_v29  ;;  %v6505_v3 = vsub.f32 %v6295_v26, %v2765_v11 }
 0x6fa   :  { %7265 = vst [vmem:[#allocation9_spill] sm:$0xff] %v6505_v3  ;;  %v2880_v61 = vsel %vm414_vm2, %v2828_v2, 0.0  ;;  %v2829_v48 = vmul.f32 %v6505_v3, %v6505_v3 }
 0x6fc   :  { %2671 = vadd.xlane.f32.xlu1 %v2670_v45  ;;  %2722 = vadd.xlane.f32.xlu0 %v2721_v42  ;;  %v2763_v45 = vmul.f32 0.03125, %v2687_v8 }
 0x6fe   :  { %v6515_v26 = vsub.f32 %v6299_v53, %v2763_v45 }
 0x700   :  { %2713 = vadd.xlane.f32.xlu1 %v2712_v46  ;;  %2674 = vadd.xlane.f32.xlu0 %v2673_v50  ;;  %v2826_v50 = vmul.f32 %v6500_v22, %v6500_v22  ;;  %7266 = vst [vmem:[#allocation11_spill] sm:$0xff] %v6515_v26 }
 0x701   :  { %v4377_v0 = vpop.f32.mrf.mxu1 }
 0x702   :  { %v3204_v16 = vadd.f32 %v4377_v0, %v6482_v60  ;;  %v2661_v0 = vsel %vm414_vm2, %v6251_v37, 0.0 }
 0x703   :  { %v3195_v54 = vpop.f32.mrf.mxu1 }
 0x704   :  { %2665 = vadd.xlane.f32.xlu1 %v2664_v30  ;;  %2716 = vadd.xlane.f32.xlu0 %v2715_v43  ;;  %v3196_v10 = vadd.f32 %v6482_v60, %v3195_v54  ;;  %v3324_v12 = vmax.f32 %v3204_v16, 0.0  ;;  %v2874_v54 = vsel %vm414_vm2, %v2826_v50, 0.0  ;;  %v2883_v30 = vsel %vm414_vm2, %v2829_v48, 0.0 }
 0x705   :  { %v4378_v47 = vpop.f32.mrf.mxu1  ;;  %v2827_v43 = vmul.f32 %v6515_v26, %v6515_v26 }
 0x706   :  { %v3207_v62 = vadd.f32 %v4378_v47, %v6482_v60  ;;  %v3322_v6 = vmax.f32 %v3196_v10, 0.0 }
 0x707   :  { %v3198_v4 = vpop.f32.mrf.mxu1  ;;  %v2877_v35 = vsel %vm414_vm2, %v2827_v43, 0.0 }
 0x708   :  { %v3199_v17 = vadd.f32 %v6482_v60, %v3198_v4  ;;  %2707 = vadd.xlane.f32.xlu1 %v2706_v38  ;;  %v3325_v7 = vmax.f32 %v3207_v62, 0.0  ;;  %2668 = vadd.xlane.f32.xlu0 %v2667_v24 }
 0x70a   :  { %v3323_v55 = vmax.f32 %v3199_v17, 0.0  ;;  %v3363_v46 = vpack.c.bf16 %v3325_v7, %v3324_v12 }
 0x70c   :  { %v3362_v42 = vpack.c.bf16 %v3323_v55, %v3322_v6  ;;  %2659 = vadd.xlane.f32.xlu1 %v2658_v36  ;;  %2710 = vadd.xlane.f32.xlu0 %v2709_v59 }
 0x70e   :  { %4415 = vmatprep.mubr.msk.bf16.mxu0 %vm3409_vm3, %v3362_v42 }
 0x70f   :  { %4416 = vmatmul.mubr.msk.bf16.vlgmr.msra.gmra.mxu0 %vm3409_vm3, %v3363_v46 }
 0x710   :  { %2881 = vadd.xlane.f32.xlu1 %v2880_v61  ;;  %2662 = vadd.xlane.f32.xlu0 %v2661_v0 }
 0x712   :  { %v4381_v28 = vpop.f32.mrf.mxu1 }
 0x713   :  { %v3220_v62 = vadd.f32 %v4381_v28, %v6482_v60 }
 0x714   :  { %v3211_v18 = vpop.f32.mrf.mxu1  ;;  %2875 = vadd.xlane.f32.xlu1 %v2874_v54  ;;  %2884 = vadd.xlane.f32.xlu0 %v2883_v30 }
 0x715   :  { %v3212_v47 = vadd.f32 %v6482_v60, %v3211_v18  ;;  %v3328_v17 = vmax.f32 %v3220_v62, 0.0 }
 0x716   :  { %v4382_v53 = vpop.f32.mrf.mxu1 }
 0x717   :  { %v3223_v10 = vadd.f32 %v4382_v53, %v6482_v60  ;;  %v3326_v11 = vmax.f32 %v3212_v47, 0.0 }
 0x718   :  { %v3214_v16 = vpop.f32.mrf.mxu1  ;;  %2878 = vadd.xlane.f32.xlu0 %v2877_v35 }
 0x719   :  { %v3215_v4 = vadd.f32 %v6482_v60, %v3214_v16  ;;  %v3329_v38 = vmax.f32 %v3223_v10, 0.0 }
 0x71b   :  { %v3327_v24 = vmax.f32 %v3215_v4, 0.0  ;;  %v3365_v7 = vpack.c.bf16 %v3329_v38, %v3328_v17 }
 0x71d   :  { %v3364_v8 = vpack.c.bf16 %v3327_v24, %v3326_v11 }
 0x71f   :  { %4419 = vmatprep.mubr.msk.bf16.mxu0 %vm3409_vm3, %v3364_v8  ;;  %v2702_v6 = vpop.xlane.xlu1 %2701 }
 0x720   :  { %4420 = vmatmul.mubr.msk.bf16.gmra.mxu0 %vm3409_vm3, %v3365_v7  ;;  %v2768_v55 = vmul.f32 0.03125, %v2702_v6 }
 0x722   :  { %v6533_v36 = vsub.f32 %v6327_v31, %v2768_v55 }
 0x723   :  { %v4385_v12 = vpop.f32.mrf.mxu1  ;;  %v2705_v2 = vpop.xlane.xlu0 %2704 }
 0x724   :  { %v2769_v45 = vmul.f32 0.03125, %v2705_v2  ;;  %v2696_v42 = vpop.xlane.xlu1 %2695  ;;  %v2832_v59 = vmul.f32 %v6533_v36, %v6533_v36  ;;  %v3236_v53 = vadd.f32 %v4385_v12, %v6482_v60 }
 0x725   :  { %v3227_v46 = vpop.f32.mrf.mxu1  ;;  %v2766_v61 = vmul.f32 0.03125, %v2696_v42 }
 0x726   :  { %v6538_v50 = vsub.f32 %v6337_v1, %v2769_v45  ;;  %v2892_v0 = vsel %vm414_vm2, %v2832_v59, 0.0  ;;  %v3228_v54 = vadd.f32 %v6482_v60, %v3227_v46  ;;  %v3332_v24 = vmax.f32 %v3236_v53, 0.0 }
 0x727   :  { %v6542_v48 = vsub.f32 %v6331_v52, %v2766_v61  ;;  %v4386_v28 = vpop.f32.mrf.mxu1  ;;  %v2699_v31 = vpop.xlane.xlu0 %2698  ;;  %2893 = vadd.xlane.f32.xlu1 %v2892_v0 }
 0x728   :  { %v3239_v30 = vadd.f32 %v4386_v28, %v6482_v60  ;;  %v2767_v18 = vmul.f32 0.03125, %v2699_v31  ;;  %v2833_v43 = vmul.f32 %v6538_v50, %v6538_v50  ;;  %v3330_v4 = vmax.f32 %v3228_v54, 0.0 }
 0x729   :  { %v3230_v1 = vpop.f32.mrf.mxu1  ;;  %v2830_v47 = vmul.f32 %v6542_v48, %v6542_v48 }
 0x72a   :  { %v6552_v52 = vsub.f32 %v6341_v19, %v2767_v18  ;;  %v3231_v10 = vadd.f32 %v6482_v60, %v3230_v1  ;;  %v2895_v62 = vsel %vm414_vm2, %v2833_v43, 0.0  ;;  %v3333_v35 = vmax.f32 %v3239_v30, 0.0 }
 0x72b   :  { %2896 = vadd.xlane.f32.xlu0 %v2895_v62  ;;  %v2886_v16 = vsel %vm414_vm2, %v2830_v47, 0.0 }
 0x72c   :  { %v3331_v38 = vmax.f32 %v3231_v10, 0.0  ;;  %2887 = vadd.xlane.f32.xlu1 %v2886_v16  ;;  %v2831_v11 = vmul.f32 %v6552_v52, %v6552_v52  ;;  %v3367_v19 = vpack.c.bf16 %v3333_v35, %v3332_v24 }
 0x72e   :  { %v3366_v17 = vpack.c.bf16 %v3331_v38, %v3330_v4  ;;  %v2889_v8 = vsel %vm414_vm2, %v2831_v11, 0.0 }
 0x72f   :  { %2890 = vadd.xlane.f32.xlu0 %v2889_v8 }
 0x730   :  { %4423 = vmatprep.mubr.msk.bf16.mxu0 %vm3409_vm3, %v3366_v17 }
 0x731   :  { %4424 = vmatmul.mubr.msk.bf16.gmra.mxu0 %vm3409_vm3, %v3367_v19 }
 0x73f   :  { %v2726_v7 = vpop.xlane.xlu1 %2725 }
 0x740   :  { %v2776_v6 = vmul.f32 0.03125, %v2726_v7 }
 0x742   :  { %v6563_v55 = vsub.f32 %v6379_v5, %v2776_v6 }
 0x743   :  { %v2729_v12 = vpop.xlane.xlu0 %2728 }
 0x744   :  { %7267 = vst [vmem:[#allocation43_spill] sm:$0xff] %v6563_v55  ;;  %v2777_v2 = vmul.f32 0.03125, %v2729_v12  ;;  %v2840_v45 = vmul.f32 %v6563_v55, %v6563_v55 }
 0x746   :  { %v6568_v42 = vsub.f32 %v6387_v14, %v2777_v2  ;;  %v2916_v59 = vsel %vm414_vm2, %v2840_v45, 0.0 }
 0x747   :  { %2917 = vadd.xlane.f32.xlu1 %v2916_v59 }
 0x748   :  { %7268 = vst [vmem:[#allocation41_spill] sm:$0xff] %v6568_v42  ;;  %v2841_v46 = vmul.f32 %v6568_v42, %v6568_v42 }
 0x74a   :  { %v2919_v61 = vsel %vm414_vm2, %v2841_v46, 0.0 }
 0x74b   :  { %2920 = vadd.xlane.f32.xlu0 %v2919_v61 }
 0x74f   :  { %v2738_v0 = vpop.xlane.xlu1 %2737 }
 0x750   :  { %v2780_v5 = vmul.f32 0.03125, %v2738_v0 }
 0x752   :  { %v6575_v28 = vsub.f32 %v6405_v9, %v2780_v5 }
 0x753   :  { %v2741_v31 = vpop.xlane.xlu0 %2740  ;;  %v2732_v54 = vpop.xlane.xlu1 %2731 }
 0x754   :  { %v2781_v30 = vmul.f32 0.03125, %v2741_v31  ;;  %v2778_v18 = vmul.f32 0.03125, %v2732_v54  ;;  %v2844_v14 = vmul.f32 %v6575_v28, %v6575_v28 }
 0x756   :  { %v6580_v43 = vsub.f32 %v6415_v20, %v2781_v30  ;;  %v6583_v53 = vsub.f32 %v6409_v44, %v2778_v18  ;;  %v2928_v1 = vsel %vm414_vm2, %v2844_v14, 0.0 }
 0x757   :  { %v2735_v47 = vpop.xlane.xlu0 %2734  ;;  %2929 = vadd.xlane.f32.xlu1 %v2928_v1 }
 0x758   :  { %7269 = vst [vmem:[#allocation42_spill] sm:$0xff] %v6583_v53  ;;  %v2779_v10 = vmul.f32 0.03125, %v2735_v47  ;;  %v2845_v9 = vmul.f32 %v6580_v43, %v6580_v43  ;;  %v2842_v62 = vmul.f32 %v6583_v53, %v6583_v53 }
 0x75a   :  { %v6591_v35 = vsub.f32 %v6419_v40, %v2779_v10  ;;  %v2931_v20 = vsel %vm414_vm2, %v2845_v9, 0.0  ;;  %v2922_v16 = vsel %vm414_vm2, %v2842_v62, 0.0 }
 0x75b   :  { %2932 = vadd.xlane.f32.xlu0 %v2931_v20  ;;  %2923 = vadd.xlane.f32.xlu1 %v2922_v16 }
 0x75c   :  { %7270 = vst [vmem:[#allocation13_spill] sm:$0xff] %v6591_v35  ;;  %v2843_v44 = vmul.f32 %v6591_v35, %v6591_v35 }
 0x75e   :  { %v4389_v4 = vpop.f32.mrf.mxu1  ;;  %v2925_v38 = vsel %vm414_vm2, %v2843_v44, 0.0 }
 0x75f   :  { %2926 = vadd.xlane.f32.xlu0 %v2925_v38  ;;  %v3252_v8 = vadd.f32 %v4389_v4, %v6482_v60 }
 0x760   :  { %v3243_v11 = vpop.f32.mrf.mxu1 }
 0x761   :  { %v3244_v17 = vadd.f32 %v6482_v60, %v3243_v11  ;;  %v3336_v45 = vmax.f32 %v3252_v8, 0.0 }
 0x762   :  { %v4390_v24 = vpop.f32.mrf.mxu1 }
 0x763   :  { %v3255_v40 = vadd.f32 %v4390_v24, %v6482_v60  ;;  %v3334_v12 = vmax.f32 %v3244_v17, 0.0 }
 0x764   :  { %v3246_v19 = vpop.f32.mrf.mxu1 }
 0x765   :  { %v3247_v7 = vadd.f32 %v6482_v60, %v3246_v19  ;;  %v3337_v6 = vmax.f32 %v3255_v40, 0.0 }
 0x767   :  { %v3335_v2 = vmax.f32 %v3247_v7, 0.0  ;;  %v3369_v46 = vpack.c.bf16 %v3337_v6, %v3336_v45 }
 0x769   :  { %v3368_v59 = vpack.c.bf16 %v3335_v2, %v3334_v12 }
 0x76b   :  { %4427 = vmatprep.mubr.msk.bf16.mxu0 %vm3409_vm3, %v3368_v59 }
 0x76c   :  { %4428 = vmatmul.mubr.msk.bf16.gmra.mxu0 %vm3409_vm3, %v3369_v46 }
 0x76e   :  { %v4393_v61 = vpop.f32.mrf.mxu1 }
 0x76f   :  { %v3268_v30 = vadd.f32 %v4393_v61, %v6482_v60 }
 0x770   :  { %v3259_v0 = vpop.f32.mrf.mxu1 }
 0x771   :  { %v3260_v31 = vadd.f32 %v6482_v60, %v3259_v0  ;;  %v3340_v20 = vmax.f32 %v3268_v30, 0.0 }
 0x772   :  { %v4394_v5 = vpop.f32.mrf.mxu1 }
 0x773   :  { %v3271_v54 = vadd.f32 %v4394_v5, %v6482_v60  ;;  %v3338_v9 = vmax.f32 %v3260_v31, 0.0 }
 0x774   :  { %v3262_v18 = vpop.f32.mrf.mxu1 }
 0x775   :  { %v3263_v14 = vadd.f32 %v6482_v60, %v3262_v18  ;;  %v2750_v1 = vpop.xlane.xlu1 %2749  ;;  %v3341_v47 = vmax.f32 %v3271_v54, 0.0 }
 0x776   :  { %v2784_v10 = vmul.f32 0.03125, %v2750_v1 }
 0x777   :  { %v3339_v62 = vmax.f32 %v3263_v14, 0.0  ;;  %v3371_v38 = vpack.c.bf16 %v3341_v47, %v3340_v20 }
 0x778   :  { %v6609_v16 = vsub.f32 %v6435_v32, %v2784_v10 }
 0x779   :  { %v3370_v44 = vpack.c.bf16 %v3339_v62, %v3338_v9  ;;  %v2744_v4 = vpop.xlane.xlu1 %2743  ;;  %v2753_v11 = vpop.xlane.xlu0 %2752 }
 0x77a   :  { %v2782_v24 = vmul.f32 0.03125, %v2744_v4  ;;  %v2848_v17 = vmul.f32 %v6609_v16, %v6609_v16  ;;  %v2785_v40 = vmul.f32 0.03125, %v2753_v11 }
 0x77b   :  { %4431 = vmatprep.mubr.msk.bf16.mxu0 %vm3409_vm3, %v3370_v44 }
 0x77c   :  { %v6615_v8 = vsub.f32 %v6441_v49, %v2782_v24  ;;  %4432 = vmatmul.mubr.msk.bf16.gmra.mxu0 %vm3409_vm3, %v3371_v38  ;;  %v2940_v19 = vsel %vm414_vm2, %v2848_v17, 0.0  ;;  %v6620_v32 = vsub.f32 %v6445_v51, %v2785_v40 }
 0x77d   :  { %2941 = vadd.xlane.f32.xlu1 %v2940_v19  ;;  %v2678_v7 = vpop.xlane.xlu1 %2677  ;;  %v2747_v6 = vpop.xlane.xlu0 %2746 }
 0x77e   :  { %v2760_v12 = vmul.f32 0.03125, %v2678_v7  ;;  %v4397_v2 = vpop.f32.mrf.mxu1  ;;  %v2846_v45 = vmul.f32 %v6615_v8, %v6615_v8  ;;  %v2783_v59 = vmul.f32 0.03125, %v2747_v6  ;;  %v2849_v49 = vmul.f32 %v6620_v32, %v6620_v32 }
 0x77f   :  { %v3284_v10 = vadd.f32 %v4397_v2, %v6482_v60 }
 0x780   :  { %v6627_v46 = vsub.f32 %v6275_v21, %v2760_v12  ;;  %v3275_v61 = vpop.f32.mrf.mxu1  ;;  %v2934_v0 = vsel %vm414_vm2, %v2846_v45, 0.0  ;;  %v6631_v51 = vsub.f32 %v6451_v33, %v2783_v59  ;;  %v2943_v5 = vsel %vm414_vm2, %v2849_v49, 0.0 }
 0x781   :  { %2935 = vadd.xlane.f32.xlu1 %v2934_v0  ;;  %v2720_v31 = vpop.xlane.xlu1 %2719  ;;  %2944 = vadd.xlane.f32.xlu0 %v2943_v5  ;;  %v2681_v54 = vpop.xlane.xlu0 %2680  ;;  %v3276_v21 = vadd.f32 %v6482_v60, %v3275_v61  ;;  %v3344_v12 = vmax.f32 %v3284_v10, 0.0 }
 0x782   :  { %v2774_v30 = vmul.f32 0.03125, %v2720_v31  ;;  %v4398_v18 = vpop.f32.mrf.mxu1  ;;  %v2824_v14 = vmul.f32 %v6627_v46, %v6627_v46  ;;  %v2761_v1 = vmul.f32 0.03125, %v2681_v54  ;;  %v2847_v33 = vmul.f32 %v6631_v51, %v6631_v51 }
 0x783   :  { %v3287_v47 = vadd.f32 %v4398_v18, %v6482_v60  ;;  %v3342_v19 = vmax.f32 %v3276_v21, 0.0 }
 0x784   :  { %v6642_v9 = vsub.f32 %v6391_v58, %v2774_v30  ;;  %v3278_v62 = vpop.f32.mrf.mxu1  ;;  %v2868_v20 = vsel %vm414_vm2, %v2824_v14, 0.0  ;;  %v6646_v44 = vsub.f32 %v6269_v39, %v2761_v1  ;;  %v2937_v4 = vsel %vm414_vm2, %v2847_v33, 0.0 }
 0x785   :  { %v3279_v38 = vadd.f32 %v6482_v60, %v3278_v62  ;;  %2869 = vadd.xlane.f32.xlu1 %v2868_v20  ;;  %v2672_v11 = vpop.xlane.xlu1 %2671  ;;  %v3345_v24 = vmax.f32 %v3287_v47, 0.0  ;;  %2938 = vadd.xlane.f32.xlu0 %v2937_v4  ;;  %v2723_v17 = vpop.xlane.xlu0 %2722 }
 0x786   :  { %7271 = vst [vmem:[#allocation10_spill] sm:$0xff] %v6642_v9  ;;  %v2758_v40 = vmul.f32 0.03125, %v2672_v11  ;;  %v2838_v58 = vmul.f32 %v6642_v9, %v6642_v9  ;;  %v2775_v7 = vmul.f32 0.03125, %v2723_v17  ;;  %v2825_v39 = vmul.f32 %v6646_v44, %v6646_v44 }
 0x787   :  { %v3343_v6 = vmax.f32 %v3279_v38, 0.0  ;;  %v3373_v5 = vpack.c.bf16 %v3345_v24, %v3344_v12 }
 0x788   :  { %v6655_v2 = vsub.f32 %v6271_v63, %v2758_v40  ;;  %v2910_v45 = vsel %vm414_vm2, %v2838_v58, 0.0  ;;  %v6659_v59 = vsub.f32 %v6393_v15, %v2775_v7  ;;  %v2871_v61 = vsel %vm414_vm2, %v2825_v39, 0.0 }
 0x789   :  { %v3372_v49 = vpack.c.bf16 %v3343_v6, %v3342_v19  ;;  %2911 = vadd.xlane.f32.xlu1 %v2910_v45  ;;  %v2714_v0 = vpop.xlane.xlu1 %2713  ;;  %2872 = vadd.xlane.f32.xlu0 %v2871_v61  ;;  %v2675_v31 = vpop.xlane.xlu0 %2674 }
 0x78a   :  { %7272 = vst [vmem:[#allocation45_spill] sm:$0xff] %v6659_v59  ;;  %v2772_v54 = vmul.f32 0.03125, %v2714_v0  ;;  %v2822_v30 = vmul.f32 %v6655_v2, %v6655_v2  ;;  %v2759_v18 = vmul.f32 0.03125, %v2675_v31  ;;  %v2839_v63 = vmul.f32 %v6659_v59, %v6659_v59 }
 0x78b   :  { %4435 = vmatprep.mubr.msk.bf16.mxu0 %vm3409_vm3, %v3372_v49 }
 0x78c   :  { %v6668_v15 = vsub.f32 %v6369_v13, %v2772_v54  ;;  %4436 = vmatmul.mubr.msk.bf16.gmra.mxu0 %vm3409_vm3, %v3373_v5  ;;  %v2862_v14 = vsel %vm414_vm2, %v2822_v30, 0.0  ;;  %v6673_v1 = vsub.f32 %v6273_v41, %v2759_v18  ;;  %v2913_v21 = vsel %vm414_vm2, %v2839_v63, 0.0 }
 0x78d   :  { %2863 = vadd.xlane.f32.xlu1 %v2862_v14  ;;  %v2666_v47 = vpop.xlane.xlu1 %2665  ;;  %2914 = vadd.xlane.f32.xlu0 %v2913_v21  ;;  %v2717_v33 = vpop.xlane.xlu0 %2716 }
 0x78e   :  { %7273 = vst [vmem:[#allocation47_spill] sm:$0xff] %v6668_v15  ;;  %v2756_v10 = vmul.f32 0.03125, %v2666_v47  ;;  %v4401_v62 = vpop.f32.mrf.mxu1  ;;  %v2836_v20 = vmul.f32 %v6668_v15, %v6668_v15  ;;  %v2773_v13 = vmul.f32 0.03125, %v2717_v33  ;;  %v2823_v4 = vmul.f32 %v6673_v1, %v6673_v1 }
 0x78f   :  { %v3300_v45 = vadd.f32 %v4401_v62, %v6482_v60 }
 0x790   :  { %v6681_v38 = vsub.f32 %v6253_v34, %v2756_v10  ;;  %v3291_v41 = vpop.f32.mrf.mxu1  ;;  %v2904_v11 = vsel %vm414_vm2, %v2836_v20, 0.0  ;;  %v6685_v24 = vsub.f32 %v6363_v25, %v2773_v13  ;;  %v2865_v17 = vsel %vm414_vm2, %v2823_v4, 0.0 }
 0x791   :  { %2905 = vadd.xlane.f32.xlu1 %v2904_v11  ;;  %v2708_v40 = vpop.xlane.xlu1 %2707  ;;  %2866 = vadd.xlane.f32.xlu0 %v2865_v17  ;;  %v2669_v58 = vpop.xlane.xlu0 %2668  ;;  %v3292_v34 = vadd.f32 %v6482_v60, %v3291_v41  ;;  %v3348_v10 = vmax.f32 %v3300_v45, 0.0 }
 0x792   :  { %7274 = vst [vmem:[#allocation46_spill] sm:$0xff] %v6685_v24  ;;  %v2770_v19 = vmul.f32 0.03125, %v2708_v40  ;;  %v4402_v7 = vpop.f32.mrf.mxu1  ;;  %v2820_v6 = vmul.f32 %v6681_v38, %v6681_v38  ;;  %v2757_v39 = vmul.f32 0.03125, %v2669_v58  ;;  %v2837_v25 = vmul.f32 %v6685_v24, %v6685_v24 }
 0x793   :  { %v3303_v12 = vadd.f32 %v4402_v7, %v6482_v60  ;;  %v3346_v21 = vmax.f32 %v3292_v34, 0.0 }
 0x794   :  { %v6696_v49 = vsub.f32 %v6365_v27, %v2770_v19  ;;  %v3294_v61 = vpop.f32.mrf.mxu1  ;;  %v2856_v0 = vsel %vm414_vm2, %v2820_v6, 0.0  ;;  %v6700_v5 = vsub.f32 %v6247_v56, %v2757_v39  ;;  %v2907_v31 = vsel %vm414_vm2, %v2837_v25, 0.0 }
 0x795   :  { %v3295_v54 = vadd.f32 %v6482_v60, %v3294_v61  ;;  %2857 = vadd.xlane.f32.xlu1 %v2856_v0  ;;  %v2660_v30 = vpop.xlane.xlu1 %2659  ;;  %v3349_v18 = vmax.f32 %v3303_v12, 0.0  ;;  %2908 = vadd.xlane.f32.xlu0 %v2907_v31  ;;  %v2711_v63 = vpop.xlane.xlu0 %2710 }
 0x796   :  { %7275 = vst [vmem:[#allocation15_spill] sm:$0xff] %v6696_v49  ;;  %v2754_v14 = vmul.f32 0.03125, %v2660_v30  ;;  %v2834_v27 = vmul.f32 %v6696_v49, %v6696_v49  ;;  %v2771_v47 = vmul.f32 0.03125, %v2711_v63  ;;  %v2821_v56 = vmul.f32 %v6700_v5, %v6700_v5 }
 0x797   :  { %v3347_v33 = vmax.f32 %v3295_v54, 0.0  ;;  %v3375_v11 = vpack.c.bf16 %v3349_v18, %v3348_v10 }
 0x798   :  { %v6709_v62 = vsub.f32 %v6249_v23, %v2754_v14  ;;  %v2898_v20 = vsel %vm414_vm2, %v2834_v27, 0.0  ;;  %v6713_v13 = vsub.f32 %v6367_v57, %v2771_v47  ;;  %v2859_v41 = vsel %vm414_vm2, %v2821_v56, 0.0 }
 0x799   :  { %v3374_v4 = vpack.c.bf16 %v3347_v33, %v3346_v21  ;;  %2899 = vadd.xlane.f32.xlu1 %v2898_v20  ;;  %2860 = vadd.xlane.f32.xlu0 %v2859_v41  ;;  %v2663_v17 = vpop.xlane.xlu0 %2662  ;;  %v6736_v21 = vpop.xlane.xlu1 %2881 }
 0x79a   :  { %7276 = vst [vmem:[#allocation44_spill] sm:$0xff] %v6713_v13  ;;  %v2818_v40 = vmul.f32 %v6709_v62, %v6709_v62  ;;  %v2755_v58 = vmul.f32 0.03125, %v2663_v17  ;;  %v2835_v23 = vmul.f32 %v6713_v13, %v6713_v13 }
 0x79b   :  { %4439 = vmatprep.mubr.msk.bf16.mxu0 %vm3409_vm3, %v3374_v4 }
 0x79c   :  { %4440 = vmatmul.mubr.msk.bf16.gmra.mxu0 %vm3409_vm3, %v3375_v11  ;;  %v2850_v57 = vsel %vm414_vm2, %v2818_v40, 0.0  ;;  %v6724_v19 = vsub.f32 %v6251_v37, %v2755_v58  ;;  %v2901_v7 = vsel %vm414_vm2, %v2835_v23, 0.0 }
 0x79d   :  { %2851 = vadd.xlane.f32.xlu1 %v2850_v57  ;;  %2902 = vadd.xlane.f32.xlu0 %v2901_v7  ;;  %v6738_v47 = vpop.xlane.xlu0 %2884  ;;  %v6740_v33 = vpop.xlane.xlu1 %2875 }
 0x79e   :  { %v2819_v6 = vmul.f32 %v6724_v19, %v6724_v19 }
 0x7a0   :  { %v2853_v39 = vsel %vm414_vm2, %v2819_v6, 0.0 }
 0x7a1   :  { %2854 = vadd.xlane.f32.xlu0 %v2853_v39  ;;  %v6744_v10 = vpop.xlane.xlu0 %2878 }
 0x7b0   :  { %v6742_v56 = vpop.xlane.xlu1 %2893 }
 0x7b5   :  { %v4405_v34 = vpop.f32.mrf.mxu1  ;;  %v6748_v20 = vpop.xlane.xlu1 %2887 }
 0x7b6   :  { %v3316_v37 = vadd.f32 %v4405_v34, %v6482_v60 }
 0x7b7   :  { %v3307_v12 = vpop.f32.mrf.mxu1 }
 0x7b8   :  { %v3308_v45 = vadd.f32 %v6482_v60, %v3307_v12  ;;  %v3352_v63 = vmax.f32 %v3316_v37, 0.0 }
 0x7b9   :  { %v4406_v25 = vpop.f32.mrf.mxu1 }
 0x7ba   :  { %v3319_v61 = vadd.f32 %v4406_v25, %v6482_v60  ;;  %v3350_v30 = vmax.f32 %v3308_v45, 0.0 }
 0x7bb   :  { %v3310_v0 = vpop.f32.mrf.mxu1 }
 0x7bc   :  { %v3311_v31 = vadd.f32 %v6482_v60, %v3310_v0  ;;  %v3353_v54 = vmax.f32 %v3319_v61, 0.0  ;;  %v6746_v60 = vpop.xlane.xlu0 %2896 }
 0x7be   :  { %v3351_v18 = vmax.f32 %v3311_v31, 0.0  ;;  %v3377_v27 = vpack.c.bf16 %v3353_v54, %v3352_v63 }
 0x7c0   :  { %v3376_v14 = vpack.c.bf16 %v3351_v18, %v3350_v30  ;;  %v6752_v41 = vpop.xlane.xlu0 %2890 }
 0x7c2   :  { %4443 = vmatprep.mubr.msk.bf16.mxu0 %vm3409_vm3, %v3376_v14 }
 0x7c3   :  { %4444 = vmatmul.mubr.msk.bf16.gmra.mxu0 %vm3409_vm3, %v3377_v27 }
 0x7cf   :  { %v6770_v39 = vpop.f32.mrf.mxu0 }
 0x7d0   :  { %v6750_v4 = vpop.xlane.xlu1 %2917 }
 0x7d1   :  { %v6774_v45 = vpop.f32.mrf.mxu0 }
 0x7d3   :  { %v4418_v54 = vpop.f32.mrf.mxu0 }
 0x7d4   :  { %v6756_v17 = vpop.xlane.xlu0 %2920 }
 0x7d5   :  { %v6780_v27 = vpop.f32.mrf.mxu0 }
 0x7e0   :  { %v6754_v11 = vpop.xlane.xlu1 %2929 }
 0x7e4   :  { %v6758_v40 = vpop.xlane.xlu0 %2932  ;;  %v6760_v58 = vpop.xlane.xlu1 %2923 }
 0x7e8   :  { %v6764_v57 = vpop.xlane.xlu0 %2926 }
 0x806   :  { %v6762_v23 = vpop.xlane.xlu1 %2941 }
 0x80a   :  { %v6766_v7 = vpop.xlane.xlu1 %2935  ;;  %v6768_v6 = vpop.xlane.xlu0 %2944 }
 0x80e   :  { %v2870_v34 = vpop.xlane.xlu1 %2869  ;;  %v6772_v12 = vpop.xlane.xlu0 %2938 }
 0x80f   :  { %v2952_v25 = vmul.f32 0.03125, %v2870_v34  ;;  %v4421_v34 = vpop.f32.mrf.mxu0 }
 0x811   :  { %v2984_v61 = vadd.f32 1e-05, %v2952_v25 }
 0x812   :  { %v6776_v37 = vpop.xlane.xlu1 %2911  ;;  %v2873_v0 = vpop.xlane.xlu0 %2872 }
 0x813   :  { %4768 = vrsqrt.f32 %v2984_v61  ;;  %v2953_v31 = vmul.f32 0.03125, %v2873_v0  ;;  %v3508_v61 = vpop.f32.mrf.mxu0 }
 0x815   :  { %v2985_v30 = vadd.f32 1e-05, %v2953_v31 }
 0x816   :  { %v2864_v18 = vpop.xlane.xlu1 %2863  ;;  %v6778_v63 = vpop.xlane.xlu0 %2914 }
 0x817   :  { %v2950_v14 = vmul.f32 0.03125, %v2864_v18  ;;  %4770 = vrsqrt.f32 %v2985_v30  ;;  %v4422_v30 = vpop.f32.mrf.mxu0 }
 0x819   :  { %v2982_v49 = vadd.f32 1e-05, %v2950_v14 }
 0x81a   :  { %v6782_v13 = vpop.xlane.xlu1 %2905  ;;  %v2867_v15 = vpop.xlane.xlu0 %2866 }
 0x81b   :  { %4772 = vrsqrt.f32 %v2982_v49  ;;  %v2951_v25 = vmul.f32 0.03125, %v2867_v15  ;;  %v6792_v15 = vld [vmem:[%s7014_s12] ss:$0 sm:$0xff] }
 0x81c   :  { %v3517_v49 = vadd.f32 %v4421_v34, %v6792_v15  ;;  %v3511_v34 = vpop.f32.mrf.mxu0 }
 0x81d   :  { %v2983_v24 = vadd.f32 1e-05, %v2951_v25 }
 0x81e   :  { %v2858_v9 = vpop.xlane.xlu1 %2857  ;;  %v6784_v0 = vpop.xlane.xlu0 %2908 }
 0x81f   :  { %v2948_v31 = vmul.f32 0.03125, %v2858_v9  ;;  %4774 = vrsqrt.f32 %v2983_v24  ;;  %v3520_v9 = vadd.f32 %v4422_v30, %v6792_v15  ;;  %v4506_v30 = vld [vmem:[%s7004_s2 + $0x4] ss:$8 sps:$4 sm:$0xff]  }
 0x820   :  { %v4769_v59 = vpop.eup %4768  ;;  %3723 = vmatprep.mubr.bf16.mxu1 %v4506_v30 }
 0x821   :  { %v2980_v55 = vadd.f32 1e-05, %v2948_v31  ;;  %v3048_v42 = vmul.f32 %v4769_v59, %v6627_v46 }
 0x822   :  { %v6786_v18 = vpop.xlane.xlu1 %2899  ;;  %v2861_v22 = vpop.xlane.xlu0 %2860 }
 0x823   :  { %4776 = vrsqrt.f32 %v2980_v55  ;;  %v2949_v14 = vmul.f32 0.03125, %v2861_v22  ;;  %v6799_v22 = vadd.f32 %v3517_v49, %v3048_v42  ;;  %v3509_v42 = vadd.f32 %v6792_v15, %v3508_v61 }
 0x824   :  { %v4771_v26 = vpop.eup %4770  ;;  %v3512_v49 = vadd.f32 %v6792_v15, %v3511_v34  ;;  %v3501_v61 = vadd.f32 %v6770_v39, %v6792_v15  ;;  %v3493_v39 = vadd.f32 %v6792_v15, %v6774_v45 }
 0x825   :  { %v2981_v24 = vadd.f32 1e-05, %v2949_v14  ;;  %v3049_v31 = vmul.f32 %v4771_v26, %v6646_v44 }
 0x826   :  { %v2852_v25 = vpop.xlane.xlu1 %2851  ;;  %v6797_v53 = vpop.xlane.xlu0 %2902 }
 0x827   :  { %v2946_v55 = vmul.f32 0.03125, %v2852_v25  ;;  %4778 = vrsqrt.f32 %v2981_v24  ;;  %v6801_v46 = vadd.f32 %v3520_v9, %v3049_v31 }
 0x828   :  { %v4773_v59 = vpop.eup %4772 }
 0x829   :  { %v2978_v35 = vadd.f32 1e-05, %v2946_v55  ;;  %v3046_v44 = vmul.f32 %v4773_v59, %v6655_v2  ;;  %v3504_v59 = vadd.f32 %v4418_v54, %v6792_v15  ;;  %v3496_v54 = vadd.f32 %v6792_v15, %v6780_v27 }
 0x82a   :  { %v2855_v29 = vpop.xlane.xlu0 %2854 }
 0x82b   :  { %4780 = vrsqrt.f32 %v2978_v35  ;;  %v2947_v26 = vmul.f32 0.03125, %v2855_v29  ;;  %v6812_v25 = vadd.f32 %v3509_v42, %v3046_v44  ;;  %v2972_v29 = vmul.f32 0.03125, %v6754_v11 }
 0x82c   :  { %v4775_v14 = vpop.eup %4774 }
 0x82d   :  { %v2979_v9 = vadd.f32 1e-05, %v2947_v26  ;;  %v3047_v24 = vmul.f32 %v4775_v14, %v6673_v1  ;;  %7277 = vst [vmem:[#allocation8_spill] sm:$0xff] %v6812_v25 }
 0x82f   :  { %4782 = vrsqrt.f32 %v2979_v9  ;;  %v6814_v31 = vadd.f32 %v3512_v49, %v3047_v24 }
 0x830   :  { %v4777_v55 = vpop.eup %4776 }
 0x831   :  { %v3044_v35 = vmul.f32 %v4777_v55, %v6681_v38  ;;  %v6830_v38 = vpop.f32.mrf.mxu0 }
 0x833   :  { %v6823_v1 = vadd.f32 %v3501_v61, %v3044_v35  ;;  %v6841_v24 = vpop.f32.mrf.mxu0 }
 0x834   :  { %v4779_v2 = vpop.eup %4778 }
 0x835   :  { %v3045_v34 = vmul.f32 %v4779_v2, %v6700_v5  ;;  %7278 = vst [vmem:[#allocation17_spill] sm:$0xff] %v6823_v1  ;;  %v6845_v55 = vpop.f32.mrf.mxu0  ;;  %v2976_v1 = vmul.f32 0.03125, %v6762_v23 }
 0x837   :  { %v6825_v30 = vadd.f32 %v3504_v59, %v3045_v34  ;;  %v6847_v35 = vpop.f32.mrf.mxu0  ;;  %v3008_v11 = vadd.f32 1e-05, %v2976_v1  ;;  %v2970_v1 = vmul.f32 0.03125, %v6760_v58 }
 0x838   :  { %v4781_v26 = vpop.eup %4780 }
 0x839   :  { %7279 = vst [vmem:[#allocation14_spill] sm:$0xff] %v6825_v30  ;;  %v3042_v14 = vmul.f32 %v4781_v26, %v6709_v62  ;;  %v6849_v2 = vpop.f32.mrf.mxu0 }
 0x83b   :  { %v6837_v49 = vadd.f32 %v3493_v39, %v3042_v14  ;;  %v6851_v45 = vpop.f32.mrf.mxu0  ;;  %v2961_v39 = vmul.f32 0.03125, %v6746_v60  ;;  %v3004_v60 = vadd.f32 1e-05, %v2972_v29 }
 0x83c   :  { %v4783_v42 = vpop.eup %4782 }
 0x83d   :  { %v3043_v5 = vmul.f32 %v4783_v42, %v6724_v19  ;;  %7280 = vst [vmem:[#allocation53_spill] sm:$0xff] %v6837_v49  ;;  %v6853_v27 = vpop.f32.mrf.mxu0  ;;  %v2960_v42 = vmul.f32 0.03125, %v6742_v56  ;;  %v2993_v3 = vadd.f32 1e-05, %v2961_v39  ;;  %v2973_v49 = vmul.f32 0.03125, %v6758_v40 }
 0x83e   :  { %v2974_v56 = vmul.f32 0.03125, %v6766_v7  ;;  %v2956_v7 = vmul.f32 0.03125, %v6736_v21 }
 0x83f   :  { %v6839_v9 = vadd.f32 %v3496_v54, %v3043_v5  ;;  %v6855_v19 = vpop.f32.mrf.mxu0  ;;  %v2958_v54 = vmul.f32 0.03125, %v6748_v20  ;;  %v2959_v5 = vmul.f32 0.03125, %v6752_v41  ;;  %v2992_v44 = vadd.f32 1e-05, %v2960_v42 }
 0x840   :  { %v2977_v20 = vmul.f32 0.03125, %v6768_v6  ;;  %v3005_v41 = vadd.f32 1e-05, %v2973_v49  ;;  %v2975_v42 = vmul.f32 0.03125, %v6772_v12  ;;  %v3006_v40 = vadd.f32 1e-05, %v2974_v56 }
 0x841   :  { %7281 = vst [vmem:[#allocation55_spill] sm:$0xff] %v6839_v9  ;;  %v6857_v61 = vpop.f32.mrf.mxu0  ;;  %v2990_v9 = vadd.f32 1e-05, %v2958_v54  ;;  %v2991_v30 = vadd.f32 1e-05, %v2959_v5  ;;  %4784 = vrsqrt.f32 %v2992_v44  ;;  %v2954_v6 = vmul.f32 0.03125, %v6740_v33 }
 0x842   :  { %4786 = vrsqrt.f32 %v2993_v3  ;;  %v3009_v23 = vadd.f32 1e-05, %v2977_v20  ;;  %v3007_v54 = vadd.f32 1e-05, %v2975_v42  ;;  %v2957_v3 = vmul.f32 0.03125, %v6738_v47 }
 0x843   :  { %v6859_v59 = vpop.f32.mrf.mxu0  ;;  %4788 = vrsqrt.f32 %v2990_v9  ;;  %v2971_v12 = vmul.f32 0.03125, %v6764_v57  ;;  %v2988_v29 = vadd.f32 1e-05, %v2956_v7  ;;  %v2986_v21 = vadd.f32 1e-05, %v2954_v6 }
 0x844   :  { %4790 = vrsqrt.f32 %v2991_v30  ;;  %v2955_v49 = vmul.f32 0.03125, %v6744_v10  ;;  %v2989_v9 = vadd.f32 1e-05, %v2957_v3  ;;  %v2968_v5 = vmul.f32 0.03125, %v6750_v4 }
 0x845   :  { %v6861_v34 = vpop.f32.mrf.mxu0  ;;  %4792 = vrsqrt.f32 %v3004_v60  ;;  %v2969_v33 = vmul.f32 0.03125, %v6756_v17  ;;  %v3003_v56 = vadd.f32 1e-05, %v2971_v12  ;;  %v3002_v60 = vadd.f32 1e-05, %v2970_v1 }
 0x846   :  { %4794 = vrsqrt.f32 %v3005_v41  ;;  %v2966_v57 = vmul.f32 0.03125, %v6776_v37  ;;  %v2987_v58 = vadd.f32 1e-05, %v2955_v49  ;;  %v2967_v42 = vmul.f32 0.03125, %v6778_v63 }
 0x847   :  { %v6863_v26 = vpop.f32.mrf.mxu0  ;;  %4796 = vrsqrt.f32 %v3008_v11  ;;  %v3000_v10 = vadd.f32 1e-05, %v2968_v5  ;;  %v2964_v3 = vmul.f32 0.03125, %v6782_v13  ;;  %v2965_v12 = vmul.f32 0.03125, %v6784_v0 }
 0x848   :  { %4798 = vrsqrt.f32 %v3006_v40  ;;  %v2998_v17 = vadd.f32 1e-05, %v2966_v57  ;;  %v2999_v6 = vadd.f32 1e-05, %v2967_v42  ;;  %v3552_v5 = vadd.f32 %v6853_v27, %v6792_v15 }
 0x849   :  { %4800 = vrsqrt.f32 %v3009_v23  ;;  %v3001_v23 = vadd.f32 1e-05, %v2969_v33  ;;  %v2963_v57 = vmul.f32 0.03125, %v6797_v53  ;;  %v3549_v27 = vadd.f32 %v6849_v2, %v6792_v15 }
 0x84a   :  { %4802 = vrsqrt.f32 %v3007_v54 }
 0x84b   :  { %4804 = vrsqrt.f32 %v2988_v29 }
 0x84c   :  { %v6865_v14 = vpop.f32.mrf.mxu0  ;;  %4806 = vrsqrt.f32 %v2986_v21 }
 0x84d   :  { %4808 = vrsqrt.f32 %v2989_v9 }
 0x84e   :  { %v6871_v62 = vpop.f32.mrf.mxu0  ;;  %v4785_v47 = vpop.eup %4784  ;;  %4810 = vrsqrt.f32 %v3003_v56 }
 0x84f   :  { %v4787_v41 = vpop.eup %4786  ;;  %4812 = vrsqrt.f32 %v3002_v60  ;;  %v3056_v1 = vmul.f32 %v4785_v47, %v6533_v36  ;;  %v2996_v47 = vadd.f32 1e-05, %v2964_v3 }
 0x850   :  { %v6877_v25 = vpop.f32.mrf.mxu0  ;;  %v4789_v11 = vpop.eup %4788  ;;  %4814 = vrsqrt.f32 %v2987_v58  ;;  %v3057_v49 = vmul.f32 %v4787_v41, %v6538_v50  ;;  %v2997_v50 = vadd.f32 1e-05, %v2965_v12 }
 0x851   :  { %v4791_v40 = vpop.eup %4790  ;;  %4816 = vrsqrt.f32 %v3000_v10  ;;  %v3054_v21 = vmul.f32 %v4789_v11, %v6542_v48  ;;  %v3544_v11 = vadd.f32 %v6792_v15, %v6855_v19 }
 0x852   :  { %v6881_v39 = vpop.f32.mrf.mxu0  ;;  %v4793_v4 = vpop.eup %4792  ;;  %4818 = vrsqrt.f32 %v3001_v23  ;;  %v3055_v33 = vmul.f32 %v4791_v40, %v6552_v52  ;;  %v3634_v42 = vadd.f32 %v3552_v5, %v3057_v49 }
 0x853   :  { %v4795_v54 = vpop.eup %4794  ;;  %4820 = vrsqrt.f32 %v2998_v17  ;;  %v3068_v13 = vmul.f32 %v4793_v4, %v6575_v28 }
 0x854   :  { %v4797_v37 = vpop.eup %4796  ;;  %4822 = vrsqrt.f32 %v2999_v6  ;;  %v3069_v60 = vmul.f32 %v4795_v54, %v6580_v43  ;;  %v3633_v54 = vadd.f32 %v3549_v27, %v3056_v1 }
 0x855   :  { %v4799_v29 = vpop.eup %4798  ;;  %v3072_v36 = vmul.f32 %v4797_v37, %v6609_v16  ;;  %v2962_v16 = vmul.f32 0.03125, %v6786_v18  ;;  %4824 = vrsqrt.f32 %v2997_v50  ;;  %v3541_v18 = vadd.f32 %v6792_v15, %v6851_v45 }
 0x856   :  { %v4801_v9 = vpop.eup %4800  ;;  %v3070_v52 = vmul.f32 %v4799_v29, %v6615_v8  ;;  %4826 = vrsqrt.f32 %v2996_v47  ;;  %v3632_v29 = vadd.f32 %v3544_v11, %v3055_v33  ;;  %v7284_v47 = vld [vmem:[#allocation13_spill] sm:$0xff]  ;;  %v3525_v11 = vadd.f32 %v6792_v15, %v6841_v24 }
 0x857   :  { %v4803_v0 = vpop.eup %4802  ;;  %v3073_v58 = vmul.f32 %v4801_v9, %v6620_v32  ;;  %v2995_v32 = vadd.f32 1e-05, %v2963_v57  ;;  %v2994_v9 = vadd.f32 1e-05, %v2962_v16  ;;  %v3631_v57 = vadd.f32 %v3541_v18, %v3054_v21 }
 0x858   :  { %v3071_v53 = vmul.f32 %v4803_v0, %v6631_v51  ;;  %v4805_v40 = vpop.eup %4804  ;;  %v7282_v0 = vld [vmem:[#allocation51_spill] sm:$0xff]  ;;  %v3584_v21 = vadd.f32 %v6877_v25, %v6792_v15  ;;  %v3576_v24 = vadd.f32 %v6792_v15, %v6881_v39 }
 0x859   :  { %v4807_v17 = vpop.eup %4806  ;;  %4828 = vrsqrt.f32 %v2995_v32 }
 0x85a   :  { %v4809_v6 = vpop.eup %4808  ;;  %4830 = vrsqrt.f32 %v2994_v9 }
 0x85b   :  { %v4811_v12 = vpop.eup %4810 }
 0x85c   :  { %v6884_v44 = vpop.f32.mrf.mxu0  ;;  %v4813_v49 = vpop.eup %4812 }
 0x85d   :  { %v3597_v19 = vadd.f32 %v6884_v44, %v6792_v15  ;;  %v3052_v44 = vmul.f32 %v4805_v40, %v7282_v0  ;;  %v7287_v40 = vld [vmem:[#allocation41_spill] sm:$0xff] }
 0x85e   :  { %v6890_v30 = vpop.f32.mrf.mxu0 }
 0x85f   :  { %v3645_v33 = vadd.f32 %v3597_v19, %v3068_v13 }
 0x860   :  { %v4442_v20 = vpop.f32.mrf.mxu0 }
 0x861   :  { %v3600_v2 = vadd.f32 %v4442_v20, %v6792_v15  ;;  %v3536_v20 = vadd.f32 %v6845_v55, %v6792_v15 }
 0x862   :  { %v3591_v7 = vpop.f32.mrf.mxu0 }
 0x863   :  { %v3646_v1 = vadd.f32 %v3600_v2, %v3069_v60  ;;  %v3592_v5 = vadd.f32 %v6792_v15, %v3591_v7  ;;  %v3589_v60 = vadd.f32 %v6792_v15, %v6890_v30  ;;  %v3067_v7 = vmul.f32 %v4811_v12, %v7284_v47  ;;  %v7290_v12 = vld [vmem:[#allocation45_spill] sm:$0xff] }
 0x865   :  { %v3644_v13 = vadd.f32 %v3592_v5, %v3067_v7  ;;  %v3668_v16 = vpack.c.bf16 %v3646_v1, %v3645_v33  ;;  %v3565_v5 = vadd.f32 %v6857_v61, %v6792_v15  ;;  %v3557_v61 = vadd.f32 %v6792_v15, %v6859_v59  ;;  %v7296_v7 = vld [vmem:[#allocation15_spill] sm:$0xff] }
 0x866   :  { %v7302_v59 = vld [vmem:[#allocation55_spill] sm:$0xff] }
 0x883   :  { %v4445_v63 = vpop.f32.mrf.mxu0 }
 0x884   :  { %v3613_v48 = vadd.f32 %v4445_v63, %v6792_v15  ;;  %v3662_v63 = vpack.c.bf16 %v3634_v42, %v3633_v54  ;;  %v7289_v54 = vld [vmem:[#allocation43_spill] sm:$0xff] }
 0x885   :  { %v3604_v56 = vpop.f32.mrf.mxu0 }
 0x886   :  { %v3605_v28 = vadd.f32 %v6792_v15, %v3604_v56  ;;  %v3649_v23 = vadd.f32 %v3613_v48, %v3072_v36  ;;  %v4815_v56 = vpop.eup %4814  ;;  %v3533_v36 = vadd.f32 %v6830_v38, %v6792_v15  ;;  %v7283_v48 = vld [vmem:[#allocation9_spill] sm:$0xff]  ;;  %v7285_v38 = vld [vmem:[#allocation42_spill] sm:$0xff] }
 0x887   :  { %v4446_v41 = vpop.f32.mrf.mxu0  ;;  %v3053_v50 = vmul.f32 %v4809_v6, %v7283_v48  ;;  %v4817_v55 = vpop.eup %4816 }
 0x888   :  { %v3616_v43 = vadd.f32 %v4446_v41, %v6792_v15  ;;  %v3647_v51 = vadd.f32 %v3605_v28, %v3070_v52  ;;  %v4819_v27 = vpop.eup %4818  ;;  %v3528_v52 = vadd.f32 %v6792_v15, %v6847_v35  ;;  %v3661_v28 = vpack.c.bf16 %v3632_v29, %v3631_v57 }
 0x889   :  { %v3607_v10 = vpop.f32.mrf.mxu0  ;;  %v3630_v41 = vadd.f32 %v3536_v20, %v3053_v50  ;;  %v3629_v30 = vadd.f32 %v3533_v36, %v3052_v44  ;;  %v3581_v35 = vadd.f32 %v6865_v14, %v6792_v15  ;;  %v3065_v2 = vmul.f32 %v4819_v27, %v7287_v40  ;;  %v7293_v44 = vld [vmem:[#allocation47_spill] sm:$0xff] }
 0x88a   :  { %v3650_v8 = vadd.f32 %v3616_v43, %v3073_v58  ;;  %v3608_v4 = vadd.f32 %v6792_v15, %v3607_v10  ;;  %v3066_v58 = vmul.f32 %v4813_v49, %v7285_v38  ;;  %v4821_v43 = vpop.eup %4820  ;;  %v3064_v18 = vmul.f32 %v4817_v55, %v7289_v54  ;;  %v7291_v49 = vld [vmem:[#allocation10_spill] sm:$0xff] }
 0x88b   :  { %v4823_v42 = vpop.eup %4822  ;;  %v3660_v25 = vpack.c.bf16 %v3630_v41, %v3629_v30  ;;  %v3642_v6 = vadd.f32 %v3584_v21, %v3065_v2  ;;  %v3573_v14 = vadd.f32 %v6792_v15, %v6871_v62  ;;  %v3568_v29 = vadd.f32 %v6861_v34, %v6792_v15  ;;  %v7303_v21 = vld [vmem:[#allocation53_spill] sm:$0xff]  ;;  %v4511_v30 = vld [vmem:[%s7015_s13] sm:$0xff]  }
 0x88c   :  { %v3648_v37 = vadd.f32 %v3608_v4, %v3071_v53  ;;  %v3670_v3 = vpack.c.bf16 %v3650_v8, %v3649_v23  ;;  %v7286_v53 = vld [vmem:[#allocation11_spill] sm:$0xff]  ;;  %v3643_v23 = vadd.f32 %v3589_v60, %v3066_v58  ;;  %v7288_v8 = vld [vmem:[#allocation40_spill] sm:$0xff]  ;;  %v3063_v20 = vmul.f32 %v4823_v42, %v7290_v12  ;;  %v4510_v42 = vld [vmem:[%s7015_s13 + $0x8] sm:$0xff]  }
 0x88d   :  { %v3051_v10 = vmul.f32 %v4815_v56, %v7286_v53  ;;  %v3050_v4 = vmul.f32 %v4807_v17, %v7288_v8  ;;  %v3062_v9 = vmul.f32 %v4821_v43, %v7291_v49  ;;  %v3560_v50 = vadd.f32 %v6792_v15, %v6863_v26  ;;  %v7295_v60 = vld [vmem:[#allocation44_spill] sm:$0xff] }
 0x88e   :  { %4231 = vmatprep.subr.bf16.mxu1 %v3670_v3  ;;  %v3669_v45 = vpack.c.bf16 %v3648_v37, %v3647_v51  ;;  %v3667_v19 = vpack.c.bf16 %v3644_v13, %v3643_v23  ;;  %v4825_v37 = vpop.eup %4824  ;;  %v3641_v3 = vadd.f32 %v3581_v35, %v3064_v18  ;;  %v3640_v1 = vadd.f32 %v3576_v24, %v3063_v20  ;;  %v4504_v15 = vld [vmem:[%s7004_s2] ss:$8 sps:$4 sm:$0xff]  }
 0x88f   :  { %4232 = vmatpush3.bf16.msra.mxu1 %v3662_v63  ;;  %v3628_v32 = vadd.f32 %v3528_v52, %v3051_v10  ;;  %v3627_v51 = vadd.f32 %v3525_v11, %v3050_v4  ;;  %v4827_v63 = vpop.eup %4826  ;;  %v3639_v0 = vadd.f32 %v3573_v14, %v3062_v9  ;;  %v7294_v55 = vpack.c.bf16 %v6801_v46, %v6799_v22  ;;  %v7299_v22 = vld [vmem:[#allocation14_spill] sm:$0xff]  ;;  %v7300_v46 = vld [vmem:[#allocation17_spill] sm:$0xff]  ;;  %v3974_v24 = vld [vmem:[%s7016_s14] ss:$0 sm:$0xff] }
 0x890   :  { %4233 = vmatprep.subr.bf16.mxu1 %v3669_v45  ;;  %v3666_v39 = vpack.c.bf16 %v3642_v6, %v3641_v3  ;;  %v7292_v45 = vld [vmem:[#allocation46_spill] sm:$0xff]  ;;  %v4829_v62 = vpop.eup %4828  ;;  %v3060_v36 = vmul.f32 %v4827_v63, %v7293_v44  ;;  %v7301_v43 = vpack.c.bf16 %v7299_v22, %v7300_v46  ;;  %v7304_v13 = vpack.c.bf16 %v7302_v59, %v7303_v21 }
 0x891   :  { %v3659_v17 = vpack.c.bf16 %v3628_v32, %v3627_v51  ;;  %v3061_v56 = vmul.f32 %v4825_v37, %v7292_v45  ;;  %v3665_v34 = vpack.c.bf16 %v3640_v1, %v3639_v0  ;;  %v4831_v57 = vpop.eup %4830  ;;  %v3059_v47 = vmul.f32 %v4829_v62, %v7295_v60 }
 0x892   :  { %v3637_v33 = vadd.f32 %v3565_v5, %v3060_v36  ;;  %v3058_v27 = vmul.f32 %v4831_v57, %v7296_v7 }
 0x893   :  { %4234 = vmatpush3.bf16.msra.mxu1 %v3661_v28  ;;  %v3638_v48 = vadd.f32 %v3568_v29, %v3061_v56  ;;  %v3636_v41 = vadd.f32 %v3560_v50, %v3059_v47  ;;  %v7297_v28 = vld [vmem:[#allocation8_spill] sm:$0xff] }
 0x894   :  { %4235 = vmatprep.subr.bf16.mxu1 %v3668_v16  ;;  %v7298_v26 = vpack.c.bf16 %v6814_v31, %v7297_v28  ;;  %v3635_v38 = vadd.f32 %v3557_v61, %v3058_v27  ;;  %v4509_v31 = vld [vmem:[%s7004_s2 + $0x14] ss:$8 sps:$4 sm:$0xff]   ;;  %v4507_v16 = vld [vmem:[%s7004_s2 + $0x10] ss:$8 sps:$4 sm:$0xff]  }
 0x895   :  { %v3664_v52 = vpack.c.bf16 %v3638_v48, %v3637_v33 }
 0x896   :  { %v3663_v58 = vpack.c.bf16 %v3636_v41, %v3635_v38 }
 0x897   :  { %4236 = vmatpush3.bf16.msra.mxu1 %v3660_v25 }
 0x898   :  { %4237 = vmatprep.subr.bf16.mxu1 %v3667_v19 }
 0x89b   :  { %4238 = vmatpush3.bf16.msra.mxu1 %v3659_v17 }
 0x89c   :  { %4239 = vmatprep.subr.bf16.mxu1 %v3666_v39 }
 0x89f   :  { %4240 = vmatpush3.bf16.msra.mxu1 %v7294_v55 }
 0x8a0   :  { %4241 = vmatprep.subr.bf16.mxu1 %v3665_v34 }
 0x8a3   :  { %4242 = vmatpush3.bf16.msra.mxu1 %v7298_v26 }
 0x8a4   :  { %4243 = vmatprep.subr.bf16.mxu1 %v3664_v52 }
 0x8a7   :  { %4244 = vmatpush3.bf16.msra.mxu1 %v7301_v43 }
 0x8a8   :  { %4245 = vmatprep.subr.bf16.mxu1 %v3663_v58 }
 0x8ab   :  { %4246 = vmatpush3.bf16.msra.mxu1 %v7304_v13 }
 0x8ac   :  { %4447 = vmatprep.subr.bf16.mxu1 %v4510_v42 }
 0x8ae   :  { %3724 = vmatmul.mubr.bf16.vlgmr.msra.gmra.mxu1 %v4504_v15 }
 0x8af   :  { %3731 = vmatprep.mubr.bf16.mxu1 %v4509_v31  ;;  %4448 = vmatpush3.bf16.msra.mxu1 %v4510_v42 }
 0x8b0   :  { %4449 = vmatprep.subr.bf16.mxu1 %v4511_v30 }
 0x8b3   :  { %4450 = vmatpush3.bf16.msra.mxu1 %v4511_v30 }
 0x8b6   :  { %3732 = vmatmul.mubr.bf16.gmra.mxu1 %v4507_v16 }
 0x96e   :  { %v4247_v11 = vpop.f32.mrf.mxu1 }
 0x970   :  { %v4248_v53 = vpop.f32.mrf.mxu1 }
 0x971   :  { %v4249_v40 = vadd.f32 %v4248_v53, %v4247_v11 }
 0x972   :  { %v4250_v10 = vpop.f32.mrf.mxu1 }
 0x974   :  { %v4251_v35 = vpop.f32.mrf.mxu1 }
 0x975   :  { %v4252_v2 = vadd.f32 %v4251_v35, %v4250_v10 }
 0x976   :  { %v4253_v23 = vpop.f32.mrf.mxu1 }
 0x977   :  { %v3744_v8 = vpack.c.bf16 %v4252_v2, %v4249_v40 }
 0x978   :  { %v4254_v4 = vpop.f32.mrf.mxu1 }
 0x979   :  { %4451 = vmatprep.mubr.msk.bf16.mxu1 %vm414_vm2, %v3744_v8  ;;  %v4255_v54 = vadd.f32 %v4254_v4, %v4253_v23 }
 0x97a   :  { %v4256_v25 = vpop.f32.mrf.mxu1 }
 0x97c   :  { %v4257_v32 = vpop.f32.mrf.mxu1 }
 0x97d   :  { %v4258_v18 = vadd.f32 %v4257_v32, %v4256_v25 }
 0x97f   :  { %v3745_v6 = vpack.c.bf16 %v4258_v18, %v4255_v54 }
 0x981   :  { %4452 = vmatmul.mubr.msk.bf16.vlgmr.msra.gmra.mxu1 %vm414_vm2, %v3745_v6 }
 0xa41   :  { %v4453_v19 = vpop.f32.mrf.mxu1 }
 0xa42   :  { %v3814_v51 = vadd.f32 %v4453_v19, %v3974_v24 }
 0xa43   :  { %v3805_v37 = vpop.f32.mrf.mxu1 }
 0xa44   :  { %3822 = vst [vmem:[#allocation5 + $0x10] sm:$0xff] %v3814_v51  ;;  %v3806_v3 = vadd.f32 %v3974_v24, %v3805_v37 }
 0xa45   :  { %v4454_v14 = vpop.f32.mrf.mxu1 }
 0xa46   :  { %3820 = vst [vmem:[#allocation5] sm:$0xff] %v3806_v3  ;;  %v3817_v12 = vadd.f32 %v4454_v14, %v3974_v24 }
 0xa47   :  { %v3808_v20 = vpop.f32.mrf.mxu1 }
 0xa48   :  { %3823 = vst [vmem:[#allocation5 + $0x18] sm:$0xff] %v3817_v12  ;;  %v3809_v17 = vadd.f32 %v3974_v24, %v3808_v20 }
 0xa4a   :  { %3821 = vst [vmem:[#allocation5 + $0x8] sm:$0xff] %v3809_v17 }
 0xa4b   :  { %4863 = shalt.err (!%p4860_p9)
}
 0xa4c   :  { %s4882_s14 = smov 128   ;;  %s4883_s8 = smov 8  }
 0xa4d   :  { %3835 = dma.vmem_to_hbm [thread:$0]  %s3830_s9, 512, %s7017_s15, [#allocation4], %s4882_s14, %s4882_s14, %s4883_s8  }
 0xa4e   :  { %4874 = dma.done.wait [#allocation4], 512  }
 0xa4f   :  { %4875 = vsyncadd [#allocation4], 4294966784 }
 0xa50   :  { %3839 = vsyncpa [#allocation3], 1 }
 0xa51   :  { %3840 = vsyncpa [#allocation4], 1 }

</bundles_post_ra>
